<compile_context>
chip_gen: v5e
topology: v5e:2x2
jax: 0.10.0
libtpu: 0.0.40
codegen_flags: <defaults>
</compile_context>

<pallas_src>
import functools

import jax
import jax.numpy as jnp
from jax.experimental import pallas as pl
from jax.experimental.pallas import tpu as pltpu

LANES = 128
_EPS = 1e-5
_VMEM_LIMIT = 32 * 1024 * 1024


# ----------------------------------------------------------------------------
# helpers
# ----------------------------------------------------------------------------
def _round_up(x, m):
    return ((x + m - 1) // m) * m


def _pad_axis(x, axis, target):
    pad = target - x.shape[axis]
    if pad <= 0:
        return x
    cfg = [(0, 0)] * x.ndim
    cfg[axis] = (0, pad)
    return jnp.pad(x, cfg)


def _pick_tile_m(m):
    # Biggest tile that still leaves a few grid steps for the DMA pipeline.
    for t in (2048, 1024, 512, 256):
        if m >= 4 * t:
            return t
    return _round_up(min(m, 256), 8)


# ----------------------------------------------------------------------------
# kernels
# ----------------------------------------------------------------------------
def _mm_stats_kernel(x_ref, w_ref, y_ref, s_ref, q_ref):
    """y_tile = x_tile @ w (bf16 MXU, f32 acc); accumulate channel sum/sumsq."""
    @pl.when(pl.program_id(0) == 0)
    def _init():
        s_ref[...] = jnp.zeros_like(s_ref)
        q_ref[...] = jnp.zeros_like(q_ref)

    y = jnp.dot(x_ref[...], w_ref[...], preferred_element_type=jnp.float32)
    y_ref[...] = y.astype(y_ref.dtype)
    s_ref[...] += jnp.sum(y, axis=0, keepdims=True)
    q_ref[...] += jnp.sum(y * y, axis=0, keepdims=True)


def _bn1_relu_bn3stats_kernel(y1_ref, s1_ref, q1_ref, w3_ref,
                              out_ref, s3_ref, q3_ref, *, count, eps, pad_rows):
    """out = ReLU(BN1(y1)) stored bf16; y3 = out @ w3 is computed in VMEM only
    to accumulate the BN3 statistics (it is not written back to HBM)."""
    i = pl.program_id(0)

    @pl.when(i == 0)
    def _init():
        s3_ref[...] = jnp.zeros_like(s3_ref)
        q3_ref[...] = jnp.zeros_like(q3_ref)

    inv_n = 1.0 / count
    mean = s1_ref[...] * inv_n
    var = jnp.maximum(q1_ref[...] * inv_n - mean * mean, 0.0)
    out = jnp.maximum(
        (y1_ref[...].astype(jnp.float32) - mean) * jax.lax.rsqrt(var + eps), 0.0)

    def finish(o32):
        o = o32.astype(out_ref.dtype)
        out_ref[...] = o
        y3 = jnp.dot(o, w3_ref[...], preferred_element_type=jnp.float32)
        s3_ref[...] += jnp.sum(y3, axis=0, keepdims=True)
        q3_ref[...] += jnp.sum(y3 * y3, axis=0, keepdims=True)

    if pad_rows == 0:          # static: no padded rows at all -> no mask work
        finish(out)
    else:
        tm = out_ref.shape[0]
        last = pl.num_programs(0) - 1

        @pl.when(i < last)
        def _plain():
            finish(out)

        @pl.when(i == last)
        def _masked():
            # Only the last M tile can hold padded rows; zero them so the
            # BN3 statistics stay exact.
            row = jax.lax.broadcasted_iota(jnp.int32, (tm, 1), 0) + i * tm
            finish(jnp.where(row < count, out, 0.0))


def _mm_bn_sigmoid_kernel(x_ref, w_ref, s_ref, q_ref, o_ref, *, count, eps, c_true):
    """Branch B: recompute y3 = out @ w3 in VMEM, BN3 + sigmoid, and store only
    the true (unpadded) output channels."""
    inv_n = 1.0 / count
    mean = s_ref[...] * inv_n
    var = jnp.maximum(q_ref[...] * inv_n - mean * mean, 0.0)
    y3 = jnp.dot(x_ref[...], w_ref[...], preferred_element_type=jnp.float32)
    yn = (y3 - mean) * jax.lax.rsqrt(var + eps)
    o_ref[...] = jax.nn.sigmoid(yn)[:, :c_true]


def _bn_relu_kernel(y_ref, s_ref, q_ref, o_ref, *, count, eps, c_true):
    """Branch A finalize: BN2 (batch stats) + ReLU, true-channel-width store."""
    inv_n = 1.0 / count
    mean = s_ref[...] * inv_n
    var = jnp.maximum(q_ref[...] * inv_n - mean * mean, 0.0)
    yn = (y_ref[...].astype(jnp.float32) - mean) * jax.lax.rsqrt(var + eps)
    o_ref[...] = jnp.maximum(yn, 0.0)[:, :c_true]


def _conv3x3_stats_kernel(x_ref, w_ref, y_ref, s_ref, q_ref, slab_ref,
                          *, height, width):
    """3x3 valid conv on one image as 9 row-shifted matmuls over the flattened
    (H*W, C) slab.  Output columns >= W-2 of every row are wrap garbage that is
    masked out of the BN2 statistics and sliced off in the wrapper."""
    @pl.when(pl.program_id(0) == 0)
    def _init():
        s_ref[...] = jnp.zeros_like(s_ref)
        q_ref[...] = jnp.zeros_like(q_ref)

    hw = height * width
    how, c2pad = y_ref.shape               # how = (H-2)*W
    cpad = x_ref.shape[1]

    # Stage the image into a slab with 8 zero tail rows so every tap can use a
    # full-height static slice (the tail rows only feed masked garbage cols).
    slab_ref[pl.ds(0, hw), :] = x_ref[...]
    slab_ref[pl.ds(hw, 8), :] = jnp.zeros((8, cpad), slab_ref.dtype)

    acc = jnp.zeros((how, c2pad), jnp.float32)
    for ky in range(3):
        for kx in range(3):
            patch = slab_ref[pl.ds(ky * width + kx, how), :]
            acc = acc + jnp.dot(patch, w_ref[ky * 3 + kx],
                                preferred_element_type=jnp.float32)
    y_ref[...] = acc.astype(y_ref.dtype)

    # Valid output columns: (r % W) < W-2, generated in-kernel.
    r = jax.lax.broadcasted_iota(jnp.int32, (how, 1), 0)
    if width & (width - 1) == 0:
        ox = jnp.bitwise_and(r, width - 1)
    else:
        ox = jax.lax.rem(r, width)
    valid = ox < width - 2
    s_ref[...] += jnp.sum(jnp.where(valid, acc, 0.0), axis=0, keepdims=True)
    q_ref[...] += jnp.sum(jnp.where(valid, acc * acc, 0.0), axis=0, keepdims=True)


# ----------------------------------------------------------------------------
# full Block forward
# ----------------------------------------------------------------------------
def block_forward(x_nchw, w1, w2, w3, eps=_EPS):
    N, cin, H, W = x_nchw.shape
    hidden = w1.shape[0]
    c2 = w2.shape[0]             # 2 * hidden
    c3 = w3.shape[0]             # 4 * hidden
    Ho, Wo = H - 2, W - 2
    hw, how = H * W, Ho * W
    # TODO(synk): general (non 8-aligned) image sizes would need a padded
    # per-image layout for the conv stage.
    assert hw % 8 == 0 and how % 8 == 0

    cpad = _round_up(hidden, LANES)
    c2pad = _round_up(c2, LANES)
    c3pad = _round_up(c3, LANES)

    m = N * hw
    tm = _pick_tile_m(m)
    mpad = _round_up(m, tm)
    grid_m = mpad // tm

    m2 = N * how
    tm2 = _pick_tile_m(m2)
    m2pad = _round_up(m2, tm2)
    grid_m2 = m2pad // tm2
    count2 = N * Ho * Wo          # true pixel count for BN2

    params_arb = pltpu.CompilerParams(
        dimension_semantics=("arbitrary",), vmem_limit_bytes=_VMEM_LIMIT)
    params_par = pltpu.CompilerParams(
        dimension_semantics=("parallel",), vmem_limit_bytes=_VMEM_LIMIT)

    # conv0 = Dropout(0.25) -> Dropout2d(0.5) -> Dropout3d(0.75): identity in
    # eval.  TODO(synk): training-mode stochastic dropout is not implemented.

    # Channels-last, pixel-flattened bf16 activations (lane-dense 128-channel
    # padding); padded rows are zero so they drop out of the BN1 statistics.
    x2d = jnp.transpose(x_nchw, (0, 2, 3, 1)).reshape(m, cin)
    x2d = _pad_axis(x2d, 0, mpad).astype(jnp.bfloat16)

    w1_2d = _pad_axis(jnp.transpose(w1[:, :, 0, 0], (1, 0)), 1, cpad
                      ).astype(jnp.bfloat16)
    w3_2d = _pad_axis(
        _pad_axis(jnp.transpose(w3[:, :, 0, 0], (1, 0)), 0, cpad), 1, c3pad
    ).astype(jnp.bfloat16)
    w2_taps = jnp.transpose(w2, (2, 3, 1, 0)).reshape(9, hidden, c2)
    w2_taps = _pad_axis(_pad_axis(w2_taps, 1, cpad), 2, c2pad).astype(jnp.bfloat16)

    # ---- stage 1, pass A: conv1 (1x1) matmul + BN1 statistics, tiled over M.
    y1, s1, q1 = pl.pallas_call(
        _mm_stats_kernel,
        out_shape=(jax.ShapeDtypeStruct((mpad, cpad), jnp.bfloat16),
                   jax.ShapeDtypeStruct((1, cpad), jnp.float32),
                   jax.ShapeDtypeStruct((1, cpad), jnp.float32)),
        grid=(grid_m,),
        in_specs=[pl.BlockSpec((tm, cin), lambda i: (i, 0)),
                  pl.BlockSpec((cin, cpad), lambda i: (0, 0))],
        out_specs=(pl.BlockSpec((tm, cpad), lambda i: (i, 0)),
                   pl.BlockSpec((1, cpad), lambda i: (0, 0)),
                   pl.BlockSpec((1, cpad), lambda i: (0, 0))),
        compiler_params=params_arb,
        cost_estimate=pl.CostEstimate(
            flops=2 * mpad * cin * cpad, transcendentals=0,
            bytes_accessed=2 * (mpad * cin + cin * cpad + mpad * cpad)),
    )(x2d, w1_2d)

    # ---- stage 1, pass B: BN1 + ReLU fused with BN3 statistics (y3 stays in
    #      VMEM and is not written to HBM).
    out2d, s3, q3 = pl.pallas_call(
        functools.partial(_bn1_relu_bn3stats_kernel, count=m, eps=eps,
                          pad_rows=mpad - m),
        out_shape=(jax.ShapeDtypeStruct((mpad, cpad), jnp.bfloat16),
                   jax.ShapeDtypeStruct((1, c3pad), jnp.float32),
                   jax.ShapeDtypeStruct((1, c3pad), jnp.float32)),
        grid=(grid_m,),
        in_specs=[pl.BlockSpec((tm, cpad), lambda i: (i, 0)),
                  pl.BlockSpec((1, cpad), lambda i: (0, 0)),
                  pl.BlockSpec((1, cpad), lambda i: (0, 0)),
                  pl.BlockSpec((cpad, c3pad), lambda i: (0, 0))],
        out_specs=(pl.BlockSpec((tm, cpad), lambda i: (i, 0)),
                   pl.BlockSpec((1, c3pad), lambda i: (0, 0)),
                   pl.BlockSpec((1, c3pad), lambda i: (0, 0))),
        compiler_params=params_arb,
        cost_estimate=pl.CostEstimate(
            flops=2 * mpad * cpad * c3pad + 8 * mpad * cpad, transcendentals=0,
            bytes_accessed=2 * (2 * mpad * cpad + cpad * c3pad)),
    )(y1, s1, q1, w3_2d)

    # ---- branch B: recompute conv3, BN3 + Sigmoid, true-width f32 output.
    b2d = pl.pallas_call(
        functools.partial(_mm_bn_sigmoid_kernel, count=m, eps=eps, c_true=c3),
        out_shape=jax.ShapeDtypeStruct((mpad, c3), jnp.float32),
        grid=(grid_m,),
        in_specs=[pl.BlockSpec((tm, cpad), lambda i: (i, 0)),
                  pl.BlockSpec((cpad, c3pad), lambda i: (0, 0)),
                  pl.BlockSpec((1, c3pad), lambda i: (0, 0)),
                  pl.BlockSpec((1, c3pad), lambda i: (0, 0))],
        out_specs=pl.BlockSpec((tm, c3), lambda i: (i, 0)),
        compiler_params=params_par,
        cost_estimate=pl.CostEstimate(
            flops=2 * mpad * cpad * c3pad + 6 * mpad * c3pad,
            transcendentals=mpad * c3pad,
            bytes_accessed=2 * mpad * cpad + 4 * mpad * c3),
    )(out2d, w3_2d, s3, q3)

    # ---- branch A: conv2 (3x3 valid) in-kernel + BN2 statistics, per image.
    # TODO(synk): for very large H*W, tile this grid over output rows (with a
    # 2-row halo) instead of whole images to stay inside v7x's smaller VMEM.
    y2, s2, q2 = pl.pallas_call(
        functools.partial(_conv3x3_stats_kernel, height=H, width=W),
        out_shape=(jax.ShapeDtypeStruct((m2pad, c2pad), jnp.bfloat16),
                   jax.ShapeDtypeStruct((1, c2pad), jnp.float32),
                   jax.ShapeDtypeStruct((1, c2pad), jnp.float32)),
        grid=(N,),
        in_specs=[pl.BlockSpec((hw, cpad), lambda n: (n, 0)),
                  pl.BlockSpec((9, cpad, c2pad), lambda n: (0, 0, 0))],
        out_specs=(pl.BlockSpec((how, c2pad), lambda n: (n, 0)),
                   pl.BlockSpec((1, c2pad), lambda n: (0, 0)),
                   pl.BlockSpec((1, c2pad), lambda n: (0, 0))),
        scratch_shapes=[pltpu.VMEM((hw + 8, cpad), jnp.bfloat16)],
        compiler_params=params_arb,
        cost_estimate=pl.CostEstimate(
            flops=2 * 9 * N * how * cpad * c2pad, transcendentals=0,
            bytes_accessed=2 * (N * hw * cpad + 9 * cpad * c2pad
                                + N * how * c2pad)),
    )(out2d, w2_taps)

    # ---- branch A finalize: BN2 + ReLU, true-width f32 output.
    a2d = pl.pallas_call(
        functools.partial(_bn_relu_kernel, count=count2, eps=eps, c_true=c2),
        out_shape=jax.ShapeDtypeStruct((m2pad, c2), jnp.float32),
        grid=(grid_m2,),
        in_specs=[pl.BlockSpec((tm2, c2pad), lambda i: (i, 0)),
                  pl.BlockSpec((1, c2pad), lambda i: (0, 0)),
                  pl.BlockSpec((1, c2pad), lambda i: (0, 0))],
        out_specs=pl.BlockSpec((tm2, c2), lambda i: (i, 0)),
        compiler_params=params_par,
        cost_estimate=pl.CostEstimate(
            flops=6 * m2pad * c2pad, transcendentals=0,
            bytes_accessed=2 * m2pad * c2pad + 4 * m2pad * c2),
    )(y2, s2, q2)

    # Slice away spatial padding (channel padding already dropped in-kernel).
    branch_a = jnp.transpose(
        a2d[:m2].reshape(N, Ho, W, c2)[:, :, :Wo, :], (0, 3, 1, 2))
    branch_b = jnp.transpose(b2d[:m].reshape(N, H, W, c3), (0, 3, 1, 2))

    # TODO(synk): the original forward computes branch_a + branch_b, i.e.
    # (N,2h,H-2,W-2) + (N,4h,H,W), which is not broadcast-compatible and raises
    # in PyTorch for any valid input; the two branches are returned separately.
    return branch_a, branch_b


# ----------------------------------------------------------------------------
# plain-JAX f32 reference (numerical smoke check)
# ----------------------------------------------------------------------------
def _reference_forward(x_nchw, w1, w2, w3, eps=_EPS):
    hp = jax.lax.Precision.HIGHEST
    N, _, H, W = x_nchw.shape
    Ho, Wo = H - 2, W - 2
    x = jnp.transpose(x_nchw, (0, 2, 3, 1))

    def bn(y):
        mu = jnp.mean(y, axis=(0, 1, 2), keepdims=True)
        var = jnp.mean(jnp.square(y - mu), axis=(0, 1, 2), keepdims=True)
        return (y - mu) * jax.lax.rsqrt(var + eps)

    y1 = jnp.einsum("nhwc,oc->nhwo", x, w1[:, :, 0, 0], precision=hp)
    out = jnp.maximum(bn(y1), 0.0)

    y2 = jnp.zeros((N, Ho, Wo, w2.shape[0]), jnp.float32)
    for ky in range(3):
        for kx in range(3):
            y2 = y2 + jnp.einsum("nhwc,oc->nhwo",
                                 out[:, ky:ky + Ho, kx:kx + Wo, :],
                                 w2[:, :, ky, kx], precision=hp)
    a = jnp.maximum(bn(y2), 0.0)

    y3 = jnp.einsum("nhwc,oc->nhwo", out, w3[:, :, 0, 0], precision=hp)
    b = jax.nn.sigmoid(bn(y3))
    return jnp.transpose(a, (0, 3, 1, 2)), jnp.transpose(b, (0, 3, 1, 2))


if __name__ == "__main__":
    key = jax.random.PRNGKey(0)
    k_x, k_w1, k_w2, k_w3 = jax.random.split(key, 4)

    # Shapes consistent with the module: inp=2 -> conv1 expects inp*2=4 input
    # channels; hidden=8.
    inp, hidden = 2, 8
    N, H, W = 2, 16, 16
    cin = inp * 2

    x_nchw = jax.random.normal(k_x, (N, cin, H, W), dtype=jnp.float32)
    w1 = 0.1 * jax.random.normal(k_w1, (hidden, cin, 1, 1), dtype=jnp.float32)
    w2 = 0.1 * jax.random.normal(k_w2, (2 * hidden, hidden, 3, 3), dtype=jnp.float32)
    w3 = 0.1 * jax.random.normal(k_w3, (4 * hidden, hidden, 1, 1), dtype=jnp.float32)

    fwd = jax.jit(block_forward)
    branch_a, branch_b = fwd(x_nchw, w1, w2, w3)
    jax.block_until_ready((branch_a, branch_b))

    assert branch_a.shape == (N, 2 * hidden, H - 2, W - 2)
    assert branch_b.shape == (N, 4 * hidden, H, W)

    ref_a, ref_b = _reference_forward(x_nchw, w1, w2, w3)
    err_a = float(jnp.max(jnp.abs(branch_a - ref_a)))
    err_b = float(jnp.max(jnp.abs(branch_b - ref_b)))
    mean_a = float(jnp.mean(jnp.abs(branch_a - ref_a)))
    mean_b = float(jnp.mean(jnp.abs(branch_b - ref_b)))
    # bf16 inter-stage storage / bf16 MXU operands set the error floor vs the
    # f32 reference.
    assert err_a < 1e-1 and err_b < 1e-1, (err_a, err_b)
    assert mean_a < 2e-2 and mean_b < 2e-2, (mean_a, mean_b)

    print("KERNEL_OK")
</pallas_src>

<mosaic_0001>
module attributes {stable_mosaic.version = 11 : i64} {
  func.func @_bn1_relu_bn3stats_kernel(%arg0: i32, %arg1: memref<256x128xbf16, #tpu.memory_space<vmem>>, %arg2: memref<1x128xf32, #tpu.memory_space<vmem>>, %arg3: memref<1x128xf32, #tpu.memory_space<vmem>>, %arg4: memref<128x128xbf16, #tpu.memory_space<vmem>>, %arg5: memref<256x128xbf16, #tpu.memory_space<vmem>>, %arg6: memref<1x128xf32, #tpu.memory_space<vmem>>, %arg7: memref<1x128xf32, #tpu.memory_space<vmem>>) attributes {dimension_semantics = [#tpu.dimension_semantics<arbitrary>], iteration_bounds = array<i64: 2>, scalar_prefetch = 0 : i64, scratch_operands = 0 : i64, tpu.core_type = #tpu.core_type<tc>, window_params = [{transform_indices = @transform_0, window_bounds = array<i64: 256, 128>}, {pipeline_mode = #tpu.pipeline_mode<synchronous>, transform_indices = @transform_1, window_bounds = array<i64: 1, 128>}, {pipeline_mode = #tpu.pipeline_mode<synchronous>, transform_indices = @transform_2, window_bounds = array<i64: 1, 128>}, {pipeline_mode = #tpu.pipeline_mode<synchronous>, transform_indices = @transform_3, window_bounds = array<i64: 128, 128>}, {transform_indices = @transform_4, window_bounds = array<i64: 256, 128>}, {pipeline_mode = #tpu.pipeline_mode<synchronous>, transform_indices = @transform_5, window_bounds = array<i64: 1, 128>}, {pipeline_mode = #tpu.pipeline_mode<synchronous>, transform_indices = @transform_6, window_bounds = array<i64: 1, 128>}]} {
    %c0_i32 = arith.constant 0 : i32
    %0 = arith.cmpi eq, %arg0, %c0_i32 : i32
    %1 = arith.extui %0 : i1 to i32
    %c0_i32_0 = arith.constant 0 : i32
    %2 = arith.cmpi ne, %1, %c0_i32_0 : i32
    scf.if %2 {
      %cst_25 = arith.constant 0.000000e+00 : f32
      %39 = vector.broadcast %cst_25 : f32 to vector<1x128xf32>
      %c0_26 = arith.constant 0 : index
      %c0_27 = arith.constant 0 : index
      %40 = vector.load %arg6[%c0_26, %c0_27] : memref<1x128xf32, #tpu.memory_space<vmem>>, vector<1x128xf32>
      tpu.vector_store %arg6[%c0_26, %c0_27], %39 {strides = array<i32>} : memref<1x128xf32, #tpu.memory_space<vmem>>, vector<1x128xf32>,
      %cst_28 = arith.constant 0.000000e+00 : f32
      %41 = vector.broadcast %cst_28 : f32 to vector<1x128xf32>
      %c0_29 = arith.constant 0 : index
      %c0_30 = arith.constant 0 : index
      %42 = vector.load %arg7[%c0_29, %c0_30] : memref<1x128xf32, #tpu.memory_space<vmem>>, vector<1x128xf32>
      tpu.vector_store %arg7[%c0_29, %c0_30], %41 {strides = array<i32>} : memref<1x128xf32, #tpu.memory_space<vmem>>, vector<1x128xf32>,
    } else {
    }
    %c0 = arith.constant 0 : index
    %c0_1 = arith.constant 0 : index
    %3 = vector.load %arg2[%c0, %c0_1] : memref<1x128xf32, #tpu.memory_space<vmem>>, vector<1x128xf32>
    %cst = arith.constant 0.001953125 : f32
    %4 = vector.broadcast %cst : f32 to vector<1x128xf32>
    %5 = arith.mulf %3, %4 : vector<1x128xf32>
    %c0_2 = arith.constant 0 : index
    %c0_3 = arith.constant 0 : index
    %6 = vector.load %arg3[%c0_2, %c0_3] : memref<1x128xf32, #tpu.memory_space<vmem>>, vector<1x128xf32>
    %cst_4 = arith.constant 0.001953125 : f32
    %7 = vector.broadcast %cst_4 : f32 to vector<1x128xf32>
    %8 = arith.mulf %6, %7 : vector<1x128xf32>
    %9 = arith.mulf %5, %5 : vector<1x128xf32>
    %10 = arith.subf %8, %9 : vector<1x128xf32>
    %cst_5 = arith.constant 0.000000e+00 : f32
    %11 = vector.broadcast %cst_5 : f32 to vector<1x128xf32>
    %12 = arith.maximumf %10, %11 : vector<1x128xf32>
    %c0_6 = arith.constant 0 : index
    %c0_7 = arith.constant 0 : index
    %13 = vector.load %arg1[%c0_6, %c0_7] : memref<256x128xbf16, #tpu.memory_space<vmem>>, vector<256x128xbf16>
    %14 = arith.extf %13 : vector<256x128xbf16> to vector<256x128xf32>
    %15 = vector.broadcast %5 : vector<1x128xf32> to vector<256x128xf32>
    %16 = arith.subf %14, %15 : vector<256x128xf32>
    %cst_8 = arith.constant 9.99999974E-6 : f32
    %17 = vector.broadcast %cst_8 : f32 to vector<1x128xf32>
    %18 = arith.addf %12, %17 : vector<1x128xf32>
    %19 = math.rsqrt %18 : vector<1x128xf32>
    %20 = vector.broadcast %19 : vector<1x128xf32> to vector<256x128xf32>
    %21 = arith.mulf %16, %20 : vector<256x128xf32>
    %cst_9 = arith.constant 0.000000e+00 : f32
    %22 = vector.broadcast %cst_9 : f32 to vector<256x128xf32>
    %23 = arith.maximumf %21, %22 : vector<256x128xf32>
    %24 = arith.truncf %23 : vector<256x128xf32> to vector<256x128xbf16>
    %c0_10 = arith.constant 0 : index
    %c0_11 = arith.constant 0 : index
    %25 = vector.load %arg5[%c0_10, %c0_11] : memref<256x128xbf16, #tpu.memory_space<vmem>>, vector<256x128xbf16>
    tpu.vector_store %arg5[%c0_10, %c0_11], %24 {strides = array<i32>} : memref<256x128xbf16, #tpu.memory_space<vmem>>, vector<256x128xbf16>,
    %c0_12 = arith.constant 0 : index
    %c0_13 = arith.constant 0 : index
    %26 = vector.load %arg4[%c0_12, %c0_13] : memref<128x128xbf16, #tpu.memory_space<vmem>>, vector<128x128xbf16>
    %cst_14 = arith.constant dense<0.000000e+00> : vector<256x128xf32>
    %27 = tpu.matmul %24, %26, %cst_14 {dimension_numbers = #tpu.dot_dimension_numbers<[1], [0], [0], [1], [0, 0, 1, 1], [], []>} : vector<256x128xbf16>, vector<128x128xbf16>, vector<256x128xf32> -> vector<256x128xf32>
    %c0_15 = arith.constant 0 : index
    %c0_16 = arith.constant 0 : index
    %28 = vector.load %arg6[%c0_15, %c0_16] : memref<1x128xf32, #tpu.memory_space<vmem>>, vector<1x128xf32>
    %cst_17 = arith.constant dense<0.000000e+00> : vector<128xf32>
    %29 = vector.multi_reduction <add>, %27, %cst_17 [0] : vector<256x128xf32> to vector<128xf32>
    %30 = vector.shape_cast %29 : vector<128xf32> to vector<1x128xf32>
    %31 = arith.addf %28, %30 : vector<1x128xf32>
    %c0_18 = arith.constant 0 : index
    %c0_19 = arith.constant 0 : index
    %32 = vector.load %arg6[%c0_18, %c0_19] : memref<1x128xf32, #tpu.memory_space<vmem>>, vector<1x128xf32>
    tpu.vector_store %arg6[%c0_18, %c0_19], %31 {strides = array<i32>} : memref<1x128xf32, #tpu.memory_space<vmem>>, vector<1x128xf32>,
    %c0_20 = arith.constant 0 : index
    %c0_21 = arith.constant 0 : index
    %33 = vector.load %arg7[%c0_20, %c0_21] : memref<1x128xf32, #tpu.memory_space<vmem>>, vector<1x128xf32>
    %34 = arith.mulf %27, %27 : vector<256x128xf32>
    %cst_22 = arith.constant dense<0.000000e+00> : vector<128xf32>
    %35 = vector.multi_reduction <add>, %34, %cst_22 [0] : vector<256x128xf32> to vector<128xf32>
    %36 = vector.shape_cast %35 : vector<128xf32> to vector<1x128xf32>
    %37 = arith.addf %33, %36 : vector<1x128xf32>
    %c0_23 = arith.constant 0 : index
    %c0_24 = arith.constant 0 : index
    %38 = vector.load %arg7[%c0_23, %c0_24] : memref<1x128xf32, #tpu.memory_space<vmem>>, vector<1x128xf32>
    tpu.vector_store %arg7[%c0_23, %c0_24], %37 {strides = array<i32>} : memref<1x128xf32, #tpu.memory_space<vmem>>, vector<1x128xf32>,
    return
  }
  func.func @transform_0(%arg0: i32) -> (i32, i32) {
    %c0_i32 = arith.constant 0 : i32
    %c0_i32_0 = arith.constant 0 : i32
    return %arg0, %c0_i32 : i32, i32
  }
  func.func @transform_1(%arg0: i32) -> (i32, i32) {
    %c0_i32 = arith.constant 0 : i32
    %c0_i32_0 = arith.constant 0 : i32
    %c0_i32_1 = arith.constant 0 : i32
    return %c0_i32, %c0_i32_0 : i32, i32
  }
  func.func @transform_2(%arg0: i32) -> (i32, i32) {
    %c0_i32 = arith.constant 0 : i32
    %c0_i32_0 = arith.constant 0 : i32
    %c0_i32_1 = arith.constant 0 : i32
    return %c0_i32, %c0_i32_0 : i32, i32
  }
  func.func @transform_3(%arg0: i32) -> (i32, i32) {
    %c0_i32 = arith.constant 0 : i32
    %c0_i32_0 = arith.constant 0 : i32
    %c0_i32_1 = arith.constant 0 : i32
    return %c0_i32, %c0_i32_0 : i32, i32
  }
  func.func @transform_4(%arg0: i32) -> (i32, i32) {
    %c0_i32 = arith.constant 0 : i32
    %c0_i32_0 = arith.constant 0 : i32
    return %arg0, %c0_i32 : i32, i32
  }
  func.func @transform_5(%arg0: i32) -> (i32, i32) {
    %c0_i32 = arith.constant 0 : i32
    %c0_i32_0 = arith.constant 0 : i32
    %c0_i32_1 = arith.constant 0 : i32
    return %c0_i32, %c0_i32_0 : i32, i32
  }
  func.func @transform_6(%arg0: i32) -> (i32, i32) {
    %c0_i32 = arith.constant 0 : i32
    %c0_i32_0 = arith.constant 0 : i32
    %c0_i32_1 = arith.constant 0 : i32
    return %c0_i32, %c0_i32_0 : i32, i32
  }
}

module attributes {stable_mosaic.version = 11 : i64} {
  func.func @_mm_stats_kernel(%arg0: i32, %arg1: memref<256x4xbf16, #tpu.memory_space<vmem>>, %arg2: memref<4x128xbf16, #tpu.memory_space<vmem>>, %arg3: memref<256x128xbf16, #tpu.memory_space<vmem>>, %arg4: memref<1x128xf32, #tpu.memory_space<vmem>>, %arg5: memref<1x128xf32, #tpu.memory_space<vmem>>) attributes {dimension_semantics = [#tpu.dimension_semantics<arbitrary>], iteration_bounds = array<i64: 2>, scalar_prefetch = 0 : i64, scratch_operands = 0 : i64, tpu.core_type = #tpu.core_type<tc>, window_params = [{transform_indices = @transform_0, window_bounds = array<i64: 256, 4>}, {pipeline_mode = #tpu.pipeline_mode<synchronous>, transform_indices = @transform_1, window_bounds = array<i64: 4, 128>}, {transform_indices = @transform_2, window_bounds = array<i64: 256, 128>}, {pipeline_mode = #tpu.pipeline_mode<synchronous>, transform_indices = @transform_3, window_bounds = array<i64: 1, 128>}, {pipeline_mode = #tpu.pipeline_mode<synchronous>, transform_indices = @transform_4, window_bounds = array<i64: 1, 128>}]} {
    %c0_i32 = arith.constant 0 : i32
    %0 = arith.cmpi eq, %arg0, %c0_i32 : i32
    %1 = arith.extui %0 : i1 to i32
    %c0_i32_0 = arith.constant 0 : i32
    %2 = arith.cmpi ne, %1, %c0_i32_0 : i32
    scf.if %2 {
      %cst_16 = arith.constant 0.000000e+00 : f32
      %19 = vector.broadcast %cst_16 : f32 to vector<1x128xf32>
      %c0_17 = arith.constant 0 : index
      %c0_18 = arith.constant 0 : index
      %20 = vector.load %arg4[%c0_17, %c0_18] : memref<1x128xf32, #tpu.memory_space<vmem>>, vector<1x128xf32>
      tpu.vector_store %arg4[%c0_17, %c0_18], %19 {strides = array<i32>} : memref<1x128xf32, #tpu.memory_space<vmem>>, vector<1x128xf32>,
      %cst_19 = arith.constant 0.000000e+00 : f32
      %21 = vector.broadcast %cst_19 : f32 to vector<1x128xf32>
      %c0_20 = arith.constant 0 : index
      %c0_21 = arith.constant 0 : index
      %22 = vector.load %arg5[%c0_20, %c0_21] : memref<1x128xf32, #tpu.memory_space<vmem>>, vector<1x128xf32>
      tpu.vector_store %arg5[%c0_20, %c0_21], %21 {strides = array<i32>} : memref<1x128xf32, #tpu.memory_space<vmem>>, vector<1x128xf32>,
    } else {
    }
    %c0 = arith.constant 0 : index
    %c0_1 = arith.constant 0 : index
    %3 = vector.load %arg1[%c0, %c0_1] : memref<256x4xbf16, #tpu.memory_space<vmem>>, vector<256x4xbf16>
    %c0_2 = arith.constant 0 : index
    %c0_3 = arith.constant 0 : index
    %4 = vector.load %arg2[%c0_2, %c0_3] : memref<4x128xbf16, #tpu.memory_space<vmem>>, vector<4x128xbf16>
    %cst = arith.constant dense<0.000000e+00> : vector<256x128xf32>
    %5 = tpu.matmul %3, %4, %cst {dimension_numbers = #tpu.dot_dimension_numbers<[1], [0], [0], [1], [0, 0, 1, 1], [], []>} : vector<256x4xbf16>, vector<4x128xbf16>, vector<256x128xf32> -> vector<256x128xf32>
    %6 = arith.truncf %5 : vector<256x128xf32> to vector<256x128xbf16>
    %c0_4 = arith.constant 0 : index
    %c0_5 = arith.constant 0 : index
    %7 = vector.load %arg3[%c0_4, %c0_5] : memref<256x128xbf16, #tpu.memory_space<vmem>>, vector<256x128xbf16>
    tpu.vector_store %arg3[%c0_4, %c0_5], %6 {strides = array<i32>} : memref<256x128xbf16, #tpu.memory_space<vmem>>, vector<256x128xbf16>,
    %c0_6 = arith.constant 0 : index
    %c0_7 = arith.constant 0 : index
    %8 = vector.load %arg4[%c0_6, %c0_7] : memref<1x128xf32, #tpu.memory_space<vmem>>, vector<1x128xf32>
    %cst_8 = arith.constant dense<0.000000e+00> : vector<128xf32>
    %9 = vector.multi_reduction <add>, %5, %cst_8 [0] : vector<256x128xf32> to vector<128xf32>
    %10 = vector.shape_cast %9 : vector<128xf32> to vector<1x128xf32>
    %11 = arith.addf %8, %10 : vector<1x128xf32>
    %c0_9 = arith.constant 0 : index
    %c0_10 = arith.constant 0 : index
    %12 = vector.load %arg4[%c0_9, %c0_10] : memref<1x128xf32, #tpu.memory_space<vmem>>, vector<1x128xf32>
    tpu.vector_store %arg4[%c0_9, %c0_10], %11 {strides = array<i32>} : memref<1x128xf32, #tpu.memory_space<vmem>>, vector<1x128xf32>,
    %c0_11 = arith.constant 0 : index
    %c0_12 = arith.constant 0 : index
    %13 = vector.load %arg5[%c0_11, %c0_12] : memref<1x128xf32, #tpu.memory_space<vmem>>, vector<1x128xf32>
    %14 = arith.mulf %5, %5 : vector<256x128xf32>
    %cst_13 = arith.constant dense<0.000000e+00> : vector<128xf32>
    %15 = vector.multi_reduction <add>, %14, %cst_13 [0] : vector<256x128xf32> to vector<128xf32>
    %16 = vector.shape_cast %15 : vector<128xf32> to vector<1x128xf32>
    %17 = arith.addf %13, %16 : vector<1x128xf32>
    %c0_14 = arith.constant 0 : index
    %c0_15 = arith.constant 0 : index
    %18 = vector.load %arg5[%c0_14, %c0_15] : memref<1x128xf32, #tpu.memory_space<vmem>>, vector<1x128xf32>
    tpu.vector_store %arg5[%c0_14, %c0_15], %17 {strides = array<i32>} : memref<1x128xf32, #tpu.memory_space<vmem>>, vector<1x128xf32>,
    return
  }
  func.func @transform_0(%arg0: i32) -> (i32, i32) {
    %c0_i32 = arith.constant 0 : i32
    %c0_i32_0 = arith.constant 0 : i32
    return %arg0, %c0_i32 : i32, i32
  }
  func.func @transform_1(%arg0: i32) -> (i32, i32) {
    %c0_i32 = arith.constant 0 : i32
    %c0_i32_0 = arith.constant 0 : i32
    %c0_i32_1 = arith.constant 0 : i32
    return %c0_i32, %c0_i32_0 : i32, i32
  }
  func.func @transform_2(%arg0: i32) -> (i32, i32) {
    %c0_i32 = arith.constant 0 : i32
    %c0_i32_0 = arith.constant 0 : i32
    return %arg0, %c0_i32 : i32, i32
  }
  func.func @transform_3(%arg0: i32) -> (i32, i32) {
    %c0_i32 = arith.constant 0 : i32
    %c0_i32_0 = arith.constant 0 : i32
    %c0_i32_1 = arith.constant 0 : i32
    return %c0_i32, %c0_i32_0 : i32, i32
  }
  func.func @transform_4(%arg0: i32) -> (i32, i32) {
    %c0_i32 = arith.constant 0 : i32
    %c0_i32_0 = arith.constant 0 : i32
    %c0_i32_1 = arith.constant 0 : i32
    return %c0_i32, %c0_i32_0 : i32, i32
  }
}

module attributes {stable_mosaic.version = 11 : i64} {
  func.func @_bn_relu_kernel(%arg0: i32, %arg1: memref<256x128xbf16, #tpu.memory_space<vmem>>, %arg2: memref<1x128xf32, #tpu.memory_space<vmem>>, %arg3: memref<1x128xf32, #tpu.memory_space<vmem>>, %arg4: memref<256x16xf32, #tpu.memory_space<vmem>>) attributes {dimension_semantics = [#tpu.dimension_semantics<parallel>], iteration_bounds = array<i64: 2>, scalar_prefetch = 0 : i64, scratch_operands = 0 : i64, tpu.core_type = #tpu.core_type<tc>, window_params = [{transform_indices = @transform_0, window_bounds = array<i64: 256, 128>}, {pipeline_mode = #tpu.pipeline_mode<synchronous>, transform_indices = @transform_1, window_bounds = array<i64: 1, 128>}, {pipeline_mode = #tpu.pipeline_mode<synchronous>, transform_indices = @transform_2, window_bounds = array<i64: 1, 128>}, {transform_indices = @transform_3, window_bounds = array<i64: 256, 16>}]} {
    %c0 = arith.constant 0 : index
    %c0_0 = arith.constant 0 : index
    %0 = vector.load %arg2[%c0, %c0_0] : memref<1x128xf32, #tpu.memory_space<vmem>>, vector<1x128xf32>
    %cst = arith.constant 0.00255102036 : f32
    %1 = vector.broadcast %cst : f32 to vector<1x128xf32>
    %2 = arith.mulf %0, %1 : vector<1x128xf32>
    %c0_1 = arith.constant 0 : index
    %c0_2 = arith.constant 0 : index
    %3 = vector.load %arg3[%c0_1, %c0_2] : memref<1x128xf32, #tpu.memory_space<vmem>>, vector<1x128xf32>
    %cst_3 = arith.constant 0.00255102036 : f32
    %4 = vector.broadcast %cst_3 : f32 to vector<1x128xf32>
    %5 = arith.mulf %3, %4 : vector<1x128xf32>
    %6 = arith.mulf %2, %2 : vector<1x128xf32>
    %7 = arith.subf %5, %6 : vector<1x128xf32>
    %cst_4 = arith.constant 0.000000e+00 : f32
    %8 = vector.broadcast %cst_4 : f32 to vector<1x128xf32>
    %9 = arith.maximumf %7, %8 : vector<1x128xf32>
    %c0_5 = arith.constant 0 : index
    %c0_6 = arith.constant 0 : index
    %10 = vector.load %arg1[%c0_5, %c0_6] : memref<256x128xbf16, #tpu.memory_space<vmem>>, vector<256x128xbf16>
    %11 = arith.extf %10 : vector<256x128xbf16> to vector<256x128xf32>
    %12 = vector.broadcast %2 : vector<1x128xf32> to vector<256x128xf32>
    %13 = arith.subf %11, %12 : vector<256x128xf32>
    %cst_7 = arith.constant 9.99999974E-6 : f32
    %14 = vector.broadcast %cst_7 : f32 to vector<1x128xf32>
    %15 = arith.addf %9, %14 : vector<1x128xf32>
    %16 = math.rsqrt %15 : vector<1x128xf32>
    %17 = vector.broadcast %16 : vector<1x128xf32> to vector<256x128xf32>
    %18 = arith.mulf %13, %17 : vector<256x128xf32>
    %cst_8 = arith.constant 0.000000e+00 : f32
    %19 = vector.broadcast %cst_8 : f32 to vector<256x128xf32>
    %20 = arith.maximumf %18, %19 : vector<256x128xf32>
    %21 = vector.extract_strided_slice %20 {offsets = [0, 0], sizes = [256, 16], strides = [1, 1]} : vector<256x128xf32> to vector<256x16xf32>
    %c0_9 = arith.constant 0 : index
    %c0_10 = arith.constant 0 : index
    %22 = vector.load %arg4[%c0_9, %c0_10] : memref<256x16xf32, #tpu.memory_space<vmem>>, vector<256x16xf32>
    tpu.vector_store %arg4[%c0_9, %c0_10], %21 {strides = array<i32>} : memref<256x16xf32, #tpu.memory_space<vmem>>, vector<256x16xf32>,
    return
  }
  func.func @transform_0(%arg0: i32) -> (i32, i32) {
    %c0_i32 = arith.constant 0 : i32
    %c0_i32_0 = arith.constant 0 : i32
    return %arg0, %c0_i32 : i32, i32
  }
  func.func @transform_1(%arg0: i32) -> (i32, i32) {
    %c0_i32 = arith.constant 0 : i32
    %c0_i32_0 = arith.constant 0 : i32
    %c0_i32_1 = arith.constant 0 : i32
    return %c0_i32, %c0_i32_0 : i32, i32
  }
  func.func @transform_2(%arg0: i32) -> (i32, i32) {
    %c0_i32 = arith.constant 0 : i32
    %c0_i32_0 = arith.constant 0 : i32
    %c0_i32_1 = arith.constant 0 : i32
    return %c0_i32, %c0_i32_0 : i32, i32
  }
  func.func @transform_3(%arg0: i32) -> (i32, i32) {
    %c0_i32 = arith.constant 0 : i32
    %c0_i32_0 = arith.constant 0 : i32
    return %arg0, %c0_i32 : i32, i32
  }
}

module attributes {stable_mosaic.version = 11 : i64} {
  func.func @_conv3x3_stats_kernel(%arg0: i32, %arg1: memref<256x128xbf16, #tpu.memory_space<vmem>>, %arg2: memref<9x128x128xbf16, #tpu.memory_space<vmem>>, %arg3: memref<224x128xbf16, #tpu.memory_space<vmem>>, %arg4: memref<1x128xf32, #tpu.memory_space<vmem>>, %arg5: memref<1x128xf32, #tpu.memory_space<vmem>>, %arg6: memref<264x128xbf16, #tpu.memory_space<vmem>>) attributes {dimension_semantics = [#tpu.dimension_semantics<arbitrary>], iteration_bounds = array<i64: 2>, scalar_prefetch = 0 : i64, scratch_operands = 1 : i64, tpu.core_type = #tpu.core_type<tc>, window_params = [{transform_indices = @transform_0, window_bounds = array<i64: 256, 128>}, {pipeline_mode = #tpu.pipeline_mode<synchronous>, transform_indices = @transform_1, window_bounds = array<i64: 9, 128, 128>}, {transform_indices = @transform_2, window_bounds = array<i64: 224, 128>}, {pipeline_mode = #tpu.pipeline_mode<synchronous>, transform_indices = @transform_3, window_bounds = array<i64: 1, 128>}, {pipeline_mode = #tpu.pipeline_mode<synchronous>, transform_indices = @transform_4, window_bounds = array<i64: 1, 128>}]} {
    %c0_i32 = arith.constant 0 : i32
    %0 = arith.cmpi eq, %arg0, %c0_i32 : i32
    %1 = arith.extui %0 : i1 to i32
    %c0_i32_0 = arith.constant 0 : i32
    %2 = arith.cmpi ne, %1, %c0_i32_0 : i32
    scf.if %2 {
      %cst_60 = arith.constant 0.000000e+00 : f32
      %79 = vector.broadcast %cst_60 : f32 to vector<1x128xf32>
      %c0_61 = arith.constant 0 : index
      %c0_62 = arith.constant 0 : index
      %80 = vector.load %arg4[%c0_61, %c0_62] : memref<1x128xf32, #tpu.memory_space<vmem>>, vector<1x128xf32>
      tpu.vector_store %arg4[%c0_61, %c0_62], %79 {strides = array<i32>} : memref<1x128xf32, #tpu.memory_space<vmem>>, vector<1x128xf32>,
      %cst_63 = arith.constant 0.000000e+00 : f32
      %81 = vector.broadcast %cst_63 : f32 to vector<1x128xf32>
      %c0_64 = arith.constant 0 : index
      %c0_65 = arith.constant 0 : index
      %82 = vector.load %arg5[%c0_64, %c0_65] : memref<1x128xf32, #tpu.memory_space<vmem>>, vector<1x128xf32>
      tpu.vector_store %arg5[%c0_64, %c0_65], %81 {strides = array<i32>} : memref<1x128xf32, #tpu.memory_space<vmem>>, vector<1x128xf32>,
    } else {
    }
    %c0 = arith.constant 0 : index
    %c0_1 = arith.constant 0 : index
    %3 = vector.load %arg1[%c0, %c0_1] : memref<256x128xbf16, #tpu.memory_space<vmem>>, vector<256x128xbf16>
    %c0_2 = arith.constant 0 : index
    %c0_3 = arith.constant 0 : index
    %4 = vector.load %arg6[%c0_2, %c0_3] : memref<264x128xbf16, #tpu.memory_space<vmem>>, vector<256x128xbf16>
    tpu.vector_store %arg6[%c0_2, %c0_3], %3 {strides = array<i32>} : memref<264x128xbf16, #tpu.memory_space<vmem>>, vector<256x128xbf16>,
    %cst = arith.constant 0.000000e+00 : bf16
    %5 = vector.broadcast %cst : bf16 to vector<8x128xbf16>
    %c256 = arith.constant 256 : index
    %c0_4 = arith.constant 0 : index
    %6 = vector.load %arg6[%c256, %c0_4] : memref<264x128xbf16, #tpu.memory_space<vmem>>, vector<8x128xbf16>
    tpu.vector_store %arg6[%c256, %c0_4], %5 {strides = array<i32>} : memref<264x128xbf16, #tpu.memory_space<vmem>>, vector<8x128xbf16>,
    %cst_5 = arith.constant 0.000000e+00 : f32
    %7 = vector.broadcast %cst_5 : f32 to vector<224x128xf32>
    %c0_6 = arith.constant 0 : index
    %c0_7 = arith.constant 0 : index
    %8 = vector.load %arg6[%c0_6, %c0_7] : memref<264x128xbf16, #tpu.memory_space<vmem>>, vector<224x128xbf16>
    %c0_8 = arith.constant 0 : index
    %c0_9 = arith.constant 0 : index
    %c0_10 = arith.constant 0 : index
    %9 = vector.load %arg2[%c0_8, %c0_9, %c0_10] : memref<9x128x128xbf16, #tpu.memory_space<vmem>>, vector<1x128x128xbf16>
    %10 = vector.shape_cast %9 : vector<1x128x128xbf16> to vector<128x128xbf16>
    %cst_11 = arith.constant dense<0.000000e+00> : vector<224x128xf32>
    %11 = tpu.matmul %8, %10, %cst_11 {dimension_numbers = #tpu.dot_dimension_numbers<[1], [0], [0], [1], [0, 0, 1, 1], [], []>} : vector<224x128xbf16>, vector<128x128xbf16>, vector<224x128xf32> -> vector<224x128xf32>
    %12 = arith.addf %7, %11 : vector<224x128xf32>
    %c1 = arith.constant 1 : index
    %c0_12 = arith.constant 0 : index
    %13 = vector.load %arg6[%c1, %c0_12] : memref<264x128xbf16, #tpu.memory_space<vmem>>, vector<224x128xbf16>
    %c1_13 = arith.constant 1 : index
    %c0_14 = arith.constant 0 : index
    %c0_15 = arith.constant 0 : index
    %14 = vector.load %arg2[%c1_13, %c0_14, %c0_15] : memref<9x128x128xbf16, #tpu.memory_space<vmem>>, vector<1x128x128xbf16>
    %15 = vector.shape_cast %14 : vector<1x128x128xbf16> to vector<128x128xbf16>
    %cst_16 = arith.constant dense<0.000000e+00> : vector<224x128xf32>
    %16 = tpu.matmul %13, %15, %cst_16 {dimension_numbers = #tpu.dot_dimension_numbers<[1], [0], [0], [1], [0, 0, 1, 1], [], []>} : vector<224x128xbf16>, vector<128x128xbf16>, vector<224x128xf32> -> vector<224x128xf32>
    %17 = arith.addf %12, %16 : vector<224x128xf32>
    %c2 = arith.constant 2 : index
    %c0_17 = arith.constant 0 : index
    %18 = vector.load %arg6[%c2, %c0_17] : memref<264x128xbf16, #tpu.memory_space<vmem>>, vector<224x128xbf16>
    %c2_18 = arith.constant 2 : index
    %c0_19 = arith.constant 0 : index
    %c0_20 = arith.constant 0 : index
    %19 = vector.load %arg2[%c2_18, %c0_19, %c0_20] : memref<9x128x128xbf16, #tpu.memory_space<vmem>>, vector<1x128x128xbf16>
    %20 = vector.shape_cast %19 : vector<1x128x128xbf16> to vector<128x128xbf16>
    %cst_21 = arith.constant dense<0.000000e+00> : vector<224x128xf32>
    %21 = tpu.matmul %18, %20, %cst_21 {dimension_numbers = #tpu.dot_dimension_numbers<[1], [0], [0], [1], [0, 0, 1, 1], [], []>} : vector<224x128xbf16>, vector<128x128xbf16>, vector<224x128xf32> -> vector<224x128xf32>
    %22 = arith.addf %17, %21 : vector<224x128xf32>
    %c16 = arith.constant 16 : index
    %c0_22 = arith.constant 0 : index
    %23 = vector.load %arg6[%c16, %c0_22] : memref<264x128xbf16, #tpu.memory_space<vmem>>, vector<224x128xbf16>
    %c3 = arith.constant 3 : index
    %c0_23 = arith.constant 0 : index
    %c0_24 = arith.constant 0 : index
    %24 = vector.load %arg2[%c3, %c0_23, %c0_24] : memref<9x128x128xbf16, #tpu.memory_space<vmem>>, vector<1x128x128xbf16>
    %25 = vector.shape_cast %24 : vector<1x128x128xbf16> to vector<128x128xbf16>
    %cst_25 = arith.constant dense<0.000000e+00> : vector<224x128xf32>
    %26 = tpu.matmul %23, %25, %cst_25 {dimension_numbers = #tpu.dot_dimension_numbers<[1], [0], [0], [1], [0, 0, 1, 1], [], []>} : vector<224x128xbf16>, vector<128x128xbf16>, vector<224x128xf32> -> vector<224x128xf32>
    %27 = arith.addf %22, %26 : vector<224x128xf32>
    %c17 = arith.constant 17 : index
    %c0_26 = arith.constant 0 : index
    %28 = vector.load %arg6[%c17, %c0_26] : memref<264x128xbf16, #tpu.memory_space<vmem>>, vector<224x128xbf16>
    %c4 = arith.constant 4 : index
    %c0_27 = arith.constant 0 : index
    %c0_28 = arith.constant 0 : index
    %29 = vector.load %arg2[%c4, %c0_27, %c0_28] : memref<9x128x128xbf16, #tpu.memory_space<vmem>>, vector<1x128x128xbf16>
    %30 = vector.shape_cast %29 : vector<1x128x128xbf16> to vector<128x128xbf16>
    %cst_29 = arith.constant dense<0.000000e+00> : vector<224x128xf32>
    %31 = tpu.matmul %28, %30, %cst_29 {dimension_numbers = #tpu.dot_dimension_numbers<[1], [0], [0], [1], [0, 0, 1, 1], [], []>} : vector<224x128xbf16>, vector<128x128xbf16>, vector<224x128xf32> -> vector<224x128xf32>
    %32 = arith.addf %27, %31 : vector<224x128xf32>
    %c18 = arith.constant 18 : index
    %c0_30 = arith.constant 0 : index
    %33 = vector.load %arg6[%c18, %c0_30] : memref<264x128xbf16, #tpu.memory_space<vmem>>, vector<224x128xbf16>
    %c5 = arith.constant 5 : index
    %c0_31 = arith.constant 0 : index
    %c0_32 = arith.constant 0 : index
    %34 = vector.load %arg2[%c5, %c0_31, %c0_32] : memref<9x128x128xbf16, #tpu.memory_space<vmem>>, vector<1x128x128xbf16>
    %35 = vector.shape_cast %34 : vector<1x128x128xbf16> to vector<128x128xbf16>
    %cst_33 = arith.constant dense<0.000000e+00> : vector<224x128xf32>
    %36 = tpu.matmul %33, %35, %cst_33 {dimension_numbers = #tpu.dot_dimension_numbers<[1], [0], [0], [1], [0, 0, 1, 1], [], []>} : vector<224x128xbf16>, vector<128x128xbf16>, vector<224x128xf32> -> vector<224x128xf32>
    %37 = arith.addf %32, %36 : vector<224x128xf32>
    %c32 = arith.constant 32 : index
    %c0_34 = arith.constant 0 : index
    %38 = vector.load %arg6[%c32, %c0_34] : memref<264x128xbf16, #tpu.memory_space<vmem>>, vector<224x128xbf16>
    %c6 = arith.constant 6 : index
    %c0_35 = arith.constant 0 : index
    %c0_36 = arith.constant 0 : index
    %39 = vector.load %arg2[%c6, %c0_35, %c0_36] : memref<9x128x128xbf16, #tpu.memory_space<vmem>>, vector<1x128x128xbf16>
    %40 = vector.shape_cast %39 : vector<1x128x128xbf16> to vector<128x128xbf16>
    %cst_37 = arith.constant dense<0.000000e+00> : vector<224x128xf32>
    %41 = tpu.matmul %38, %40, %cst_37 {dimension_numbers = #tpu.dot_dimension_numbers<[1], [0], [0], [1], [0, 0, 1, 1], [], []>} : vector<224x128xbf16>, vector<128x128xbf16>, vector<224x128xf32> -> vector<224x128xf32>
    %42 = arith.addf %37, %41 : vector<224x128xf32>
    %c33 = arith.constant 33 : index
    %c0_38 = arith.constant 0 : index
    %43 = vector.load %arg6[%c33, %c0_38] : memref<264x128xbf16, #tpu.memory_space<vmem>>, vector<224x128xbf16>
    %c7 = arith.constant 7 : index
    %c0_39 = arith.constant 0 : index
    %c0_40 = arith.constant 0 : index
    %44 = vector.load %arg2[%c7, %c0_39, %c0_40] : memref<9x128x128xbf16, #tpu.memory_space<vmem>>, vector<1x128x128xbf16>
    %45 = vector.shape_cast %44 : vector<1x128x128xbf16> to vector<128x128xbf16>
    %cst_41 = arith.constant dense<0.000000e+00> : vector<224x128xf32>
    %46 = tpu.matmul %43, %45, %cst_41 {dimension_numbers = #tpu.dot_dimension_numbers<[1], [0], [0], [1], [0, 0, 1, 1], [], []>} : vector<224x128xbf16>, vector<128x128xbf16>, vector<224x128xf32> -> vector<224x128xf32>
    %47 = arith.addf %42, %46 : vector<224x128xf32>
    %c34 = arith.constant 34 : index
    %c0_42 = arith.constant 0 : index
    %48 = vector.load %arg6[%c34, %c0_42] : memref<264x128xbf16, #tpu.memory_space<vmem>>, vector<224x128xbf16>
    %c8 = arith.constant 8 : index
    %c0_43 = arith.constant 0 : index
    %c0_44 = arith.constant 0 : index
    %49 = vector.load %arg2[%c8, %c0_43, %c0_44] : memref<9x128x128xbf16, #tpu.memory_space<vmem>>, vector<1x128x128xbf16>
    %50 = vector.shape_cast %49 : vector<1x128x128xbf16> to vector<128x128xbf16>
    %cst_45 = arith.constant dense<0.000000e+00> : vector<224x128xf32>
    %51 = tpu.matmul %48, %50, %cst_45 {dimension_numbers = #tpu.dot_dimension_numbers<[1], [0], [0], [1], [0, 0, 1, 1], [], []>} : vector<224x128xbf16>, vector<128x128xbf16>, vector<224x128xf32> -> vector<224x128xf32>
    %52 = arith.addf %47, %51 : vector<224x128xf32>
    %53 = arith.truncf %52 : vector<224x128xf32> to vector<224x128xbf16>
    %c0_46 = arith.constant 0 : index
    %c0_47 = arith.constant 0 : index
    %54 = vector.load %arg3[%c0_46, %c0_47] : memref<224x128xbf16, #tpu.memory_space<vmem>>, vector<224x128xbf16>
    tpu.vector_store %arg3[%c0_46, %c0_47], %53 {strides = array<i32>} : memref<224x128xbf16, #tpu.memory_space<vmem>>, vector<224x128xbf16>,
    %55 = tpu.iota {dimensions = array<i32: 0>} : vector<224x1xi32>
    %c15_i32 = arith.constant 15 : i32
    %56 = vector.broadcast %c15_i32 : i32 to vector<224x1xi32>
    %57 = arith.andi %55, %56 : vector<224x1xi32>
    %c14_i32 = arith.constant 14 : i32
    %58 = vector.broadcast %c14_i32 : i32 to vector<224x1xi32>
    %59 = arith.cmpi slt, %57, %58 : vector<224x1xi32>
    %c0_48 = arith.constant 0 : index
    %c0_49 = arith.constant 0 : index
    %60 = vector.load %arg4[%c0_48, %c0_49] : memref<1x128xf32, #tpu.memory_space<vmem>>, vector<1x128xf32>
    %cst_50 = arith.constant 0.000000e+00 : f32
    %61 = vector.shape_cast %59 : vector<224x1xi1> to vector<224x1xi1>
    %62 = vector.broadcast %61 : vector<224x1xi1> to vector<224x128xi1>
    %63 = vector.broadcast %cst_50 : f32 to vector<224x128xf32>
    %64 = arith.select %62, %52, %63 : vector<224x128xi1>, vector<224x128xf32>
    %cst_51 = arith.constant dense<0.000000e+00> : vector<128xf32>
    %65 = vector.multi_reduction <add>, %64, %cst_51 [0] : vector<224x128xf32> to vector<128xf32>
    %66 = vector.shape_cast %65 : vector<128xf32> to vector<1x128xf32>
    %67 = arith.addf %60, %66 : vector<1x128xf32>
    %c0_52 = arith.constant 0 : index
    %c0_53 = arith.constant 0 : index
    %68 = vector.load %arg4[%c0_52, %c0_53] : memref<1x128xf32, #tpu.memory_space<vmem>>, vector<1x128xf32>
    tpu.vector_store %arg4[%c0_52, %c0_53], %67 {strides = array<i32>} : memref<1x128xf32, #tpu.memory_space<vmem>>, vector<1x128xf32>,
    %c0_54 = arith.constant 0 : index
    %c0_55 = arith.constant 0 : index
    %69 = vector.load %arg5[%c0_54, %c0_55] : memref<1x128xf32, #tpu.memory_space<vmem>>, vector<1x128xf32>
    %70 = arith.mulf %52, %52 : vector<224x128xf32>
    %cst_56 = arith.constant 0.000000e+00 : f32
    %71 = vector.shape_cast %59 : vector<224x1xi1> to vector<224x1xi1>
    %72 = vector.broadcast %71 : vector<224x1xi1> to vector<224x128xi1>
    %73 = vector.broadcast %cst_56 : f32 to vector<224x128xf32>
    %74 = arith.select %72, %70, %73 : vector<224x128xi1>, vector<224x128xf32>
    %cst_57 = arith.constant dense<0.000000e+00> : vector<128xf32>
    %75 = vector.multi_reduction <add>, %74, %cst_57 [0] : vector<224x128xf32> to vector<128xf32>
    %76 = vector.shape_cast %75 : vector<128xf32> to vector<1x128xf32>
    %77 = arith.addf %69, %76 : vector<1x128xf32>
    %c0_58 = arith.constant 0 : index
    %c0_59 = arith.constant 0 : index
    %78 = vector.load %arg5[%c0_58, %c0_59] : memref<1x128xf32, #tpu.memory_space<vmem>>, vector<1x128xf32>
    tpu.vector_store %arg5[%c0_58, %c0_59], %77 {strides = array<i32>} : memref<1x128xf32, #tpu.memory_space<vmem>>, vector<1x128xf32>,
    return
  }
  func.func @transform_0(%arg0: i32) -> (i32, i32) {
    %c0_i32 = arith.constant 0 : i32
    %c0_i32_0 = arith.constant 0 : i32
    return %arg0, %c0_i32 : i32, i32
  }
  func.func @transform_1(%arg0: i32) -> (i32, i32, i32) {
    %c0_i32 = arith.constant 0 : i32
    %c0_i32_0 = arith.constant 0 : i32
    %c0_i32_1 = arith.constant 0 : i32
    %c0_i32_2 = arith.constant 0 : i32
    return %c0_i32, %c0_i32_0, %c0_i32_1 : i32, i32, i32
  }
  func.func @transform_2(%arg0: i32) -> (i32, i32) {
    %c0_i32 = arith.constant 0 : i32
    %c0_i32_0 = arith.constant 0 : i32
    return %arg0, %c0_i32 : i32, i32
  }
  func.func @transform_3(%arg0: i32) -> (i32, i32) {
    %c0_i32 = arith.constant 0 : i32
    %c0_i32_0 = arith.constant 0 : i32
    %c0_i32_1 = arith.constant 0 : i32
    return %c0_i32, %c0_i32_0 : i32, i32
  }
  func.func @transform_4(%arg0: i32) -> (i32, i32) {
    %c0_i32 = arith.constant 0 : i32
    %c0_i32_0 = arith.constant 0 : i32
    %c0_i32_1 = arith.constant 0 : i32
    return %c0_i32, %c0_i32_0 : i32, i32
  }
}

module attributes {stable_mosaic.version = 11 : i64} {
  func.func @_mm_bn_sigmoid_kernel(%arg0: i32, %arg1: memref<256x128xbf16, #tpu.memory_space<vmem>>, %arg2: memref<128x128xbf16, #tpu.memory_space<vmem>>, %arg3: memref<1x128xf32, #tpu.memory_space<vmem>>, %arg4: memref<1x128xf32, #tpu.memory_space<vmem>>, %arg5: memref<256x32xf32, #tpu.memory_space<vmem>>) attributes {dimension_semantics = [#tpu.dimension_semantics<parallel>], iteration_bounds = array<i64: 2>, scalar_prefetch = 0 : i64, scratch_operands = 0 : i64, tpu.core_type = #tpu.core_type<tc>, window_params = [{transform_indices = @transform_0, window_bounds = array<i64: 256, 128>}, {pipeline_mode = #tpu.pipeline_mode<synchronous>, transform_indices = @transform_1, window_bounds = array<i64: 128, 128>}, {pipeline_mode = #tpu.pipeline_mode<synchronous>, transform_indices = @transform_2, window_bounds = array<i64: 1, 128>}, {pipeline_mode = #tpu.pipeline_mode<synchronous>, transform_indices = @transform_3, window_bounds = array<i64: 1, 128>}, {transform_indices = @transform_4, window_bounds = array<i64: 256, 32>}]} {
    %c0 = arith.constant 0 : index
    %c0_0 = arith.constant 0 : index
    %0 = vector.load %arg3[%c0, %c0_0] : memref<1x128xf32, #tpu.memory_space<vmem>>, vector<1x128xf32>
    %cst = arith.constant 0.001953125 : f32
    %1 = vector.broadcast %cst : f32 to vector<1x128xf32>
    %2 = arith.mulf %0, %1 : vector<1x128xf32>
    %c0_1 = arith.constant 0 : index
    %c0_2 = arith.constant 0 : index
    %3 = vector.load %arg4[%c0_1, %c0_2] : memref<1x128xf32, #tpu.memory_space<vmem>>, vector<1x128xf32>
    %cst_3 = arith.constant 0.001953125 : f32
    %4 = vector.broadcast %cst_3 : f32 to vector<1x128xf32>
    %5 = arith.mulf %3, %4 : vector<1x128xf32>
    %6 = arith.mulf %2, %2 : vector<1x128xf32>
    %7 = arith.subf %5, %6 : vector<1x128xf32>
    %cst_4 = arith.constant 0.000000e+00 : f32
    %8 = vector.broadcast %cst_4 : f32 to vector<1x128xf32>
    %9 = arith.maximumf %7, %8 : vector<1x128xf32>
    %c0_5 = arith.constant 0 : index
    %c0_6 = arith.constant 0 : index
    %10 = vector.load %arg1[%c0_5, %c0_6] : memref<256x128xbf16, #tpu.memory_space<vmem>>, vector<256x128xbf16>
    %c0_7 = arith.constant 0 : index
    %c0_8 = arith.constant 0 : index
    %11 = vector.load %arg2[%c0_7, %c0_8] : memref<128x128xbf16, #tpu.memory_space<vmem>>, vector<128x128xbf16>
    %cst_9 = arith.constant dense<0.000000e+00> : vector<256x128xf32>
    %12 = tpu.matmul %10, %11, %cst_9 {dimension_numbers = #tpu.dot_dimension_numbers<[1], [0], [0], [1], [0, 0, 1, 1], [], []>} : vector<256x128xbf16>, vector<128x128xbf16>, vector<256x128xf32> -> vector<256x128xf32>
    %13 = vector.broadcast %2 : vector<1x128xf32> to vector<256x128xf32>
    %14 = arith.subf %12, %13 : vector<256x128xf32>
    %cst_10 = arith.constant 9.99999974E-6 : f32
    %15 = vector.broadcast %cst_10 : f32 to vector<1x128xf32>
    %16 = arith.addf %9, %15 : vector<1x128xf32>
    %17 = math.rsqrt %16 : vector<1x128xf32>
    %18 = vector.broadcast %17 : vector<1x128xf32> to vector<256x128xf32>
    %19 = arith.mulf %14, %18 : vector<256x128xf32>
    %20 = arith.negf %19 : vector<256x128xf32>
    %21 = math.exp %20 : vector<256x128xf32>
    %cst_11 = arith.constant 1.000000e+00 : f32
    %22 = vector.broadcast %cst_11 : f32 to vector<256x128xf32>
    %23 = arith.addf %22, %21 : vector<256x128xf32>
    %24 = arith.divf %22, %23 : vector<256x128xf32>
    %25 = vector.extract_strided_slice %24 {offsets = [0, 0], sizes = [256, 32], strides = [1, 1]} : vector<256x128xf32> to vector<256x32xf32>
    %c0_12 = arith.constant 0 : index
    %c0_13 = arith.constant 0 : index
    %26 = vector.load %arg5[%c0_12, %c0_13] : memref<256x32xf32, #tpu.memory_space<vmem>>, vector<256x32xf32>
    tpu.vector_store %arg5[%c0_12, %c0_13], %25 {strides = array<i32>} : memref<256x32xf32, #tpu.memory_space<vmem>>, vector<256x32xf32>,
    return
  }
  func.func @transform_0(%arg0: i32) -> (i32, i32) {
    %c0_i32 = arith.constant 0 : i32
    %c0_i32_0 = arith.constant 0 : i32
    return %arg0, %c0_i32 : i32, i32
  }
  func.func @transform_1(%arg0: i32) -> (i32, i32) {
    %c0_i32 = arith.constant 0 : i32
    %c0_i32_0 = arith.constant 0 : i32
    %c0_i32_1 = arith.constant 0 : i32
    return %c0_i32, %c0_i32_0 : i32, i32
  }
  func.func @transform_2(%arg0: i32) -> (i32, i32) {
    %c0_i32 = arith.constant 0 : i32
    %c0_i32_0 = arith.constant 0 : i32
    %c0_i32_1 = arith.constant 0 : i32
    return %c0_i32, %c0_i32_0 : i32, i32
  }
  func.func @transform_3(%arg0: i32) -> (i32, i32) {
    %c0_i32 = arith.constant 0 : i32
    %c0_i32_0 = arith.constant 0 : i32
    %c0_i32_1 = arith.constant 0 : i32
    return %c0_i32, %c0_i32_0 : i32, i32
  }
  func.func @transform_4(%arg0: i32) -> (i32, i32) {
    %c0_i32 = arith.constant 0 : i32
    %c0_i32_0 = arith.constant 0 : i32
    return %arg0, %c0_i32 : i32, i32
  }
}

</mosaic_0001>

<bundles_post_ra>
// kernel: block_forward.9
= control target key start
LH: loop header
LB: loop body
LE: loop exit
PB: predicated region body
PF: predicated region fallthrough
CT: control target
= control target key end

     0   :  { %s575_s12 = smov 0   ;;  %s760_s0 = inlined_call_operand.vmem [shape: bf16[512,128], index: 0, kind: input, shape index: {}]   ;;  %s761_s1 = inlined_call_operand.vmem [shape: f32[1,128], index: 1, kind: input, shape index: {}]   ;;  %s762_s2 = inlined_call_operand.vmem [shape: f32[1,128], index: 2, kind: input, shape index: {}]   ;;  %s763_s3 = inlined_call_operand.vmem [shape: f32[512,16], index: 3, kind: output, shape index: {}]  }
   0x1 LB: > { %s447_s13 = sadd.s32 4294967295, %s553_s12   ;;  %p451_p0 = scmp.ge.s32.totalorder %s553_s12, 1  ;;  %s553_s12 = sphi %s575_s12, %s13_s12  }
   0x2   : > { %p138_p1 = scmp.lt.s32.totalorder %s553_s12, 3 }
   0x4   : > { %p139_p2 = pnand %p451_p0, %p138_p1 }
   0x5   : > { %s452_s18 = sshll.u32 (!%p139_p2), %s447_s13, 5 }
   0x6   : > { %142 = sbr.rel (%p139_p2) target bundleno = 78 (0x4e), region = 32  ;;  %p163_p3 = scmp.lt.s32.totalorder (!%p139_p2), %s452_s18, 63 }
   0xb   : > { %v174_v0 = vld [vmem:[%s761_s1] sm:$0x1]  ;;  %s767_s18 = smov (!%p163_p3, %s452_s18), 63  ;;  %vm358_vm3 = vcmask 130048  }
   0xc   : > { %v176_v1 = vld [vmem:[%s762_s2] sm:$0x1]  ;;  %v175_v2 = vmul.f32 0.0025510204, %v174_v0  ;;  %s453_s19 = sshll.u32 %s767_s18, 2  ;;  %s455_s23 = sshll.u32 %s767_s18, 3 }
   0xd   : > { %v177_v3 = vmul.f32 0.0025510204, %v176_v1  ;;  %s595_s22 = scalar_lea.vmem %s760_s0, %s453_s19  ;;  %s633_s26 = scalar_lea.vmem %s763_s3, %s455_s23 }
   0xe   : > { %v178_v4 = vmul.f32 %v175_v2, %v175_v2  ;;  %v459_v10 = vld [vmem:[%s595_s22] sm:$0xff]   ;;  %v522_v12 = vld [vmem:[%s595_s22 + $0x8] sm:$0xff]   ;;  %v523_v13 = vld [vmem:[%s595_s22 + $0x10] sm:$0xff]   ;;  %v600_v14 = vperm.slane %v175_v2, 0 }
   0xf   : > { %v524_v16 = vld [vmem:[%s595_s22 + $0x18] sm:$0xff]   ;;  %v460_v17 = vunpack.c.l.bf16 %v459_v10  ;;  %v461_v18 = vunpack.c.h.bf16 %v459_v10  ;;  %v464_v19 = vunpack.c.l.bf16 %v522_v12  ;;  %v465_v20 = vunpack.c.h.bf16 %v522_v12  ;;  %v525_v21 = vld [vmem:[%s595_s22 + $0x20] sm:$0xff]   ;;  %v526_v27 = vld [vmem:[%s595_s22 + $0x28] sm:$0xff]  }
  0x10   : > { %v179_v5 = vsub.f32 %v177_v3, %v178_v4  ;;  %v468_v23 = vunpack.c.l.bf16 %v523_v13  ;;  %v469_v24 = vunpack.c.h.bf16 %v523_v13  ;;  %v472_v26 = vunpack.c.l.bf16 %v524_v16  ;;  %v527_v32 = vld [vmem:[%s595_s22 + $0x30] sm:$0xff]   ;;  %v528_v45 = vld [vmem:[%s595_s22 + $0x38] sm:$0xff]   ;;  %v529_v58 = vld [vmem:[%s595_s22 + $0x40] sm:$0xff]  }
  0x11   : > { %v473_v29 = vunpack.c.h.bf16 %v524_v16  ;;  %v476_v30 = vunpack.c.l.bf16 %v525_v21  ;;  %v477_v31 = vunpack.c.h.bf16 %v525_v21  ;;  %v248_v33 = vsub.f32 %v460_v17, %v600_v14  ;;  %v530_v3 = vld [vmem:[%s595_s22 + $0x48] sm:$0xff]   ;;  %v531_v12 = vld [vmem:[%s595_s22 + $0x50] sm:$0xff]  }
  0x12   : > { %v180_v6 = vmax.f32 %v179_v5, 0.0  ;;  %v249_v34 = vsub.f32 %v461_v18, %v600_v14  ;;  %v250_v35 = vsub.f32 %v464_v19, %v600_v14  ;;  %v251_v36 = vsub.f32 %v465_v20, %v600_v14 }
  0x13   : > { %v252_v38 = vsub.f32 %v468_v23, %v600_v14  ;;  %v253_v39 = vsub.f32 %v469_v24, %v600_v14  ;;  %v480_v40 = vunpack.c.l.bf16 %v526_v27  ;;  %v254_v42 = vsub.f32 %v472_v26, %v600_v14 }
  0x14   : > { %v280_v7 = vadd.f32 1e-05, %v180_v6  ;;  %v481_v43 = vunpack.c.h.bf16 %v526_v27  ;;  %v484_v44 = vunpack.c.l.bf16 %v527_v32  ;;  %v255_v46 = vsub.f32 %v473_v29, %v600_v14 }
  0x15   : > { %v256_v47 = vsub.f32 %v476_v30, %v600_v14  ;;  %v257_v48 = vsub.f32 %v477_v31, %v600_v14  ;;  %v485_v49 = vunpack.c.h.bf16 %v527_v32  ;;  %v258_v56 = vsub.f32 %v480_v40, %v600_v14  ;;  %v533_v31 = vld [vmem:[%s595_s22 + $0x60] sm:$0xff]   ;;  %v534_v40 = vld [vmem:[%s595_s22 + $0x68] sm:$0xff]  }
  0x16   : > { %545 = vrsqrt.f32 %v280_v7  ;;  %vm287_vm0 = vweird.f32 %v280_v7  ;;  %v488_v57 = vunpack.c.l.bf16 %v528_v45  ;;  %v259_v1 = vsub.f32 %v481_v43, %v600_v14 }
  0x17   : > { %v489_v2 = vunpack.c.h.bf16 %v528_v45  ;;  %v260_v6 = vsub.f32 %v484_v44, %v600_v14  ;;  %v261_v10 = vsub.f32 %v485_v49, %v600_v14  ;;  %v496_v17 = vunpack.c.l.bf16 %v530_v3 }
  0x18   : > { %v262_v16 = vsub.f32 %v488_v57, %v600_v14  ;;  %v497_v21 = vunpack.c.h.bf16 %v530_v3  ;;  %v500_v26 = vunpack.c.l.bf16 %v531_v12  ;;  %v501_v30 = vunpack.c.h.bf16 %v531_v12 }
  0x19   : > { %v263_v20 = vsub.f32 %v489_v2, %v600_v14  ;;  %v508_v45 = vunpack.c.l.bf16 %v533_v31  ;;  %v509_v49 = vunpack.c.h.bf16 %v533_v31 }
  0x1a   : > { %v268_v44 = vsub.f32 %v500_v26, %v600_v14 }
  0x1b   : > { %v273_v2 = vsub.f32 %v509_v49, %v600_v14 }
  0x1c   : > { %v546_v8 = vpop.eup %545 }
  0x1d   : > { %v282_v9 = vmul.f32 %v546_v8, %v280_v7  ;;  %vm288_vm1 = vweird.f32 %v546_v8  ;;  %v492_v7 = vunpack.c.l.bf16 %v529_v58 }
  0x1e   : > { %vm604_vm2 = vmor %vm287_vm0, %vm288_vm1 }
  0x1f   : > { %v283_v11 = vmul.f32 %v546_v8, %v282_v9  ;;  %v264_v25 = vsub.f32 %v492_v7, %v600_v14 }
  0x21   : > { %v284_v15 = vmul.f32 0.5, %v283_v11  ;;  %v493_v11 = vunpack.c.h.bf16 %v529_v58  ;;  %v513_v58 = vunpack.c.h.bf16 %v534_v40 }
  0x23   : > { %v285_v22 = vsub.f32 1.5, %v284_v15  ;;  %v265_v29 = vsub.f32 %v493_v11, %v600_v14 }
  0x25   : > { %v286_v28 = vmul.f32 %v546_v8, %v285_v22  ;;  %v532_v22 = vld [vmem:[%s595_s22 + $0x58] sm:$0xff]  }
  0x27   : > { %v290_v37 = vsel %vm604_vm2, %v546_v8, %v286_v28 }
  0x28   : > { %v619_v41 = vperm.slane %v290_v37, 0 }
  0x2a   : > { %v294_v50 = vmul.f32 %v619_v41, %v248_v33  ;;  %v295_v51 = vmul.f32 %v619_v41, %v249_v34  ;;  %v296_v52 = vmul.f32 %v619_v41, %v250_v35  ;;  %v297_v53 = vmul.f32 %v619_v41, %v251_v36 }
  0x2b   : > { %v298_v54 = vmul.f32 %v619_v41, %v252_v38  ;;  %v299_v55 = vmul.f32 %v619_v41, %v253_v39  ;;  %v300_v62 = vmul.f32 %v619_v41, %v254_v42  ;;  %v301_v0 = vmul.f32 %v619_v41, %v255_v46 }
  0x2c   : > { %v326_v59 = vmax.f32 %v294_v50, 0.0  ;;  %v327_v60 = vmax.f32 %v295_v51, 0.0  ;;  %v328_v61 = vmax.f32 %v296_v52, 0.0  ;;  %v329_v63 = vmax.f32 %v297_v53, 0.0  ;;  %v535_v50 = vld [vmem:[%s595_s22 + $0x70] sm:$0xff]  }
  0x2d   : > { %v330_v4 = vmax.f32 %v298_v54, 0.0  ;;  %v302_v5 = vmul.f32 %v619_v41, %v256_v47  ;;  %v331_v8 = vmax.f32 %v299_v55, 0.0  ;;  %v303_v9 = vmul.f32 %v619_v41, %v257_v48 }
  0x2e   : > { %359 = vst.msk [vmem:[%s633_s26] sm:$0xff] %vm358_vm3, %v326_v59  ;;  %v332_v13 = vmax.f32 %v300_v62, 0.0  ;;  %v304_v15 = vmul.f32 %v619_v41, %v258_v56  ;;  %v333_v18 = vmax.f32 %v301_v0, 0.0  ;;  %v305_v19 = vmul.f32 %v619_v41, %v259_v1  ;;  %v536_v59 = vld [vmem:[%s595_s22 + $0x78] sm:$0xff]  }
  0x2f   : > { %360 = vst.msk [vmem:[%s633_s26 + $0x8] sm:$0xff] %vm358_vm3, %v327_v60  ;;  %v334_v23 = vmax.f32 %v302_v5, 0.0  ;;  %v306_v24 = vmul.f32 %v619_v41, %v260_v6  ;;  %v335_v27 = vmax.f32 %v303_v9, 0.0  ;;  %v307_v28 = vmul.f32 %v619_v41, %v261_v10 }
  0x30   : > { %361 = vst.msk [vmem:[%s633_s26 + $0x10] sm:$0xff] %vm358_vm3, %v328_v61  ;;  %v336_v32 = vmax.f32 %v304_v15, 0.0  ;;  %v308_v33 = vmul.f32 %v619_v41, %v262_v16  ;;  %v266_v34 = vsub.f32 %v496_v17, %v600_v14  ;;  %v504_v35 = vunpack.c.l.bf16 %v532_v22 }
  0x31   : > { %362 = vst.msk [vmem:[%s633_s26 + $0x18] sm:$0xff] %vm358_vm3, %v329_v63  ;;  %v337_v36 = vmax.f32 %v305_v19, 0.0  ;;  %v309_v37 = vmul.f32 %v619_v41, %v263_v20  ;;  %v267_v38 = vsub.f32 %v497_v21, %v600_v14  ;;  %v505_v39 = vunpack.c.h.bf16 %v532_v22 }
  0x32   : > { %363 = vst.msk [vmem:[%s633_s26 + $0x20] sm:$0xff] %vm358_vm3, %v330_v4  ;;  %v338_v42 = vmax.f32 %v306_v24, 0.0  ;;  %v310_v43 = vmul.f32 %v619_v41, %v264_v25  ;;  %v339_v46 = vmax.f32 %v307_v28, 0.0  ;;  %v311_v47 = vmul.f32 %v619_v41, %v265_v29 }
  0x33   : > { %364 = vst.msk [vmem:[%s633_s26 + $0x28] sm:$0xff] %vm358_vm3, %v331_v8  ;;  %v269_v48 = vsub.f32 %v501_v30, %v600_v14  ;;  %v340_v51 = vmax.f32 %v308_v33, 0.0  ;;  %v312_v52 = vmul.f32 %v619_v41, %v266_v34  ;;  %v270_v53 = vsub.f32 %v504_v35, %v600_v14 }
  0x34   : > { %365 = vst.msk [vmem:[%s633_s26 + $0x30] sm:$0xff] %vm358_vm3, %v332_v13  ;;  %v512_v54 = vunpack.c.l.bf16 %v534_v40  ;;  %v341_v55 = vmax.f32 %v309_v37, 0.0  ;;  %v313_v56 = vmul.f32 %v619_v41, %v267_v38  ;;  %v271_v57 = vsub.f32 %v505_v39, %v600_v14 }
  0x35   : > { %366 = vst.msk [vmem:[%s633_s26 + $0x38] sm:$0xff] %vm358_vm3, %v333_v18  ;;  %v342_v60 = vmax.f32 %v310_v43, 0.0  ;;  %v314_v61 = vmul.f32 %v619_v41, %v268_v44  ;;  %v272_v62 = vsub.f32 %v508_v45, %v600_v14  ;;  %v516_v63 = vunpack.c.l.bf16 %v535_v50 }
  0x36   : > { %367 = vst.msk [vmem:[%s633_s26 + $0x40] sm:$0xff] %vm358_vm3, %v334_v23  ;;  %v343_v0 = vmax.f32 %v311_v47, 0.0  ;;  %v315_v1 = vmul.f32 %v619_v41, %v269_v48  ;;  %v517_v3 = vunpack.c.h.bf16 %v535_v50  ;;  %v344_v4 = vmax.f32 %v312_v52, 0.0 }
  0x37   : > { %368 = vst.msk [vmem:[%s633_s26 + $0x48] sm:$0xff] %vm358_vm3, %v335_v27  ;;  %v316_v5 = vmul.f32 %v619_v41, %v270_v53  ;;  %v274_v6 = vsub.f32 %v512_v54, %v600_v14  ;;  %v520_v7 = vunpack.c.l.bf16 %v536_v59  ;;  %v345_v8 = vmax.f32 %v313_v56, 0.0 }
  0x38   : > { %369 = vst.msk [vmem:[%s633_s26 + $0x50] sm:$0xff] %vm358_vm3, %v336_v32  ;;  %v317_v9 = vmul.f32 %v619_v41, %v271_v57  ;;  %v275_v10 = vsub.f32 %v513_v58, %v600_v14  ;;  %v521_v11 = vunpack.c.h.bf16 %v536_v59  ;;  %v346_v12 = vmax.f32 %v314_v61, 0.0 }
  0x39   : > { %370 = vst.msk [vmem:[%s633_s26 + $0x58] sm:$0xff] %vm358_vm3, %v337_v36  ;;  %v318_v13 = vmul.f32 %v619_v41, %v272_v62  ;;  %v276_v15 = vsub.f32 %v516_v63, %v600_v14  ;;  %v347_v16 = vmax.f32 %v315_v1, 0.0  ;;  %v319_v17 = vmul.f32 %v619_v41, %v273_v2 }
  0x3a   : > { %371 = vst.msk [vmem:[%s633_s26 + $0x60] sm:$0xff] %vm358_vm3, %v338_v42  ;;  %v277_v18 = vsub.f32 %v517_v3, %v600_v14  ;;  %v348_v19 = vmax.f32 %v316_v5, 0.0  ;;  %v320_v20 = vmul.f32 %v619_v41, %v274_v6  ;;  %v278_v21 = vsub.f32 %v520_v7, %v600_v14 }
  0x3b   : > { %372 = vst.msk [vmem:[%s633_s26 + $0x68] sm:$0xff] %vm358_vm3, %v339_v46  ;;  %v349_v22 = vmax.f32 %v317_v9, 0.0  ;;  %v321_v23 = vmul.f32 %v619_v41, %v275_v10  ;;  %v279_v24 = vsub.f32 %v521_v11, %v600_v14  ;;  %v350_v25 = vmax.f32 %v318_v13, 0.0 }
  0x3c   : > { %373 = vst.msk [vmem:[%s633_s26 + $0x70] sm:$0xff] %vm358_vm3, %v340_v51  ;;  %v322_v26 = vmul.f32 %v619_v41, %v276_v15  ;;  %v351_v27 = vmax.f32 %v319_v17, 0.0  ;;  %v323_v28 = vmul.f32 %v619_v41, %v277_v18  ;;  %v352_v29 = vmax.f32 %v320_v20, 0.0 }
  0x3d   : > { %374 = vst.msk [vmem:[%s633_s26 + $0x78] sm:$0xff] %vm358_vm3, %v341_v55  ;;  %v324_v14 = vmul.f32 %v619_v41, %v278_v21  ;;  %v353_v30 = vmax.f32 %v321_v23, 0.0  ;;  %v325_v31 = vmul.f32 %v619_v41, %v279_v24 }
  0x3e   : > { %375 = vst.msk [vmem:[%s633_s26 + $0x80] sm:$0xff] %vm358_vm3, %v342_v60  ;;  %v354_v32 = vmax.f32 %v322_v26, 0.0  ;;  %v355_v33 = vmax.f32 %v323_v28, 0.0 }
  0x3f   : > { %376 = vst.msk [vmem:[%s633_s26 + $0x88] sm:$0xff] %vm358_vm3, %v343_v0  ;;  %v356_v34 = vmax.f32 %v324_v14, 0.0  ;;  %v357_v35 = vmax.f32 %v325_v31, 0.0 }
  0x40   : > { %377 = vst.msk [vmem:[%s633_s26 + $0x90] sm:$0xff] %vm358_vm3, %v344_v4 }
  0x41   : > { %378 = vst.msk [vmem:[%s633_s26 + $0x98] sm:$0xff] %vm358_vm3, %v345_v8 }
  0x42   : > { %379 = vst.msk [vmem:[%s633_s26 + $0xa0] sm:$0xff] %vm358_vm3, %v346_v12 }
  0x43   : > { %380 = vst.msk [vmem:[%s633_s26 + $0xa8] sm:$0xff] %vm358_vm3, %v347_v16 }
  0x44   : > { %381 = vst.msk [vmem:[%s633_s26 + $0xb0] sm:$0xff] %vm358_vm3, %v348_v19 }
  0x45   : > { %382 = vst.msk [vmem:[%s633_s26 + $0xb8] sm:$0xff] %vm358_vm3, %v349_v22 }
  0x46   : > { %383 = vst.msk [vmem:[%s633_s26 + $0xc0] sm:$0xff] %vm358_vm3, %v350_v25 }
  0x47   : > { %384 = vst.msk [vmem:[%s633_s26 + $0xc8] sm:$0xff] %vm358_vm3, %v351_v27 }
  0x48   : > { %385 = vst.msk [vmem:[%s633_s26 + $0xd0] sm:$0xff] %vm358_vm3, %v352_v29 }
  0x49   : > { %386 = vst.msk [vmem:[%s633_s26 + $0xd8] sm:$0xff] %vm358_vm3, %v353_v30 }
  0x4a   : > { %387 = vst.msk [vmem:[%s633_s26 + $0xe0] sm:$0xff] %vm358_vm3, %v354_v32 }
  0x4b   : > { %388 = vst.msk [vmem:[%s633_s26 + $0xe8] sm:$0xff] %vm358_vm3, %v355_v33 }
  0x4c   : > { %389 = vst.msk [vmem:[%s633_s26 + $0xf0] sm:$0xff] %vm358_vm3, %v356_v34 }
  0x4d   : > { %390 = vst.msk [vmem:[%s633_s26 + $0xf8] sm:$0xff] %vm358_vm3, %v357_v35 }
  0x4e PF: > { %s13_s12 = sadd.s32 1, %s553_s12  }
  0x4f   : > { %p10_p4 = scmp.ge.s32.totalorder %s13_s12, 4  }
  0x51   :  { %12 = sbr.rel (!%p10_p4) target bundleno = 1 (0x1), region = 62 }

// kernel: block_forward.6
= control target key start
LH: loop header
LB: loop body
LE: loop exit
PB: predicated region body
PF: predicated region fallthrough
CT: control target
= control target key end

     0   :  { %s1238_s21 = smov 0   ;;  %s1483_s0 = inlined_call_operand.vmem [shape: bf16[512,128], index: 0, kind: input, shape index: {}]   ;;  %s1484_s1 = inlined_call_operand.vmem [shape: f32[1,128], index: 1, kind: input, shape index: {}]   ;;  %s1485_s2 = inlined_call_operand.vmem [shape: f32[1,128], index: 2, kind: input, shape index: {}]   ;;  %s1486_s3 = inlined_call_operand.vmem [shape: bf16[128,128], index: 3, kind: input, shape index: {}]   ;;  %s1487_s4 = inlined_call_operand.vmem [shape: bf16[512,128], index: 4, kind: output, shape index: {0}]   ;;  %s1488_s5 = inlined_call_operand.vmem [shape: f32[1,128], index: 5, kind: output, shape index: {1}]   ;;  %s1489_s6 = inlined_call_operand.vmem [shape: f32[1,128], index: 6, kind: output, shape index: {2}]  }
   0x1 LB: > { %s933_s22 = sadd.s32 4294967295, %s1200_s21   ;;  %p937_p0 = scmp.ge.s32.totalorder %s1200_s21, 1  ;;  %s1200_s21 = sphi %s1238_s21, %s17_s21  }
   0x2   : > { %p208_p1 = scmp.lt.s32.totalorder %s1200_s21, 3 }
   0x4   : > { %p209_p2 = pnand %p937_p0, %p208_p1 }
   0x5   : > { %s938_s23 = sshll.u32 (!%p209_p2), %s933_s22, 5  ;;  %p942_p4 = scmp.ne.s32.totalorder (!%p209_p2), %s933_s22, 0 }
   0x6   : > { %212 = sbr.rel (%p209_p2) target bundleno = 309 (0x135), region = 36  ;;  %p239_p3 = scmp.lt.s32.totalorder (!%p209_p2), %s938_s23, 63 }
   0xb   : > { %s1493_s23 = smov (!%p239_p3, %s938_s23), 63  ;;  %253 = sbr.rel (%p942_p4) target bundleno = 19 (0x13), region = 40 }
   0xc   : > { %s939_s24 = sshll.u32 %s1493_s23, 2 }
   0xd   : > { %s1249_s27 = scalar_lea.vmem %s1483_s0, %s939_s24  ;;  %s1254_s30 = scalar_lea.vmem %s1487_s4, %s939_s24 }
  0x10   : > { %v1202_v0 = vmov 0.0  }
  0x11   : > { %254 = vst [vmem:[%s1488_s5] sm:$0x1] %v1202_v0 }
  0x12   : > { %255 = vst [vmem:[%s1489_s6] sm:$0x1] %v1202_v0 }
  0x13 PF: > { %v984_v1 = vld [vmem:[%s1486_s3 + $0x38] sm:$0xff]  ;;  %v983_v2 = vld [vmem:[%s1486_s3 + $0x30] sm:$0xff]  ;;  %v256_v3 = vld [vmem:[%s1484_s1] sm:$0x1] }
  0x14   : > { %664 = vmatpush.bf16.msra.mxu0 %v984_v1  ;;  %1159 = vmatpush.bf16.msra.mxu1 %v984_v1  ;;  %v257_v4 = vmul.f32 0.001953125, %v256_v3  ;;  %v258_v5 = vld [vmem:[%s1485_s2] sm:$0x1]  ;;  %v982_v8 = vld [vmem:[%s1486_s3 + $0x28] sm:$0xff]  ;;  %v980_v13 = vld [vmem:[%s1486_s3 + $0x18] sm:$0xff] }
  0x15   : > { %1160 = vmatpush.bf16.msra.mxu2 %v984_v1  ;;  %1161 = vmatpush.bf16.msra.mxu3 %v984_v1  ;;  %v259_v6 = vmul.f32 0.001953125, %v258_v5  ;;  %v981_v11 = vld [vmem:[%s1486_s3 + $0x20] sm:$0xff]  ;;  %v979_v14 = vld [vmem:[%s1486_s3 + $0x10] sm:$0xff]  ;;  %v978_v19 = vld [vmem:[%s1486_s3 + $0x8] sm:$0xff] }
  0x16   : > { %v260_v7 = vmul.f32 %v257_v4, %v257_v4  ;;  %v986_v16 = vld [vmem:[%s1249_s27] sm:$0xff]   ;;  %v1129_v21 = vld [vmem:[%s1249_s27 + $0x8] sm:$0xff]   ;;  %v1292_v24 = vperm.slane %v257_v4, 0  ;;  %v1130_v44 = vld [vmem:[%s1249_s27 + $0x10] sm:$0xff]  }
  0x17   : > { %v1132_v18 = vld [vmem:[%s1249_s27 + $0x20] sm:$0xff]   ;;  %v987_v22 = vunpack.c.l.bf16 %v986_v16  ;;  %v988_v23 = vunpack.c.h.bf16 %v986_v16  ;;  %v1133_v29 = vld [vmem:[%s1249_s27 + $0x28] sm:$0xff]   ;;  %v991_v30 = vunpack.c.l.bf16 %v1129_v21  ;;  %v992_v31 = vunpack.c.h.bf16 %v1129_v21 }
  0x18   : > { %665 = vmatpush.bf16.msra.mxu0 %v983_v2  ;;  %1162 = vmatpush.bf16.msra.mxu1 %v983_v2  ;;  %v261_v9 = vsub.f32 %v259_v6, %v260_v7  ;;  %v1003_v25 = vunpack.c.l.bf16 %v1132_v18  ;;  %v1136_v26 = vld [vmem:[%s1249_s27 + $0x40] sm:$0xff]   ;;  %v1004_v28 = vunpack.c.h.bf16 %v1132_v18  ;;  %v1007_v38 = vunpack.c.l.bf16 %v1133_v29  ;;  %v1315_v52 = vld [vmem:[%s1249_s27 + $0x48] sm:$0xff]  }
  0x19   : > { %1163 = vmatpush.bf16.msra.mxu2 %v983_v2  ;;  %1164 = vmatpush.bf16.msra.mxu3 %v983_v2  ;;  %v977_v32 = vld [vmem:[%s1486_s3] sm:$0xff]  ;;  %v1019_v34 = vunpack.c.l.bf16 %v1136_v26  ;;  %v1020_v35 = vunpack.c.h.bf16 %v1136_v26  ;;  %v330_v36 = vsub.f32 %v987_v22, %v1292_v24  ;;  %v1008_v39 = vunpack.c.h.bf16 %v1133_v29 }
  0x1a   : > { %v262_v10 = vmax.f32 %v261_v9, 0.0  ;;  %v331_v40 = vsub.f32 %v988_v23, %v1292_v24  ;;  %v338_v42 = vsub.f32 %v1003_v25, %v1292_v24  ;;  %v339_v43 = vsub.f32 %v1004_v28, %v1292_v24  ;;  %v1318_v53 = vld [vmem:[%s1249_s27 + $0x60] sm:$0xff]  }
  0x1b   : > { %v332_v45 = vsub.f32 %v991_v30, %v1292_v24  ;;  %v333_v46 = vsub.f32 %v992_v31, %v1292_v24  ;;  %v995_v47 = vunpack.c.l.bf16 %v1130_v44  ;;  %v996_v48 = vunpack.c.h.bf16 %v1130_v44 }
  0x1c   : > { %666 = vmatpush.bf16.msra.mxu0 %v982_v8  ;;  %1165 = vmatpush.bf16.msra.mxu1 %v982_v8  ;;  %v362_v12 = vadd.f32 1e-05, %v262_v10  ;;  %v346_v50 = vsub.f32 %v1019_v34, %v1292_v24  ;;  %v347_v51 = vsub.f32 %v1020_v35, %v1292_v24  ;;  %v340_v55 = vsub.f32 %v1007_v38, %v1292_v24 }
  0x1d   : > { %1166 = vmatpush.bf16.msra.mxu2 %v982_v8  ;;  %1167 = vmatpush.bf16.msra.mxu3 %v982_v8  ;;  %v341_v56 = vsub.f32 %v1008_v39, %v1292_v24  ;;  %v334_v57 = vsub.f32 %v995_v47, %v1292_v24  ;;  %v335_v58 = vsub.f32 %v996_v48, %v1292_v24  ;;  %v1023_v59 = vunpack.c.l.bf16 %v1315_v52 }
  0x1e   : > { %1192 = vrsqrt.f32 %v362_v12  ;;  %vm369_vm0 = vweird.f32 %v362_v12  ;;  %v1024_v60 = vunpack.c.h.bf16 %v1315_v52  ;;  %v1035_v61 = vunpack.c.l.bf16 %v1318_v53 }
  0x1f   : > { %v1036_v30 = vunpack.c.h.bf16 %v1318_v53  ;;  %v348_v44 = vsub.f32 %v1023_v59, %v1292_v24 }
  0x20   : > { %667 = vmatpush.bf16.msra.mxu0 %v981_v11  ;;  %1168 = vmatpush.bf16.msra.mxu1 %v981_v11 }
  0x21   : > { %1169 = vmatpush.bf16.msra.mxu2 %v981_v11  ;;  %1170 = vmatpush.bf16.msra.mxu3 %v981_v11 }
  0x24   : > { %668 = vmatpush.bf16.msra.mxu0 %v980_v13  ;;  %1171 = vmatpush.bf16.msra.mxu1 %v980_v13  ;;  %v1193_v15 = vpop.eup %1192 }
  0x25   : > { %1172 = vmatpush.bf16.msra.mxu2 %v980_v13  ;;  %1173 = vmatpush.bf16.msra.mxu3 %v980_v13  ;;  %v364_v17 = vmul.f32 %v1193_v15, %v362_v12  ;;  %vm370_vm1 = vweird.f32 %v1193_v15 }
  0x26   : > { %vm1300_vm2 = vmor %vm369_vm0, %vm370_vm1 }
  0x27   : > { %v365_v20 = vmul.f32 %v1193_v15, %v364_v17 }
  0x28   : > { %669 = vmatpush.bf16.msra.mxu0 %v979_v14  ;;  %1174 = vmatpush.bf16.msra.mxu1 %v979_v14 }
  0x29   : > { %1175 = vmatpush.bf16.msra.mxu2 %v979_v14  ;;  %1176 = vmatpush.bf16.msra.mxu3 %v979_v14  ;;  %v366_v27 = vmul.f32 0.5, %v365_v20 }
  0x2b   : > { %v367_v33 = vsub.f32 1.5, %v366_v27 }
  0x2c   : > { %670 = vmatpush.bf16.msra.mxu0 %v978_v19  ;;  %1177 = vmatpush.bf16.msra.mxu1 %v978_v19 }
  0x2d   : > { %1178 = vmatpush.bf16.msra.mxu2 %v978_v19  ;;  %1179 = vmatpush.bf16.msra.mxu3 %v978_v19  ;;  %v368_v41 = vmul.f32 %v1193_v15, %v367_v33 }
  0x2f   : > { %v372_v49 = vsel %vm1300_vm2, %v1193_v15, %v368_v41 }
  0x30   : > { %671 = vmatpush.bf16.msra.mxu0 %v977_v32  ;;  %1180 = vmatpush.bf16.msra.mxu1 %v977_v32  ;;  %v1320_v54 = vperm.slane %v372_v49, 0 }
  0x31   : > { %1181 = vmatpush.bf16.msra.mxu2 %v977_v32  ;;  %1182 = vmatpush.bf16.msra.mxu3 %v977_v32 }
  0x32   : > { %v376_v62 = vmul.f32 %v1320_v54, %v330_v36  ;;  %v377_v63 = vmul.f32 %v1320_v54, %v331_v40  ;;  %v384_v0 = vmul.f32 %v1320_v54, %v338_v42  ;;  %v385_v1 = vmul.f32 %v1320_v54, %v339_v43 }
  0x33   : > { %v378_v2 = vmul.f32 %v1320_v54, %v332_v45  ;;  %v379_v3 = vmul.f32 %v1320_v54, %v333_v46  ;;  %v392_v4 = vmul.f32 %v1320_v54, %v346_v50  ;;  %v393_v5 = vmul.f32 %v1320_v54, %v347_v51 }
  0x34   : > { %v408_v6 = vmax.f32 %v376_v62, 0.0  ;;  %v409_v7 = vmax.f32 %v377_v63, 0.0  ;;  %v416_v8 = vmax.f32 %v384_v0, 0.0  ;;  %v417_v9 = vmax.f32 %v385_v1, 0.0 }
  0x35   : > { %v410_v10 = vmax.f32 %v378_v2, 0.0  ;;  %v411_v11 = vmax.f32 %v379_v3, 0.0  ;;  %v424_v12 = vmax.f32 %v392_v4, 0.0  ;;  %v425_v13 = vmax.f32 %v393_v5, 0.0  ;;  %v1131_v2 = vld [vmem:[%s1249_s27 + $0x18] sm:$0xff]  }
  0x36   : > { %v440_v14 = vpack.c.bf16 %v408_v6, %v408_v6  ;;  %v441_v15 = vpack.c.bf16 %v409_v7, %v409_v7  ;;  %v1052_v16 = vpack.c.bf16 %v409_v7, %v408_v6  ;;  %v448_v17 = vpack.c.bf16 %v416_v8, %v416_v8 }
  0x37   : > { %v449_v18 = vpack.c.bf16 %v417_v9, %v417_v9  ;;  %v1072_v19 = vpack.c.bf16 %v417_v9, %v416_v8  ;;  %v442_v20 = vpack.c.bf16 %v410_v10, %v410_v10  ;;  %v443_v21 = vpack.c.bf16 %v411_v11, %v411_v11 }
  0x38   : > { %1053 = vst [vmem:[%s1254_s30] sm:$0xff] %v1052_v16   ;;  %v552_v22 = vunpack.c.l.b16 %v440_v14  ;;  %v553_v23 = vunpack.c.l.b16 %v441_v15  ;;  %v560_v25 = vunpack.c.l.b16 %v448_v17  ;;  %v1057_v26 = vpack.c.bf16 %v411_v11, %v410_v10  ;;  %v1138_v11 = vld [vmem:[%s1249_s27 + $0x50] sm:$0xff]  }
  0x39   : > { %1147 = vst [vmem:[%s1254_s30 + $0x20] sm:$0xff] %v1072_v19   ;;  %v561_v27 = vunpack.c.l.b16 %v449_v18  ;;  %v1339_v28 = vunpack.c.l.b16 %v442_v20  ;;  %v456_v29 = vpack.c.bf16 %v424_v12, %v424_v12  ;;  %v457_v32 = vpack.c.bf16 %v425_v13, %v425_v13 }
  0x3a   : > { %v584_v31 = vpack.c.b16 %v553_v23, %v552_v22  ;;  %1144 = vst [vmem:[%s1254_s30 + $0x8] sm:$0xff] %v1057_v26   ;;  %v1092_v33 = vpack.c.bf16 %v425_v13, %v424_v12  ;;  %v386_v34 = vmul.f32 %v1320_v54, %v340_v55  ;;  %v1344_v36 = vunpack.c.l.b16 %v443_v21 }
  0x3b   : > { %v588_v35 = vpack.c.b16 %v561_v27, %v560_v25  ;;  %v568_v37 = vunpack.c.l.b16 %v456_v29  ;;  %v387_v38 = vmul.f32 %v1320_v54, %v341_v56  ;;  %v569_v39 = vunpack.c.l.b16 %v457_v32  ;;  %v1134_v56 = vld [vmem:[%s1249_s27 + $0x30] sm:$0xff]   ;;  %v1141_v25 = vld [vmem:[%s1249_s27 + $0x68] sm:$0xff]  }
  0x3c   : > { %672 = vmatmul.bf16.vlgmr.msra.gmra.mxu0 %v584_v31  ;;  %1151 = vst [vmem:[%s1254_s30 + $0x40] sm:$0xff] %v1092_v33   ;;  %v418_v40 = vmax.f32 %v386_v34, 0.0  ;;  %v380_v41 = vmul.f32 %v1320_v54, %v334_v57  ;;  %v381_v42 = vmul.f32 %v1320_v54, %v335_v58  ;;  %v349_v45 = vsub.f32 %v1024_v60, %v1292_v24 }
  0x3d   : > { %692 = vmatmul.bf16.vlgmr.msra.gmra.mxu1 %v588_v35  ;;  %v419_v43 = vmax.f32 %v387_v38, 0.0  ;;  %v354_v46 = vsub.f32 %v1035_v61, %v1292_v24  ;;  %v592_v47 = vpack.c.b16 %v569_v39, %v568_v37  ;;  %v394_v53 = vmul.f32 %v1320_v54, %v348_v44 }
  0x3e   : > { %v450_v48 = vpack.c.bf16 %v418_v40, %v418_v40  ;;  %v412_v49 = vmax.f32 %v380_v41, 0.0  ;;  %v1353_v50 = vmax.f32 %v381_v42, 0.0  ;;  %v395_v55 = vmul.f32 %v1320_v54, %v349_v45 }
  0x3f   : > { %v451_v51 = vpack.c.bf16 %v419_v43, %v419_v43  ;;  %v1077_v52 = vpack.c.bf16 %v419_v43, %v418_v40  ;;  %712 = vmatmul.bf16.vlgmr.msra.gmra.mxu2 %v592_v47  ;;  %v426_v60 = vmax.f32 %v394_v53, 0.0  ;;  %v355_v62 = vsub.f32 %v1036_v30, %v1292_v24  ;;  %v1135_v53 = vld [vmem:[%s1249_s27 + $0x38] sm:$0xff]  }
  0x40   : > { %v562_v57 = vunpack.c.l.b16 %v450_v48  ;;  %v1062_v58 = vpack.c.bf16 %v1353_v50, %v412_v49  ;;  %v427_v61 = vmax.f32 %v395_v55, 0.0  ;;  %v585_v63 = vpack.c.b16 %v1344_v36, %v1339_v28 }
  0x41   : > { %1148 = vst [vmem:[%s1254_s30 + $0x28] sm:$0xff] %v1077_v52   ;;  %v563_v59 = vunpack.c.l.b16 %v451_v51  ;;  %v400_v0 = vmul.f32 %v1320_v54, %v354_v46  ;;  %v1011_v1 = vunpack.c.l.bf16 %v1134_v56  ;;  %v444_v3 = vpack.c.bf16 %v412_v49, %v412_v49 }
  0x42   : > { %1145 = vst [vmem:[%s1254_s30 + $0x10] sm:$0xff] %v1062_v58   ;;  %v458_v4 = vpack.c.bf16 %v426_v60, %v426_v60  ;;  %v459_v5 = vpack.c.bf16 %v427_v61, %v427_v61  ;;  %v1097_v6 = vpack.c.bf16 %v427_v61, %v426_v60  ;;  %v445_v7 = vpack.c.bf16 %v1353_v50, %v1353_v50  ;;  %v1139_v61 = vld [vmem:[%s1249_s27 + $0x58] sm:$0xff]  }
  0x43   : > { %v401_v8 = vmul.f32 %v1320_v54, %v355_v62  ;;  %v432_v9 = vmax.f32 %v400_v0, 0.0  ;;  %v1012_v10 = vunpack.c.h.bf16 %v1134_v56  ;;  %v589_v12 = vpack.c.b16 %v563_v59, %v562_v57 }
  0x44   : > { %1152 = vst [vmem:[%s1254_s30 + $0x48] sm:$0xff] %v1097_v6   ;;  %v570_v13 = vunpack.c.l.b16 %v458_v4  ;;  %v342_v14 = vsub.f32 %v1011_v1, %v1292_v24  ;;  %v999_v15 = vunpack.c.l.bf16 %v1131_v2  ;;  %v1000_v19 = vunpack.c.h.bf16 %v1131_v2  ;;  %v1142_v6 = vld [vmem:[%s1249_s27 + $0x70] sm:$0xff]  }
  0x45   : > { %v433_v16 = vmax.f32 %v401_v8, 0.0  ;;  %v464_v17 = vpack.c.bf16 %v432_v9, %v432_v9  ;;  %v343_v18 = vsub.f32 %v1012_v10, %v1292_v24  ;;  %v571_v20 = vunpack.c.l.b16 %v459_v5 }
  0x46   : > { %v388_v21 = vmul.f32 %v1320_v54, %v342_v14  ;;  %v336_v22 = vsub.f32 %v999_v15, %v1292_v24  ;;  %v1027_v23 = vunpack.c.l.bf16 %v1138_v11  ;;  %v337_v31 = vsub.f32 %v1000_v19, %v1292_v24  ;;  %v1143_v19 = vld [vmem:[%s1249_s27 + $0x78] sm:$0xff]  }
  0x47   : > { %v465_v26 = vpack.c.bf16 %v433_v16, %v433_v16  ;;  %v1112_v27 = vpack.c.bf16 %v433_v16, %v432_v9  ;;  %v576_v28 = vunpack.c.l.b16 %v464_v17  ;;  %v389_v29 = vmul.f32 %v1320_v54, %v343_v18 }
  0x48   : > { %v420_v30 = vmax.f32 %v388_v21, 0.0  ;;  %v382_v32 = vmul.f32 %v1320_v54, %v336_v22  ;;  %v1028_v33 = vunpack.c.h.bf16 %v1138_v11  ;;  %v350_v36 = vsub.f32 %v1027_v23, %v1292_v24 }
  0x49   : > { %1155 = vst [vmem:[%s1254_s30 + $0x60] sm:$0xff] %v1112_v27   ;;  %v577_v34 = vunpack.c.l.b16 %v465_v26  ;;  %v421_v35 = vmax.f32 %v389_v29, 0.0  ;;  %v1039_v37 = vunpack.c.l.bf16 %v1141_v25  ;;  %v1381_v38 = vunpack.c.l.b16 %v444_v3 }
  0x4a   : > { %v383_v39 = vmul.f32 %v1320_v54, %v337_v31  ;;  %v351_v40 = vsub.f32 %v1028_v33, %v1292_v24  ;;  %v593_v41 = vpack.c.b16 %v571_v20, %v570_v13  ;;  %v396_v44 = vmul.f32 %v1320_v54, %v350_v36 }
  0x4b   : > { %v596_v42 = vpack.c.b16 %v577_v34, %v576_v28  ;;  %v1082_v43 = vpack.c.bf16 %v421_v35, %v420_v30  ;;  %v1386_v45 = vunpack.c.l.b16 %v445_v7  ;;  %v1388_v46 = vmax.f32 %v382_v32, 0.0 }
  0x4c   : > { %677 = vmatmul.bf16.gmra.mxu0 %v585_v63  ;;  %v1390_v47 = vmax.f32 %v383_v39, 0.0  ;;  %v397_v48 = vmul.f32 %v1320_v54, %v351_v40  ;;  %v452_v49 = vpack.c.bf16 %v420_v30, %v420_v30  ;;  %v428_v50 = vmax.f32 %v396_v44, 0.0 }
  0x4d   : > { %697 = vmatmul.bf16.gmra.mxu1 %v589_v12  ;;  %732 = vmatmul.bf16.vlgmr.msra.gmra.mxu3 %v596_v42  ;;  %1149 = vst [vmem:[%s1254_s30 + $0x30] sm:$0xff] %v1082_v43   ;;  %v1040_v51 = vunpack.c.h.bf16 %v1141_v25  ;;  %v356_v52 = vsub.f32 %v1039_v37, %v1292_v24  ;;  %v453_v55 = vpack.c.bf16 %v421_v35, %v421_v35  ;;  %v1015_v1 = vunpack.c.l.bf16 %v1135_v53 }
  0x4e   : > { %v1067_v56 = vpack.c.bf16 %v1390_v47, %v1388_v46  ;;  %v429_v57 = vmax.f32 %v397_v48, 0.0  ;;  %v460_v58 = vpack.c.bf16 %v428_v50, %v428_v50  ;;  %v586_v62 = vpack.c.b16 %v1386_v45, %v1381_v38 }
  0x4f   : > { %717 = vmatmul.bf16.gmra.mxu2 %v593_v41  ;;  %v357_v59 = vsub.f32 %v1040_v51, %v1292_v24  ;;  %v402_v60 = vmul.f32 %v1320_v54, %v356_v52  ;;  %v564_v2 = vunpack.c.l.b16 %v452_v49  ;;  %v1016_v5 = vunpack.c.h.bf16 %v1135_v53 }
  0x50   : > { %1146 = vst [vmem:[%s1254_s30 + $0x18] sm:$0xff] %v1067_v56   ;;  %v461_v63 = vpack.c.bf16 %v429_v57, %v429_v57  ;;  %v1102_v0 = vpack.c.bf16 %v429_v57, %v428_v50  ;;  %v565_v7 = vunpack.c.l.b16 %v453_v55  ;;  %v572_v8 = vunpack.c.l.b16 %v460_v58 }
  0x51   : > { %v403_v3 = vmul.f32 %v1320_v54, %v357_v59  ;;  %v434_v4 = vmax.f32 %v402_v60, 0.0  ;;  %v344_v9 = vsub.f32 %v1015_v1, %v1292_v24  ;;  %v1031_v10 = vunpack.c.l.bf16 %v1139_v61 }
  0x52   : > { %1153 = vst [vmem:[%s1254_s30 + $0x50] sm:$0xff] %v1102_v0   ;;  %v345_v13 = vsub.f32 %v1016_v5, %v1292_v24  ;;  %v1032_v14 = vunpack.c.h.bf16 %v1139_v61  ;;  %v573_v15 = vunpack.c.l.b16 %v461_v63  ;;  %v1043_v18 = vunpack.c.l.bf16 %v1142_v6 }
  0x53   : > { %v435_v11 = vmax.f32 %v403_v3, 0.0  ;;  %v466_v12 = vpack.c.bf16 %v434_v4, %v434_v4  ;;  %v390_v16 = vmul.f32 %v1320_v54, %v344_v9  ;;  %v352_v17 = vsub.f32 %v1031_v10, %v1292_v24 }
  0x54   : > { %v391_v23 = vmul.f32 %v1320_v54, %v345_v13  ;;  %v353_v26 = vsub.f32 %v1032_v14, %v1292_v24  ;;  %v1044_v28 = vunpack.c.h.bf16 %v1142_v6  ;;  %v358_v31 = vsub.f32 %v1043_v18, %v1292_v24 }
  0x55   : > { %v467_v20 = vpack.c.bf16 %v435_v11, %v435_v11  ;;  %v1117_v21 = vpack.c.bf16 %v435_v11, %v434_v4  ;;  %v578_v22 = vunpack.c.l.b16 %v466_v12  ;;  %v422_v25 = vmax.f32 %v390_v16, 0.0 }
  0x56   : > { %v398_v27 = vmul.f32 %v1320_v54, %v352_v17  ;;  %v423_v30 = vmax.f32 %v391_v23, 0.0  ;;  %v1047_v32 = vunpack.c.l.bf16 %v1143_v19  ;;  %v590_v33 = vpack.c.b16 %v565_v7, %v564_v2 }
  0x57   : > { %1156 = vst [vmem:[%s1254_s30 + $0x68] sm:$0xff] %v1117_v21   ;;  %v579_v29 = vunpack.c.l.b16 %v467_v20  ;;  %v399_v34 = vmul.f32 %v1320_v54, %v353_v26  ;;  %v359_v35 = vsub.f32 %v1044_v28, %v1292_v24  ;;  %v404_v38 = vmul.f32 %v1320_v54, %v358_v31 }
  0x58   : > { %v1087_v37 = vpack.c.bf16 %v423_v30, %v422_v25  ;;  %v430_v39 = vmax.f32 %v398_v27, 0.0  ;;  %v594_v42 = vpack.c.b16 %v573_v15, %v572_v8  ;;  %v1048_v43 = vunpack.c.h.bf16 %v1143_v19 }
  0x59   : > { %v597_v36 = vpack.c.b16 %v579_v29, %v578_v22  ;;  %v431_v40 = vmax.f32 %v399_v34, 0.0  ;;  %v405_v41 = vmul.f32 %v1320_v54, %v359_v35  ;;  %v360_v44 = vsub.f32 %v1047_v32, %v1292_v24 }
  0x5a   : > { %1150 = vst [vmem:[%s1254_s30 + $0x38] sm:$0xff] %v1087_v37   ;;  %v436_v48 = vmax.f32 %v404_v38, 0.0  ;;  %v361_v50 = vsub.f32 %v1048_v43, %v1292_v24  ;;  %v446_v52 = vpack.c.bf16 %v1388_v46, %v1388_v46  ;;  %v447_v55 = vpack.c.bf16 %v1390_v47, %v1390_v47 }
  0x5b   : > { %v1107_v45 = vpack.c.bf16 %v431_v40, %v430_v39  ;;  %v437_v49 = vmax.f32 %v405_v41, 0.0  ;;  %v406_v51 = vmul.f32 %v1320_v54, %v360_v44  ;;  %v454_v57 = vpack.c.bf16 %v422_v25, %v422_v25 }
  0x5c   : > { %682 = vmatmul.bf16.gmra.mxu0 %v586_v62  ;;  %v407_v56 = vmul.f32 %v1320_v54, %v361_v50  ;;  %v455_v58 = vpack.c.bf16 %v423_v30, %v423_v30  ;;  %v468_v59 = vpack.c.bf16 %v436_v48, %v436_v48  ;;  %v558_v62 = vunpack.c.l.b16 %v446_v52 }
  0x5d   : > { %702 = vmatmul.bf16.gmra.mxu1 %v590_v33  ;;  %737 = vmatmul.bf16.gmra.mxu3 %v597_v36  ;;  %1154 = vst [vmem:[%s1254_s30 + $0x58] sm:$0xff] %v1107_v45   ;;  %v1122_v53 = vpack.c.bf16 %v437_v49, %v436_v48  ;;  %v469_v60 = vpack.c.bf16 %v437_v49, %v437_v49  ;;  %v438_v24 = vmax.f32 %v406_v51, 0.0  ;;  %v559_v63 = vunpack.c.l.b16 %v447_v55 }
  0x5e   : > { %v439_v61 = vmax.f32 %v407_v56, 0.0  ;;  %v462_v0 = vpack.c.bf16 %v430_v39, %v430_v39  ;;  %v463_v46 = vpack.c.bf16 %v431_v40, %v431_v40  ;;  %v566_v2 = vunpack.c.l.b16 %v454_v57 }
  0x5f   : > { %722 = vmatmul.bf16.gmra.mxu2 %v594_v42  ;;  %1157 = vst [vmem:[%s1254_s30 + $0x70] sm:$0xff] %v1122_v53   ;;  %v567_v3 = vunpack.c.l.b16 %v455_v58  ;;  %v580_v4 = vunpack.c.l.b16 %v468_v59  ;;  %v581_v47 = vunpack.c.l.b16 %v469_v60  ;;  %v587_v5 = vpack.c.b16 %v559_v63, %v558_v62 }
  0x60   : > { %v1127_v1 = vpack.c.bf16 %v439_v61, %v438_v24  ;;  %v574_v54 = vunpack.c.l.b16 %v462_v0  ;;  %v575_v6 = vunpack.c.l.b16 %v463_v46  ;;  %v470_v10 = vpack.c.bf16 %v438_v24, %v438_v24 }
  0x61   : > { %v591_v7 = vpack.c.b16 %v567_v3, %v566_v2  ;;  %v598_v8 = vpack.c.b16 %v581_v47, %v580_v4  ;;  %v471_v11 = vpack.c.bf16 %v439_v61, %v439_v61 }
  0x62   : > { %1158 = vst [vmem:[%s1254_s30 + $0x78] sm:$0xff] %v1127_v1   ;;  %v595_v9 = vpack.c.b16 %v575_v6, %v574_v54  ;;  %v582_v12 = vunpack.c.l.b16 %v470_v10 }
  0x63   : > { %v583_v13 = vunpack.c.l.b16 %v471_v11 }
  0x65   : > { %v599_v14 = vpack.c.b16 %v583_v13, %v582_v12 }
  0x6c   : > { %687 = vmatmul.bf16.gmra.mxu0 %v587_v5 }
  0x6d   : > { %707 = vmatmul.bf16.gmra.mxu1 %v591_v7  ;;  %742 = vmatmul.bf16.gmra.mxu3 %v598_v8 }
  0x6f   : > { %727 = vmatmul.bf16.gmra.mxu2 %v595_v9 }
  0x7d   : > { %747 = vmatmul.bf16.gmra.mxu3 %v599_v14 }
  0xb9   : > { %v673_v15 = vpop.f32.mrf.mxu0 }
  0xba   : > { %v693_v16 = vpop.f32.mrf.mxu1  ;;  %v794_v33 = vmul.f32 %v673_v15, %v673_v15 }
  0xbb   : > { %v802_v61 = vmul.f32 %v693_v16, %v693_v16 }
  0xc1   : > { %v675_v17 = vpop.f32.mrf.mxu0 }
  0xc2   : > { %v695_v18 = vpop.f32.mrf.mxu1  ;;  %v1433_v20 = vpop.f32.mrf.mxu2  ;;  %v795_v32 = vmul.f32 %v675_v17, %v675_v17  ;;  %v754_v34 = vadd.f32 %v675_v17, %v673_v15 }
  0xc3   : > { %v803_v46 = vmul.f32 %v695_v18, %v695_v18 }
  0xc4   : > { %v826_v37 = vadd.f32 %v795_v32, %v794_v33 }
  0xc9   : > { %v678_v19 = vpop.f32.mrf.mxu0 }
  0xca   : > { %v698_v21 = vpop.f32.mrf.mxu1  ;;  %v1435_v23 = vpop.f32.mrf.mxu2  ;;  %v796_v35 = vmul.f32 %v678_v19, %v678_v19  ;;  %v755_v38 = vadd.f32 %v754_v34, %v678_v19 }
  0xcb   : > { %v804_v4 = vmul.f32 %v698_v21, %v698_v21 }
  0xcc   : > { %v827_v41 = vadd.f32 %v826_v37, %v796_v35 }
  0xd0   : > { %v1437_v27 = vpop.f32.mrf.mxu3 }
  0xd1   : > { %v680_v22 = vpop.f32.mrf.mxu0 }
  0xd2   : > { %v700_v25 = vpop.f32.mrf.mxu1  ;;  %v1439_v28 = vpop.f32.mrf.mxu2  ;;  %v797_v39 = vmul.f32 %v680_v22, %v680_v22  ;;  %v756_v42 = vadd.f32 %v755_v38, %v680_v22 }
  0xd3   : > { %v805_v54 = vmul.f32 %v700_v25, %v700_v25  ;;  %v812_v37 = vmul.f32 %v1439_v28, %v1439_v28 }
  0xd4   : > { %v828_v45 = vadd.f32 %v827_v41, %v797_v39 }
  0xd8   : > { %v1441_v31 = vpop.f32.mrf.mxu3 }
  0xd9   : > { %v683_v26 = vpop.f32.mrf.mxu0 }
  0xda   : > { %v703_v30 = vpop.f32.mrf.mxu1  ;;  %v1443_v36 = vpop.f32.mrf.mxu2  ;;  %v798_v43 = vmul.f32 %v683_v26, %v683_v26  ;;  %v757_v48 = vadd.f32 %v756_v42, %v683_v26 }
  0xdb   : > { %v806_v9 = vmul.f32 %v703_v30, %v703_v30 }
  0xdc   : > { %v829_v51 = vadd.f32 %v828_v45, %v798_v43 }
  0xe0   : > { %v1445_v50 = vpop.f32.mrf.mxu3 }
  0xe1   : > { %v685_v29 = vpop.f32.mrf.mxu0 }
  0xe2   : > { %v705_v44 = vpop.f32.mrf.mxu1  ;;  %v799_v49 = vmul.f32 %v685_v29, %v685_v29  ;;  %v758_v52 = vadd.f32 %v757_v48, %v685_v29  ;;  %v723_v58 = vpop.f32.mrf.mxu2 }
  0xe3   : > { %v807_v12 = vmul.f32 %v705_v44, %v705_v44  ;;  %v814_v43 = vmul.f32 %v723_v58, %v723_v58 }
  0xe4   : > { %v830_v55 = vadd.f32 %v829_v51, %v799_v49 }
  0xe8   : > { %v740_v3 = vpop.f32.mrf.mxu3 }
  0xe9   : > { %v688_v40 = vpop.f32.mrf.mxu0 }
  0xea   : > { %v800_v53 = vmul.f32 %v688_v40, %v688_v40  ;;  %v759_v56 = vadd.f32 %v758_v52, %v688_v40  ;;  %v708_v0 = vpop.f32.mrf.mxu1  ;;  %v725_v8 = vpop.f32.mrf.mxu2  ;;  %v813_v40 = vmul.f32 %v1443_v36, %v1443_v36 }
  0xeb   : > { %v808_v17 = vmul.f32 %v708_v0, %v708_v0  ;;  %v815_v49 = vmul.f32 %v725_v8, %v725_v8 }
  0xec   : > { %v831_v59 = vadd.f32 %v830_v55, %v800_v53 }
  0xf1   : > { %v690_v57 = vpop.f32.mrf.mxu0 }
  0xf2   : > { %v760_v60 = vadd.f32 %v759_v56, %v690_v57  ;;  %v801_v24 = vmul.f32 %v690_v57, %v690_v57  ;;  %v710_v15 = vpop.f32.mrf.mxu1  ;;  %v728_v33 = vpop.f32.mrf.mxu2 }
  0xf3   : > { %v809_v29 = vmul.f32 %v710_v15, %v710_v15  ;;  %v816_v55 = vmul.f32 %v728_v33, %v728_v33 }
  0xf4   : > { %v761_v62 = vadd.f32 %v760_v60, %v693_v16  ;;  %v832_v63 = vadd.f32 %v831_v59, %v801_v24  ;;  %v818_v59 = vmul.f32 %v1437_v27, %v1437_v27 }
  0xf6   : > { %v762_v1 = vadd.f32 %v761_v62, %v695_v18  ;;  %v833_v2 = vadd.f32 %v832_v63, %v802_v61  ;;  %v743_v18 = vpop.f32.mrf.mxu3  ;;  %v820_v63 = vmul.f32 %v1445_v50, %v1445_v50 }
  0xf8   : > { %v763_v47 = vadd.f32 %v762_v1, %v698_v21  ;;  %v834_v5 = vadd.f32 %v833_v2, %v803_v46  ;;  %v810_v21 = vmul.f32 %v1433_v20, %v1433_v20  ;;  %v821_v1 = vmul.f32 %v740_v3, %v740_v3 }
  0xfa   : > { %v835_v6 = vadd.f32 %v834_v5, %v804_v4  ;;  %v764_v7 = vadd.f32 %v763_v47, %v700_v25  ;;  %v730_v51 = vpop.f32.mrf.mxu2  ;;  %v822_v47 = vmul.f32 %v743_v18, %v743_v18 }
  0xfb   : > { %v817_v57 = vmul.f32 %v730_v51, %v730_v51 }
  0xfc   : > { %v765_v10 = vadd.f32 %v764_v7, %v703_v30  ;;  %v836_v11 = vadd.f32 %v835_v6, %v805_v54  ;;  %v811_v30 = vmul.f32 %v1435_v23, %v1435_v23 }
  0xfe   : > { %v766_v13 = vadd.f32 %v765_v10, %v705_v44  ;;  %v837_v14 = vadd.f32 %v836_v11, %v806_v9  ;;  %v745_v42 = vpop.f32.mrf.mxu3 }
  0xff   : > { %v823_v6 = vmul.f32 %v745_v42, %v745_v42 }
 0x100   : > { %v767_v16 = vadd.f32 %v766_v13, %v708_v0  ;;  %v838_v19 = vadd.f32 %v837_v14, %v807_v12 }
 0x102   : > { %v839_v22 = vadd.f32 %v838_v19, %v808_v17  ;;  %v768_v26 = vadd.f32 %v767_v16, %v710_v15 }
 0x104   : > { %v769_v25 = vadd.f32 %v768_v26, %v1433_v20  ;;  %v840_v32 = vadd.f32 %v839_v22, %v809_v29  ;;  %v753_v29 = vld [vmem:[%s1488_s5] sm:$0x1] }
 0x106   : > { %v770_v34 = vadd.f32 %v769_v25, %v1435_v23  ;;  %v841_v35 = vadd.f32 %v840_v32, %v810_v21  ;;  %v748_v24 = vpop.f32.mrf.mxu3  ;;  %v793_v32 = vld [vmem:[%s1489_s6] sm:$0x1] }
 0x108   : > { %v771_v38 = vadd.f32 %v770_v34, %v1439_v28  ;;  %v842_v39 = vadd.f32 %v841_v35, %v811_v30 }
 0x10a   : > { %v843_v41 = vadd.f32 %v842_v39, %v812_v37  ;;  %v772_v20 = vadd.f32 %v771_v38, %v1443_v36 }
 0x10c   : > { %v773_v44 = vadd.f32 %v772_v20, %v723_v58  ;;  %v844_v45 = vadd.f32 %v843_v41, %v813_v40  ;;  %v819_v58 = vmul.f32 %v1441_v31, %v1441_v31 }
 0x10e   : > { %v774_v48 = vadd.f32 %v773_v44, %v725_v8  ;;  %v845_v23 = vadd.f32 %v844_v45, %v814_v43  ;;  %v750_v8 = vpop.f32.mrf.mxu3 }
 0x10f   : > { %v825_v13 = vmul.f32 %v750_v8, %v750_v8 }
 0x110   : > { %v846_v52 = vadd.f32 %v845_v23, %v815_v49  ;;  %v775_v53 = vadd.f32 %v774_v48, %v728_v33 }
 0x112   : > { %v847_v56 = vadd.f32 %v846_v52, %v816_v55  ;;  %v776_v28 = vadd.f32 %v775_v53, %v730_v51 }
 0x114   : > { %v777_v60 = vadd.f32 %v776_v28, %v1437_v27  ;;  %v848_v36 = vadd.f32 %v847_v56, %v817_v57 }
 0x116   : > { %v778_v61 = vadd.f32 %v777_v60, %v1441_v31  ;;  %v849_v62 = vadd.f32 %v848_v36, %v818_v59  ;;  %v824_v31 = vmul.f32 %v748_v24, %v748_v24 }
 0x118   : > { %v779_v0 = vadd.f32 %v778_v61, %v1445_v50  ;;  %v850_v46 = vadd.f32 %v849_v62, %v819_v58 }
 0x11a   : > { %v851_v2 = vadd.f32 %v850_v46, %v820_v63  ;;  %v780_v4 = vadd.f32 %v779_v0, %v740_v3 }
 0x11c   : > { %v781_v5 = vadd.f32 %v780_v4, %v743_v18  ;;  %v852_v27 = vadd.f32 %v851_v2, %v821_v1 }
 0x11e   : > { %v782_v54 = vadd.f32 %v781_v5, %v745_v42  ;;  %v853_v7 = vadd.f32 %v852_v27, %v822_v47 }
 0x120   : > { %v854_v9 = vadd.f32 %v853_v7, %v823_v6  ;;  %v783_v10 = vadd.f32 %v782_v54, %v748_v24 }
 0x122   : > { %v855_v11 = vadd.f32 %v854_v9, %v824_v31  ;;  %v784_v12 = vadd.f32 %v783_v10, %v750_v8 }
 0x124   : > { %v785_v14 = vrot.slane %v784_v12, 4  ;;  %v856_v15 = vadd.f32 %v855_v11, %v825_v13 }
 0x126   : > { %v786_v50 = vadd.f32 %v785_v14, %v784_v12  ;;  %v857_v16 = vrot.slane %v856_v15, 4 }
 0x128   : > { %v787_v17 = vrot.slane %v786_v50, 2  ;;  %v858_v19 = vadd.f32 %v857_v16, %v856_v15 }
 0x12a   : > { %v788_v3 = vadd.f32 %v787_v17, %v786_v50  ;;  %v859_v22 = vrot.slane %v858_v19, 2 }
 0x12c   : > { %v789_v18 = vrot.slane %v788_v3, 1  ;;  %v860_v26 = vadd.f32 %v859_v22, %v858_v19 }
 0x12e   : > { %v790_v21 = vadd.f32 %v789_v18, %v788_v3  ;;  %v861_v25 = vrot.slane %v860_v26, 1 }
 0x130   : > { %v791_v33 = vadd.f32 %v790_v21, %v753_v29  ;;  %v862_v30 = vadd.f32 %v861_v25, %v860_v26 }
 0x132   : > { %792 = vst [vmem:[%s1488_s5] sm:$0x1] %v791_v33  ;;  %v863_v34 = vadd.f32 %v862_v30, %v793_v32 }
 0x134   : > { %864 = vst [vmem:[%s1489_s6] sm:$0x1] %v863_v34 }
 0x135 PF: > { %s17_s21 = sadd.s32 1, %s1200_s21  }
 0x136   : > { %p14_p5 = scmp.ge.s32.totalorder %s17_s21, 4  }
 0x138   :  { %16 = sbr.rel (!%p14_p5) target bundleno = 1 (0x1), region = 86 }

// kernel: block_forward.5
= control target key start
LH: loop header
LB: loop body
LE: loop exit
PB: predicated region body
PF: predicated region fallthrough
CT: control target
= control target key end

     0   :  { %s951_s15 = smov 0   ;;  %s1155_s0 = inlined_call_operand.vmem [shape: bf16[512,4], index: 0, kind: input, shape index: {}]   ;;  %s1156_s1 = inlined_call_operand.vmem [shape: bf16[4,128], index: 1, kind: input, shape index: {}]   ;;  %s1157_s2 = inlined_call_operand.vmem [shape: bf16[512,128], index: 2, kind: output, shape index: {0}]   ;;  %s1158_s3 = inlined_call_operand.vmem [shape: f32[1,128], index: 3, kind: output, shape index: {1}]   ;;  %s1159_s4 = inlined_call_operand.vmem [shape: f32[1,128], index: 4, kind: output, shape index: {2}]  }
   0x1 LB: > { %s702_s16 = sadd.s32 4294967295, %s923_s15   ;;  %p706_p0 = scmp.ge.s32.totalorder %s923_s15, 1  ;;  %s923_s15 = sphi %s951_s15, %s15_s15  }
   0x2   : > { %p158_p1 = scmp.lt.s32.totalorder %s923_s15, 3 }
   0x4   : > { %p159_p2 = pnand %p706_p0, %p158_p1 }
   0x5   : > { %s707_s17 = sshll.u32 (!%p159_p2), %s702_s16, 5  ;;  %p711_p4 = scmp.ne.s32.totalorder (!%p159_p2), %s702_s16, 0 }
   0x6   : > { %162 = sbr.rel (%p159_p2) target bundleno = 273 (0x111), region = 28  ;;  %p185_p3 = scmp.lt.s32.totalorder (!%p159_p2), %s707_s17, 63 }
   0xb   : > { %s1161_s17 = smov (!%p185_p3, %s707_s17), 63  ;;  %200 = sbr.rel (%p711_p4) target bundleno = 19 (0x13), region = 32 }
   0xc   : > { %s708_s18 = sshll.u32 %s1161_s17, 2 }
   0xd   : > { %s962_s21 = scalar_lea.vmem %s1155_s0, %s708_s18  ;;  %s967_s24 = scalar_lea.vmem %s1157_s2, %s708_s18 }
  0x10   : > { %v925_v0 = vmov 0.0  }
  0x11   : > { %201 = vst [vmem:[%s1158_s3] sm:$0x1] %v925_v0 }
  0x12   : > { %202 = vst [vmem:[%s1159_s4] sm:$0x1] %v925_v0 }
  0x13 PF: > { %v235_v1 = vld [vmem:[%s1156_s1] sm:$0x3]  ;;  %vm365_vm0 = vcmask 1041408   ;;  %vm316_vm1 = vcmask 31744   ;;  %v795_v7 = vld [vmem:[%s962_s21 + $0x8] sm:$0xff]  ;;  %v796_v11 = vld [vmem:[%s962_s21 + $0x10] sm:$0xff] }
  0x14   : > { %v367_v2 = vsel %vm365_vm0, %v235_v1, 0  ;;  %v794_v3 = vld [vmem:[%s962_s21] sm:$0xff]  ;;  %v799_v8 = vld [vmem:[%s962_s21 + $0x28] sm:$0xff]  ;;  %v800_v12 = vld [vmem:[%s962_s21 + $0x30] sm:$0xff] }
  0x15   : > { %v798_v4 = vld [vmem:[%s962_s21 + $0x20] sm:$0xff]  ;;  %376 = vmatpush.bf16.msra.mxu0 %v367_v2  ;;  %905 = vmatpush.bf16.msra.mxu1 %v367_v2  ;;  %v803_v9 = vld [vmem:[%s962_s21 + $0x48] sm:$0xff]  ;;  %v804_v13 = vld [vmem:[%s962_s21 + $0x50] sm:$0xff] }
  0x16   : > { %v802_v5 = vld [vmem:[%s962_s21 + $0x40] sm:$0xff]  ;;  %906 = vmatpush.bf16.msra.mxu2 %v367_v2  ;;  %907 = vmatpush.bf16.msra.mxu3 %v367_v2  ;;  %v807_v10 = vld [vmem:[%s962_s21 + $0x68] sm:$0xff]  ;;  %v808_v14 = vld [vmem:[%s962_s21 + $0x70] sm:$0xff] }
  0x17   : > { %v806_v6 = vld [vmem:[%s962_s21 + $0x60] sm:$0xff]  ;;  %v797_v15 = vld [vmem:[%s962_s21 + $0x18] sm:$0xff] }
  0x18   : > { %776 = vmatmul.msk.bf16.vlgmr.msra.gmra.mxu0 %vm316_vm1, %v794_v3  ;;  %780 = vmatmul.msk.bf16.vlgmr.msra.gmra.mxu1 %vm316_vm1, %v798_v4  ;;  %v801_v16 = vld [vmem:[%s962_s21 + $0x38] sm:$0xff] }
  0x19   : > { %784 = vmatmul.msk.bf16.vlgmr.msra.gmra.mxu2 %vm316_vm1, %v802_v5  ;;  %788 = vmatmul.msk.bf16.vlgmr.msra.gmra.mxu3 %vm316_vm1, %v806_v6  ;;  %v805_v17 = vld [vmem:[%s962_s21 + $0x58] sm:$0xff] }
  0x1a   : > { %v809_v18 = vld [vmem:[%s962_s21 + $0x78] sm:$0xff] }
  0x28   : > { %777 = vmatmul.msk.bf16.gmra.mxu0 %vm316_vm1, %v795_v7  ;;  %781 = vmatmul.msk.bf16.gmra.mxu1 %vm316_vm1, %v799_v8 }
  0x29   : > { %785 = vmatmul.msk.bf16.gmra.mxu2 %vm316_vm1, %v803_v9  ;;  %789 = vmatmul.msk.bf16.gmra.mxu3 %vm316_vm1, %v807_v10 }
  0x38   : > { %778 = vmatmul.msk.bf16.gmra.mxu0 %vm316_vm1, %v796_v11  ;;  %782 = vmatmul.msk.bf16.gmra.mxu1 %vm316_vm1, %v800_v12 }
  0x39   : > { %786 = vmatmul.msk.bf16.gmra.mxu2 %vm316_vm1, %v804_v13  ;;  %790 = vmatmul.msk.bf16.gmra.mxu3 %vm316_vm1, %v808_v14 }
  0x48   : > { %779 = vmatmul.msk.bf16.gmra.mxu0 %vm316_vm1, %v797_v15  ;;  %783 = vmatmul.msk.bf16.gmra.mxu1 %vm316_vm1, %v801_v16 }
  0x49   : > { %787 = vmatmul.msk.bf16.gmra.mxu2 %vm316_vm1, %v805_v17  ;;  %791 = vmatmul.msk.bf16.gmra.mxu3 %vm316_vm1, %v809_v18 }
  0x95   : > { %v378_v19 = vpop.f32.mrf.mxu0  ;;  %v1010_v20 = vpop.f32.mrf.mxu1 }
  0x96   : > { %v563_v52 = vmul.f32 %v378_v19, %v378_v19 }
  0x9c   : > { %v1012_v21 = vpop.f32.mrf.mxu2  ;;  %v1018_v26 = vpop.f32.mrf.mxu3 }
  0x9d   : > { %v380_v22 = vpop.f32.mrf.mxu0  ;;  %v1014_v23 = vpop.f32.mrf.mxu1 }
  0x9e   : > { %v813_v24 = vpack.c.bf16 %v380_v22, %v378_v19  ;;  %v833_v25 = vpack.c.bf16 %v1014_v23, %v1010_v20  ;;  %v564_v51 = vmul.f32 %v380_v22, %v380_v22  ;;  %v523_v54 = vadd.f32 %v380_v22, %v378_v19 }
  0x9f   : > { %v571_v22 = vmul.f32 %v1010_v20, %v1010_v20 }
  0xa0   : > { %814 = vst [vmem:[%s967_s24] sm:$0xff] %v813_v24   ;;  %v595_v55 = vadd.f32 %v564_v51, %v563_v52 }
  0xa1   : > { %893 = vst [vmem:[%s967_s24 + $0x20] sm:$0xff] %v833_v25  }
  0xa4   : > { %v1022_v27 = vpop.f32.mrf.mxu2  ;;  %v1028_v31 = vpop.f32.mrf.mxu3 }
  0xa5   : > { %v383_v28 = vpop.f32.mrf.mxu0  ;;  %v1024_v29 = vpop.f32.mrf.mxu1  ;;  %v853_v30 = vpack.c.bf16 %v1022_v27, %v1012_v21  ;;  %v873_v32 = vpack.c.bf16 %v1028_v31, %v1018_v26 }
  0xa6   : > { %v565_v53 = vmul.f32 %v383_v28, %v383_v28  ;;  %v524_v57 = vadd.f32 %v523_v54, %v383_v28 }
  0xa7   : > { %897 = vst [vmem:[%s967_s24 + $0x40] sm:$0xff] %v853_v30  }
  0xa8   : > { %901 = vst [vmem:[%s967_s24 + $0x60] sm:$0xff] %v873_v32   ;;  %v596_v59 = vadd.f32 %v595_v55, %v565_v53 }
  0xac   : > { %v1034_v33 = vpop.f32.mrf.mxu2  ;;  %v1040_v38 = vpop.f32.mrf.mxu3 }
  0xad   : > { %v385_v34 = vpop.f32.mrf.mxu0  ;;  %v1036_v35 = vpop.f32.mrf.mxu1 }
  0xae   : > { %v818_v36 = vpack.c.bf16 %v385_v34, %v383_v28  ;;  %v838_v37 = vpack.c.bf16 %v1036_v35, %v1024_v29  ;;  %v566_v56 = vmul.f32 %v385_v34, %v385_v34  ;;  %v525_v0 = vadd.f32 %v524_v57, %v385_v34 }
  0xaf   : > { %v572_v28 = vmul.f32 %v1014_v23, %v1014_v23  ;;  %v573_v34 = vmul.f32 %v1024_v29, %v1024_v29 }
  0xb0   : > { %890 = vst [vmem:[%s967_s24 + $0x8] sm:$0xff] %v818_v36   ;;  %v597_v2 = vadd.f32 %v596_v59, %v566_v56 }
  0xb1   : > { %894 = vst [vmem:[%s967_s24 + $0x28] sm:$0xff] %v838_v37  }
  0xb4   : > { %v1044_v39 = vpop.f32.mrf.mxu2  ;;  %v1050_v43 = vpop.f32.mrf.mxu3 }
  0xb5   : > { %v388_v40 = vpop.f32.mrf.mxu0  ;;  %v1046_v41 = vpop.f32.mrf.mxu1  ;;  %v858_v42 = vpack.c.bf16 %v1044_v39, %v1034_v33  ;;  %v878_v44 = vpack.c.bf16 %v1050_v43, %v1040_v38 }
  0xb6   : > { %v567_v60 = vmul.f32 %v388_v40, %v388_v40  ;;  %v526_v5 = vadd.f32 %v525_v0, %v388_v40  ;;  %v580_v0 = vmul.f32 %v1022_v27, %v1022_v27 }
  0xb7   : > { %898 = vst [vmem:[%s967_s24 + $0x48] sm:$0xff] %v858_v42  }
  0xb8   : > { %902 = vst [vmem:[%s967_s24 + $0x68] sm:$0xff] %v878_v44   ;;  %v598_v6 = vadd.f32 %v597_v2, %v567_v60 }
  0xbc   : > { %v1056_v45 = vpop.f32.mrf.mxu2  ;;  %v1062_v50 = vpop.f32.mrf.mxu3 }
  0xbd   : > { %v390_v46 = vpop.f32.mrf.mxu0  ;;  %v1058_v47 = vpop.f32.mrf.mxu1 }
  0xbe   : > { %v823_v48 = vpack.c.bf16 %v390_v46, %v388_v40  ;;  %v843_v49 = vpack.c.bf16 %v1058_v47, %v1046_v41  ;;  %v568_v3 = vmul.f32 %v390_v46, %v390_v46  ;;  %v527_v8 = vadd.f32 %v526_v5, %v390_v46 }
  0xbf   : > { %v582_v5 = vmul.f32 %v1044_v39, %v1044_v39 }
  0xc0   : > { %891 = vst [vmem:[%s967_s24 + $0x10] sm:$0xff] %v823_v48   ;;  %v599_v9 = vadd.f32 %v598_v6, %v568_v3 }
  0xc1   : > { %895 = vst [vmem:[%s967_s24 + $0x30] sm:$0xff] %v843_v49   ;;  %v575_v49 = vmul.f32 %v1046_v41, %v1046_v41 }
  0xc4   : > { %v1066_v58 = vpop.f32.mrf.mxu2  ;;  %v1070_v1 = vpop.f32.mrf.mxu3 }
  0xc5   : > { %v393_v61 = vpop.f32.mrf.mxu0  ;;  %v413_v62 = vpop.f32.mrf.mxu1  ;;  %v863_v63 = vpack.c.bf16 %v1066_v58, %v1056_v45  ;;  %v883_v4 = vpack.c.bf16 %v1070_v1, %v1062_v50 }
  0xc6   : > { %v569_v7 = vmul.f32 %v393_v61, %v393_v61  ;;  %v528_v10 = vadd.f32 %v527_v8, %v393_v61  ;;  %v577_v56 = vmul.f32 %v413_v62, %v413_v62 }
  0xc7   : > { %899 = vst [vmem:[%s967_s24 + $0x50] sm:$0xff] %v863_v63  }
  0xc8   : > { %903 = vst [vmem:[%s967_s24 + $0x70] sm:$0xff] %v883_v4   ;;  %v600_v12 = vadd.f32 %v599_v9, %v569_v7 }
  0xcc   : > { %v433_v11 = vpop.f32.mrf.mxu2  ;;  %v1076_v19 = vpop.f32.mrf.mxu3 }
  0xcd   : > { %v395_v13 = vpop.f32.mrf.mxu0  ;;  %v415_v14 = vpop.f32.mrf.mxu1 }
  0xce   : > { %v828_v15 = vpack.c.bf16 %v395_v13, %v393_v61  ;;  %v529_v16 = vadd.f32 %v528_v10, %v395_v13  ;;  %v570_v17 = vmul.f32 %v395_v13, %v395_v13  ;;  %v848_v18 = vpack.c.bf16 %v415_v14, %v413_v62 }
  0xcf   : > { %v578_v60 = vmul.f32 %v415_v14, %v415_v14  ;;  %v579_v61 = vmul.f32 %v1012_v21, %v1012_v21  ;;  %v584_v10 = vmul.f32 %v1066_v58, %v1066_v58 }
  0xd0   : > { %892 = vst [vmem:[%s967_s24 + $0x18] sm:$0xff] %v828_v15   ;;  %v530_v24 = vadd.f32 %v529_v16, %v1010_v20  ;;  %v601_v25 = vadd.f32 %v600_v12, %v570_v17  ;;  %v574_v20 = vmul.f32 %v1036_v35, %v1036_v35 }
  0xd1   : > { %896 = vst [vmem:[%s967_s24 + $0x38] sm:$0xff] %v848_v18  }
  0xd2   : > { %v531_v30 = vadd.f32 %v530_v24, %v1014_v23  ;;  %v602_v32 = vadd.f32 %v601_v25, %v571_v22 }
  0xd4   : > { %v532_v36 = vadd.f32 %v531_v30, %v1024_v29  ;;  %v603_v37 = vadd.f32 %v602_v32, %v572_v28  ;;  %v435_v40 = vpop.f32.mrf.mxu2  ;;  %v455_v48 = vpop.f32.mrf.mxu3  ;;  %v576_v29 = vmul.f32 %v1058_v47, %v1058_v47  ;;  %v590_v30 = vmul.f32 %v1050_v43, %v1050_v43 }
  0xd5   : > { %v868_v42 = vpack.c.bf16 %v435_v40, %v433_v11  ;;  %v888_v23 = vpack.c.bf16 %v455_v48, %v1076_v19  ;;  %v586_v17 = vmul.f32 %v435_v40, %v435_v40 }
  0xd6   : > { %v604_v44 = vadd.f32 %v603_v37, %v573_v34  ;;  %v533_v46 = vadd.f32 %v532_v36, %v1036_v35 }
  0xd7   : > { %900 = vst [vmem:[%s967_s24 + $0x58] sm:$0xff] %v868_v42  }
  0xd8   : > { %v534_v51 = vadd.f32 %v533_v46, %v1046_v41  ;;  %v605_v52 = vadd.f32 %v604_v44, %v574_v20  ;;  %904 = vst [vmem:[%s967_s24 + $0x78] sm:$0xff] %v888_v23   ;;  %v593_v44 = vmul.f32 %v1076_v19, %v1076_v19  ;;  %v594_v23 = vmul.f32 %v455_v48, %v455_v48 }
  0xda   : > { %v535_v53 = vadd.f32 %v534_v51, %v1058_v47  ;;  %v606_v54 = vadd.f32 %v605_v52, %v575_v49  ;;  %v581_v47 = vmul.f32 %v1034_v33, %v1034_v33 }
  0xdc   : > { %v536_v55 = vadd.f32 %v535_v53, %v413_v62  ;;  %v607_v35 = vadd.f32 %v606_v54, %v576_v29 }
  0xde   : > { %v608_v57 = vadd.f32 %v607_v35, %v577_v56  ;;  %v537_v59 = vadd.f32 %v536_v55, %v415_v14  ;;  %v585_v14 = vmul.f32 %v433_v11, %v433_v11  ;;  %v522_v35 = vld [vmem:[%s1158_s3] sm:$0x1] }
  0xe0   : > { %v538_v63 = vadd.f32 %v537_v59, %v1012_v21  ;;  %v609_v41 = vadd.f32 %v608_v57, %v578_v60  ;;  %v583_v21 = vmul.f32 %v1056_v45, %v1056_v45 }
  0xe2   : > { %v539_v2 = vadd.f32 %v538_v63, %v1022_v27  ;;  %v610_v3 = vadd.f32 %v609_v41, %v579_v61 }
  0xe4   : > { %v540_v62 = vadd.f32 %v539_v2, %v1034_v33  ;;  %v611_v4 = vadd.f32 %v610_v3, %v580_v0 }
  0xe6   : > { %v612_v6 = vadd.f32 %v611_v4, %v581_v47  ;;  %v541_v7 = vadd.f32 %v540_v62, %v1044_v39  ;;  %v587_v39 = vmul.f32 %v1018_v26, %v1018_v26 }
  0xe8   : > { %v542_v8 = vadd.f32 %v541_v7, %v1056_v45  ;;  %v613_v9 = vadd.f32 %v612_v6, %v582_v5  ;;  %v588_v45 = vmul.f32 %v1028_v31, %v1028_v31 }
  0xea   : > { %v543_v27 = vadd.f32 %v542_v8, %v1066_v58  ;;  %v614_v12 = vadd.f32 %v613_v9, %v583_v21  ;;  %v589_v58 = vmul.f32 %v1040_v38, %v1040_v38 }
  0xec   : > { %v615_v33 = vadd.f32 %v614_v12, %v584_v10  ;;  %v544_v13 = vadd.f32 %v543_v27, %v433_v11 }
  0xee   : > { %v616_v15 = vadd.f32 %v615_v33, %v585_v14  ;;  %v545_v16 = vadd.f32 %v544_v13, %v435_v40  ;;  %v592_v40 = vmul.f32 %v1070_v1, %v1070_v1 }
  0xf0   : > { %v546_v18 = vadd.f32 %v545_v16, %v1018_v26  ;;  %v617_v22 = vadd.f32 %v616_v15, %v586_v17  ;;  %v591_v26 = vmul.f32 %v1062_v50, %v1062_v50 }
  0xf2   : > { %v547_v24 = vadd.f32 %v546_v18, %v1028_v31  ;;  %v618_v25 = vadd.f32 %v617_v22, %v587_v39 }
  0xf4   : > { %v548_v11 = vadd.f32 %v547_v24, %v1040_v38  ;;  %v619_v28 = vadd.f32 %v618_v25, %v588_v45 }
  0xf6   : > { %v620_v32 = vadd.f32 %v619_v28, %v589_v58  ;;  %v549_v34 = vadd.f32 %v548_v11, %v1050_v43 }
  0xf8   : > { %v550_v36 = vadd.f32 %v549_v34, %v1062_v50  ;;  %v621_v37 = vadd.f32 %v620_v32, %v590_v30 }
  0xfa   : > { %v551_v31 = vadd.f32 %v550_v36, %v1070_v1  ;;  %v622_v42 = vadd.f32 %v621_v37, %v591_v26 }
  0xfc   : > { %v623_v38 = vadd.f32 %v622_v42, %v592_v40  ;;  %v552_v20 = vadd.f32 %v551_v31, %v1076_v19  ;;  %v562_v19 = vld [vmem:[%s1159_s4] sm:$0x1] }
  0xfe   : > { %v624_v46 = vadd.f32 %v623_v38, %v593_v44  ;;  %v553_v43 = vadd.f32 %v552_v20, %v455_v48 }
 0x100   : > { %v554_v49 = vrot.slane %v553_v43, 4  ;;  %v625_v51 = vadd.f32 %v624_v46, %v594_v23 }
 0x102   : > { %v555_v52 = vadd.f32 %v554_v49, %v553_v43  ;;  %v626_v50 = vrot.slane %v625_v51, 4 }
 0x104   : > { %v556_v29 = vrot.slane %v555_v52, 2  ;;  %v627_v53 = vadd.f32 %v626_v50, %v625_v51 }
 0x106   : > { %v557_v54 = vadd.f32 %v556_v29, %v555_v52  ;;  %v628_v55 = vrot.slane %v627_v53, 2 }
 0x108   : > { %v558_v56 = vrot.slane %v557_v54, 1  ;;  %v629_v1 = vadd.f32 %v628_v55, %v627_v53 }
 0x10a   : > { %v559_v57 = vadd.f32 %v558_v56, %v557_v54  ;;  %v630_v59 = vrot.slane %v629_v1, 1 }
 0x10c   : > { %v560_v48 = vadd.f32 %v559_v57, %v522_v35  ;;  %v631_v60 = vadd.f32 %v630_v59, %v629_v1 }
 0x10e   : > { %561 = vst [vmem:[%s1158_s3] sm:$0x1] %v560_v48  ;;  %v632_v61 = vadd.f32 %v631_v60, %v562_v19 }
 0x110   : > { %633 = vst [vmem:[%s1159_s4] sm:$0x1] %v632_v61 }
 0x111 PF: > { %s15_s15 = sadd.s32 1, %s923_s15  }
 0x112   : > { %p12_p5 = scmp.ge.s32.totalorder %s15_s15, 4  }
 0x114   :  { %14 = sbr.rel (!%p12_p5) target bundleno = 1 (0x1), region = 78 }

// kernel: block_forward.7
= control target key start
LH: loop header
LB: loop body
LE: loop exit
PB: predicated region body
PF: predicated region fallthrough
CT: control target
= control target key end

     0   :  { %9 = vsyncpa [#allocation3], 0  ;;  %s2408_s0 = inlined_call_operand.vmem [shape: bf16[512,128], index: 0, kind: input, shape index: {}]   ;;  %s2409_s1 = inlined_call_operand.vmem [shape: bf16[128,128], index: 1, kind: input, shape index: {}]   ;;  %s2410_s2 = inlined_call_operand.vmem [shape: f32[1,128], index: 2, kind: input, shape index: {}]   ;;  %s2411_s3 = inlined_call_operand.vmem [shape: f32[1,128], index: 3, kind: input, shape index: {}]   ;;  %s2412_s4 = inlined_call_operand.hbm [shape: f32[512,32], index: 4, kind: output, shape index: {}]  }
   0x1   :  { %11 = vsyncpa [#allocation3 + $0x1], 0  ;;  %s1738_s15 = smov 0   ;;  %s1740_s16 = smov 0  }
   0x2   :  { %s1742_s17 = smov 0   ;;  %s1744_s18 = smov 0  }
   0x3 LB: > { %s1759_s19 = sadd.s32 4294967295, %s1709_s18   ;;  %s1287_s20 = sadd.s32 4294967294, %s1709_s18   ;;  %s1709_s18 = sphi %s1744_s18, %s2454_s18   ;;  %s1705_s17 = sphi %s1742_s17, %s2453_s17   ;;  %s1701_s16 = sphi %s1740_s16, %s2452_s16   ;;  %s1697_s15 = sphi %s1738_s15, %s2451_s15  }
   0x4   : > { %s1763_s21 = sadd.s32 1, %s1709_s18   ;;  %s113_s22 = sadd.s32 1, %s1705_s17 }
   0x5   : > { %s110_s23 = ssub.s32 %s1709_s18, %s1763_s21  ;;  %p123_p0 = scmp.ne.s32.totalorder %s1705_s17, %s1701_s16 }
   0x6   : > { %p111_p1 = scmp.eq.s32.totalorder %s110_s23, 0  ;;  %p124_p2 = scmp.eq.s32.totalorder %s1759_s19, 1 }
   0x7   : > { %p129_p3 = scmp.ne.s32.totalorder %s1701_s16, %s1697_s15  ;;  %p130_p4 = scmp.eq.s32.totalorder %s1287_s20, 1 }
   0x8   : > { %s1774_s24 = scalar_select %p111_p1, %s1705_s17, %s113_s22  }
   0x9   : > { %p1776_p5 = por %p124_p2, %p123_p0  ;;  %p1780_p6 = por %p130_p4, %p129_p3 }
   0xa   : > { %p1290_p7 = scmp.ge.s32.totalorder %s1709_s18, 1  ;;  %p166_p8 = scmp.lt.s32.totalorder %s1709_s18, 3 }
   0xc   : > { %p167_p9 = pnand %p1290_p7, %p166_p8 }
   0xd   : > { %s1292_s9 = sshll.u32 (!%p167_p9), %s1759_s19, 5  ;;  %s1451_s12 = sshll.u32 (!%p167_p9), %s1759_s19, 8 }
   0xe   : > { %170 = sbr.rel (%p167_p9) target bundleno = 340 (0x154), region = 36  ;;  %p193_p10 = scmp.lt.s32.totalorder (!%p167_p9), %s1292_s9, 63 }
   0xf   : > { %s1221_s19 = scalar_lea.hbm (!%p167_p9), %s2412_s4, %s1451_s12  ;;  %s1667_s5 = scalar_lea.hbm (!%p167_p9), %s2412_s4, 512 }
  0x13   : > { %v1450_v0 = vld [vmem:[%s2409_s1 + $0x38] sm:$0xff]  ;;  %v1449_v1 = vld [vmem:[%s2409_s1 + $0x30] sm:$0xff]  ;;  %v1448_v2 = vld [vmem:[%s2409_s1 + $0x28] sm:$0xff]  ;;  %s2456_s9 = smov (!%p193_p10, %s1292_s9), 63  ;;  %vm1176_vm4 = vcmask 261120  }
  0x14   : > { %398 = vmatpush.bf16.msra.mxu0 %v1450_v0  ;;  %1452 = vmatpush.bf16.msra.mxu1 %v1450_v0  ;;  %v1447_v3 = vld [vmem:[%s2409_s1 + $0x20] sm:$0xff]  ;;  %v1446_v4 = vld [vmem:[%s2409_s1 + $0x18] sm:$0xff]  ;;  %v1445_v5 = vld [vmem:[%s2409_s1 + $0x10] sm:$0xff]  ;;  %s1293_s22 = sshll.u32 %s2456_s9, 2  ;;  %s189_s9 = sand.u32 1, %s1701_s16  }
  0x15   : > { %1453 = vmatpush.bf16.msra.mxu2 %v1450_v0  ;;  %1454 = vmatpush.bf16.msra.mxu3 %v1450_v0  ;;  %v1444_v6 = vld [vmem:[%s2409_s1 + $0x8] sm:$0xff]  ;;  %v1443_v7 = vld [vmem:[%s2409_s1] sm:$0xff]  ;;  %s1814_s30 = scalar_lea.vmem %s2408_s0, %s1293_s22  ;;  %s1291_s10 = sshll.u32 %s189_s9, 8 }
  0x16   : > { %v1427_v8 = vld [vmem:[%s1814_s30] sm:$0xff]  ;;  %v1428_v12 = vld [vmem:[%s1814_s30 + $0x8] sm:$0xff]  ;;  %v1429_v16 = vld [vmem:[%s1814_s30 + $0x10] sm:$0xff]  ;;  %s1919_s11 = scalar_lea.vmem [#allocation2], %s1291_s10  ;;  %s1224_s22 = sshll.u32 %s1221_s19, 4  ;;  %s1225_s22 = int_to_ptr.hbm [resolvable:$true] %s1224_s22 }
  0x17   : > { %v1431_v9 = vld [vmem:[%s1814_s30 + $0x20] sm:$0xff]  ;;  %v1432_v13 = vld [vmem:[%s1814_s30 + $0x28] sm:$0xff]  ;;  %v1433_v17 = vld [vmem:[%s1814_s30 + $0x30] sm:$0xff]  ;;  %s1222_s20 = sshll.u32 %s1919_s11, 4  ;;  %s1210_s23 = scalar_lea.sflag [#allocation3], %s189_s9  ;;  %s1223_s20 = int_to_ptr.vmem [resolvable:$true] %s1222_s20 }
  0x18   : > { %399 = vmatpush.bf16.msra.mxu0 %v1449_v1  ;;  %1455 = vmatpush.bf16.msra.mxu1 %v1449_v1  ;;  %v1435_v10 = vld [vmem:[%s1814_s30 + $0x40] sm:$0xff]  ;;  %v1436_v14 = vld [vmem:[%s1814_s30 + $0x48] sm:$0xff]  ;;  %v1437_v18 = vld [vmem:[%s1814_s30 + $0x50] sm:$0xff]  ;;  %s1661_s27 = sshra.s32 %s1225_s22, 4  ;;  %s1662_s27 = int_to_ptr.hbm [resolvable:$true] %s1661_s27 }
  0x19   : > { %1456 = vmatpush.bf16.msra.mxu2 %v1449_v1  ;;  %1457 = vmatpush.bf16.msra.mxu3 %v1449_v1  ;;  %v1439_v11 = vld [vmem:[%s1814_s30 + $0x60] sm:$0xff]  ;;  %v1440_v15 = vld [vmem:[%s1814_s30 + $0x68] sm:$0xff]  ;;  %v1441_v19 = vld [vmem:[%s1814_s30 + $0x70] sm:$0xff]  ;;  %s1663_s28 = scalar_lea.hbm %s1662_s27, 256  ;;  %p1668_p0 = scmp.lt.s32.totalorder %s1662_s27, %s2412_s4 }
  0x1a   : > { %v1430_v20 = vld [vmem:[%s1814_s30 + $0x18] sm:$0xff]  ;;  %v199_v24 = vld [vmem:[%s2410_s2] sm:$0x1]  ;;  %p1664_p11 = scmp.ne.s32.totalorder %s1662_s27, %s1663_s28  ;;  %p1669_p1 = scmp.lt.s32.totalorder %s1667_s5, %s1663_s28 }
  0x1b   : > { %v1434_v21 = vld [vmem:[%s1814_s30 + $0x38] sm:$0xff]  ;;  %v200_v25 = vmul.f32 0.001953125, %v199_v24  ;;  %v201_v26 = vld [vmem:[%s2411_s3] sm:$0x1] }
  0x1c   : > { %400 = vmatpush.bf16.msra.mxu0 %v1448_v2  ;;  %1458 = vmatpush.bf16.msra.mxu1 %v1448_v2  ;;  %v1438_v22 = vld [vmem:[%s1814_s30 + $0x58] sm:$0xff]  ;;  %v202_v27 = vmul.f32 0.001953125, %v201_v26  ;;  %p1665_p12 = pnand %p1664_p11, %p1776_p5  ;;  %p1670_p2 = por %p1669_p1, %p1668_p0 }
  0x1d   : > { %1459 = vmatpush.bf16.msra.mxu2 %v1448_v2  ;;  %1460 = vmatpush.bf16.msra.mxu3 %v1448_v2  ;;  %v1442_v23 = vld [vmem:[%s1814_s30 + $0x78] sm:$0xff]  ;;  %v203_v28 = vmul.f32 %v200_v25, %v200_v25  ;;  %v1838_v39 = vperm.slane %v200_v25, 0 }
  0x1e   : > { %p1666_p13 = pneg %p1665_p12 }
  0x1f   : > { %v204_v29 = vsub.f32 %v202_v27, %v203_v28 }
  0x20   : > { %401 = vmatpush.bf16.msra.mxu0 %v1447_v3  ;;  %1461 = vmatpush.bf16.msra.mxu1 %v1447_v3  ;;  %p1671_p3 = pnand %p1670_p2, %p1666_p13 }
  0x21   : > { %1462 = vmatpush.bf16.msra.mxu2 %v1447_v3  ;;  %1463 = vmatpush.bf16.msra.mxu3 %v1447_v3  ;;  %v205_v30 = vmax.f32 %v204_v29, 0.0 }
  0x23   : > { %v522_v31 = vadd.f32 1e-05, %v205_v30 }
  0x24   : > { %402 = vmatpush.bf16.msra.mxu0 %v1446_v4  ;;  %1464 = vmatpush.bf16.msra.mxu1 %v1446_v4 }
  0x25   : > { %1465 = vmatpush.bf16.msra.mxu2 %v1446_v4  ;;  %1466 = vmatpush.bf16.msra.mxu3 %v1446_v4  ;;  %1517 = vrsqrt.f32 %v522_v31  ;;  %vm529_vm0 = vweird.f32 %v522_v31 }
  0x28   : > { %403 = vmatpush.bf16.msra.mxu0 %v1445_v5  ;;  %1467 = vmatpush.bf16.msra.mxu1 %v1445_v5 }
  0x29   : > { %1468 = vmatpush.bf16.msra.mxu2 %v1445_v5  ;;  %1469 = vmatpush.bf16.msra.mxu3 %v1445_v5 }
  0x2b   : > { %v1518_v32 = vpop.eup %1517 }
  0x2c   : > { %404 = vmatpush.bf16.msra.mxu0 %v1444_v6  ;;  %1470 = vmatpush.bf16.msra.mxu1 %v1444_v6  ;;  %v524_v33 = vmul.f32 %v1518_v32, %v522_v31  ;;  %vm530_vm1 = vweird.f32 %v1518_v32 }
  0x2d   : > { %1471 = vmatpush.bf16.msra.mxu2 %v1444_v6  ;;  %1472 = vmatpush.bf16.msra.mxu3 %v1444_v6  ;;  %vm531_vm2 = vmor %vm529_vm0, %vm530_vm1 }
  0x2e   : > { %v525_v34 = vmul.f32 %v1518_v32, %v524_v33 }
  0x30   : > { %405 = vmatpush.bf16.msra.mxu0 %v1443_v7  ;;  %1473 = vmatpush.bf16.msra.mxu1 %v1443_v7  ;;  %v526_v35 = vmul.f32 0.5, %v525_v34 }
  0x31   : > { %1474 = vmatpush.bf16.msra.mxu2 %v1443_v7  ;;  %1475 = vmatpush.bf16.msra.mxu3 %v1443_v7 }
  0x32   : > { %v527_v36 = vsub.f32 1.5, %v526_v35 }
  0x33   : > { %406 = vmatmul.bf16.vlgmr.msra.gmra.mxu0 %v1427_v8  ;;  %426 = vmatmul.bf16.vlgmr.msra.gmra.mxu1 %v1431_v9 }
  0x34   : > { %446 = vmatmul.bf16.vlgmr.msra.gmra.mxu2 %v1435_v10  ;;  %466 = vmatmul.bf16.vlgmr.msra.gmra.mxu3 %v1439_v11  ;;  %v528_v37 = vmul.f32 %v1518_v32, %v527_v36 }
  0x36   : > { %v532_v38 = vsel %vm531_vm2, %v1518_v32, %v528_v37 }
  0x37   : > { %v1840_v40 = vperm.slane %v532_v38, 0 }
  0x43   : > { %411 = vmatmul.bf16.gmra.mxu0 %v1428_v12  ;;  %431 = vmatmul.bf16.gmra.mxu1 %v1432_v13 }
  0x44   : > { %451 = vmatmul.bf16.gmra.mxu2 %v1436_v14  ;;  %471 = vmatmul.bf16.gmra.mxu3 %v1440_v15 }
  0x53   : > { %416 = vmatmul.bf16.gmra.mxu0 %v1429_v16  ;;  %436 = vmatmul.bf16.gmra.mxu1 %v1433_v17 }
  0x54   : > { %456 = vmatmul.bf16.gmra.mxu2 %v1437_v18  ;;  %476 = vmatmul.bf16.gmra.mxu3 %v1441_v19 }
  0x63   : > { %421 = vmatmul.bf16.gmra.mxu0 %v1430_v20  ;;  %441 = vmatmul.bf16.gmra.mxu1 %v1434_v21 }
  0x64   : > { %461 = vmatmul.bf16.gmra.mxu2 %v1438_v22  ;;  %481 = vmatmul.bf16.gmra.mxu3 %v1442_v23 }
  0xb0   : > { %v407_v41 = vpop.f32.mrf.mxu0  ;;  %v427_v42 = vpop.f32.mrf.mxu1 }
  0xb1   : > { %v490_v43 = vsub.f32 %v407_v41, %v1838_v39  ;;  %v498_v44 = vsub.f32 %v427_v42, %v1838_v39 }
  0xb3   : > { %v536_v45 = vmul.f32 %v1840_v40, %v490_v43  ;;  %v544_v46 = vmul.f32 %v1840_v40, %v498_v44 }
  0xb5   : > { %v1390_v47 = vmul.f32 -1.442695, %v536_v45  ;;  %v1398_v48 = vmul.f32 -1.442695, %v544_v46 }
  0xb7   : > { %1519 = vpow2.f32 %v1390_v47  ;;  %v447_v49 = vpop.f32.mrf.mxu2  ;;  %v467_v50 = vpop.f32.mrf.mxu3 }
  0xb8   : > { %1521 = vpow2.f32 %v1398_v48  ;;  %v506_v51 = vsub.f32 %v447_v49, %v1838_v39  ;;  %v514_v52 = vsub.f32 %v467_v50, %v1838_v39  ;;  %v409_v53 = vpop.f32.mrf.mxu0  ;;  %v429_v54 = vpop.f32.mrf.mxu1 }
  0xb9   : > { %v491_v55 = vsub.f32 %v409_v53, %v1838_v39  ;;  %v499_v56 = vsub.f32 %v429_v54, %v1838_v39 }
  0xba   : > { %v552_v57 = vmul.f32 %v1840_v40, %v506_v51  ;;  %v560_v58 = vmul.f32 %v1840_v40, %v514_v52 }
  0xbb   : > { %v537_v59 = vmul.f32 %v1840_v40, %v491_v55  ;;  %v545_v60 = vmul.f32 %v1840_v40, %v499_v56 }
  0xbc   : > { %v1406_v61 = vmul.f32 -1.442695, %v552_v57  ;;  %v1414_v62 = vmul.f32 -1.442695, %v560_v58 }
  0xbd   : > { %v1520_v63 = vpop.eup %1519  ;;  %v1391_v2 = vmul.f32 -1.442695, %v537_v59  ;;  %v1399_v4 = vmul.f32 -1.442695, %v545_v60 }
  0xbe   : > { %v1522_v0 = vpop.eup %1521  ;;  %v1854_v1 = vadd.f32 1.0, %v1520_v63  ;;  %1523 = vpow2.f32 %v1406_v61 }
  0xbf   : > { %v1856_v3 = vadd.f32 1.0, %v1522_v0  ;;  %1525 = vpow2.f32 %v1414_v62  ;;  %v449_v5 = vpop.f32.mrf.mxu2  ;;  %v469_v7 = vpop.f32.mrf.mxu3 }
  0xc0   : > { %1527 = vrcp.f32 %v1854_v1  ;;  %v507_v6 = vsub.f32 %v449_v5, %v1838_v39  ;;  %v705_v8 = vand.u32 2147483647, %v1854_v1  ;;  %v412_v9 = vpop.f32.mrf.mxu0  ;;  %v432_v10 = vpop.f32.mrf.mxu1  ;;  %v707_v12 = vand.u32 2147483648, %v1854_v1 }
  0xc1   : > { %1529 = vrcp.f32 %v1856_v3  ;;  %v825_v13 = vand.u32 2147483647, %v1856_v3  ;;  %v827_v16 = vand.u32 2147483648, %v1856_v3  ;;  %v515_v18 = vsub.f32 %v469_v7, %v1838_v39 }
  0xc2   : > { %1531 = vpow2.f32 %v1391_v2  ;;  %v553_v14 = vmul.f32 %v1840_v40, %v507_v6  ;;  %vm701_vm3 = vweird.f32 %v1854_v1  ;;  %v492_v21 = vsub.f32 %v412_v9, %v1838_v39 }
  0xc3   : > { %1533 = vpow2.f32 %v1399_v4  ;;  %v500_v22 = vsub.f32 %v432_v10, %v1838_v39  ;;  %vm1875_vm5 = vcmp.eq.f32.partialorder %v705_v8, 8.507059e+37  ;;  %vm821_vm6 = vweird.f32 %v1856_v3 }
  0xc4   : > { %v1524_v11 = vpop.eup %1523  ;;  %v708_v27 = vor.u32 1.1754944e-38, %v707_v12  ;;  %vm1883_vm7 = vcmp.eq.f32.partialorder %v825_v13, 8.507059e+37  ;;  %v1407_v30 = vmul.f32 -1.442695, %v553_v14  ;;  %v828_v33 = vor.u32 1.1754944e-38, %v827_v16 }
  0xc5   : > { %v1526_v15 = vpop.eup %1525  ;;  %v1866_v17 = vadd.f32 1.0, %v1524_v11  ;;  %v561_v34 = vmul.f32 %v1840_v40, %v515_v18  ;;  %v538_v36 = vmul.f32 %v1840_v40, %v492_v21  ;;  %v546_v37 = vmul.f32 %v1840_v40, %v500_v22 }
  0xc6   : > { %v1528_v19 = vpop.eup %1527  ;;  %v1870_v20 = vadd.f32 1.0, %v1526_v15 }
  0xc7   : > { %v1530_v23 = vpop.eup %1529  ;;  %v697_v24 = vmul.f32 %v1528_v19, %v1854_v1  ;;  %1535 = vrcp.f32 %v1866_v17  ;;  %vm702_vm8 = vweird.f32 %v1528_v19  ;;  %v945_v41 = vand.u32 2147483647, %v1866_v17  ;;  %v452_v22 = vpop.f32.mrf.mxu2 }
  0xc8   : > { %v1532_v26 = vpop.eup %1531  ;;  %v817_v28 = vmul.f32 %v1530_v23, %v1856_v3  ;;  %1537 = vrcp.f32 %v1870_v20  ;;  %vm822_vm9 = vweird.f32 %v1530_v23  ;;  %vm941_vm10 = vweird.f32 %v1866_v17  ;;  %vm703_vm11 = vmor %vm701_vm3, %vm702_vm8 }
  0xc9   : > { %v1534_v31 = vpop.eup %1533  ;;  %v698_v32 = vsub.f32 1.0, %v697_v24  ;;  %v1894_v42 = vadd.f32 1.0, %v1532_v26  ;;  %1539 = vpow2.f32 %v1407_v30  ;;  %v947_v47 = vand.u32 2147483648, %v1866_v17  ;;  %vm823_vm13 = vmor %vm821_vm6, %vm822_vm9 }
  0xca   : > { %v818_v35 = vsub.f32 1.0, %v817_v28  ;;  %v1896_v43 = vadd.f32 1.0, %v1534_v31  ;;  %v1065_v48 = vand.u32 2147483647, %v1870_v20  ;;  %vm1061_vm12 = vweird.f32 %v1870_v20 }
  0xcb   : > { %v699_v38 = vmul.f32 %v1528_v19, %v698_v32  ;;  %1541 = vrcp.f32 %v1894_v42  ;;  %v1415_v51 = vmul.f32 -1.442695, %v561_v34  ;;  %vm1910_vm14 = vcmp.eq.f32.partialorder %v945_v41, 8.507059e+37 }
  0xcc   : > { %v819_v44 = vmul.f32 %v1530_v23, %v818_v35  ;;  %v1067_v55 = vand.u32 2147483648, %v1870_v20  ;;  %1543 = vrcp.f32 %v1896_v43  ;;  %v948_v61 = vor.u32 1.1754944e-38, %v947_v47 }
  0xcd   : > { %v1536_v45 = vpop.eup %1535  ;;  %v700_v46 = vadd.f32 %v1528_v19, %v699_v38  ;;  %vm1925_vm15 = vcmp.eq.f32.partialorder %v1065_v48, 8.507059e+37  ;;  %v720_v63 = vand.u32 2147483647, %v1894_v42  ;;  %1545 = vpow2.f32 %v1415_v51 }
  0xce   : > { %v820_v49 = vadd.f32 %v1530_v23, %v819_v44  ;;  %v937_v50 = vmul.f32 %v1536_v45, %v1866_v17  ;;  %v1538_v52 = vpop.eup %1537  ;;  %vm942_vm0 = vweird.f32 %v1536_v45  ;;  %v1068_v4 = vor.u32 1.1754944e-38, %v1067_v55 }
  0xcf   : > { %v704_v53 = vsel %vm703_vm11, %v1528_v19, %v700_v46  ;;  %v1057_v59 = vmul.f32 %v1538_v52, %v1870_v20  ;;  %v1540_v0 = vpop.eup %1539  ;;  %vm1062_vm1 = vweird.f32 %v1538_v52  ;;  %vm716_vm2 = vweird.f32 %v1894_v42  ;;  %vm943_vm3 = vmor %vm941_vm10, %vm942_vm0 }
  0xd0   : > { %v709_v56 = vsel %vm1875_vm5, %v708_v27, %v704_v53  ;;  %v824_v57 = vsel %vm823_vm13, %v1530_v23, %v820_v49  ;;  %v938_v58 = vsub.f32 1.0, %v937_v50  ;;  %v1933_v5 = vadd.f32 1.0, %v1540_v0  ;;  %vm1063_vm6 = vmor %vm1061_vm12, %vm1062_vm1  ;;  %v472_v23 = vpop.f32.mrf.mxu3 }
  0xd1   : > { %1177 = vst.msk [vmem:[%s1919_s11] sm:$0xff] %vm1176_vm4, %v709_v56  ;;  %v829_v60 = vsel %vm1883_vm7, %v828_v33, %v824_v57  ;;  %v1058_v2 = vsub.f32 1.0, %v1057_v59  ;;  %v1542_v3 = vpop.eup %1541  ;;  %v1392_v9 = vmul.f32 -1.442695, %v538_v36  ;;  %vm1938_vm5 = vcmp.eq.f32.partialorder %v720_v63, 8.507059e+37  ;;  %v414_v33 = vpop.f32.mrf.mxu0 }
  0xd2   : > { %1185 = vst.msk [vmem:[%s1919_s11 + $0x40] sm:$0xff] %vm1176_vm4, %v829_v60  ;;  %v939_v1 = vmul.f32 %v1536_v45, %v938_v58  ;;  %v712_v8 = vmul.f32 %v1542_v3, %v1894_v42  ;;  %v1544_v10 = vpop.eup %1543  ;;  %v722_v12 = vand.u32 2147483648, %v1894_v42  ;;  %1547 = vrcp.f32 %v1933_v5  ;;  %v434_v57 = vpop.f32.mrf.mxu1 }
  0xd3   : > { %v1059_v7 = vmul.f32 %v1538_v52, %v1058_v2  ;;  %v1400_v13 = vmul.f32 -1.442695, %v546_v37  ;;  %v832_v18 = vmul.f32 %v1544_v10, %v1896_v43  ;;  %vm717_vm7 = vweird.f32 %v1542_v3  ;;  %v1546_v24 = vpop.eup %1545 }
  0xd4   : > { %v940_v6 = vadd.f32 %v1536_v45, %v939_v1  ;;  %v713_v16 = vsub.f32 1.0, %v712_v8  ;;  %v840_v17 = vand.u32 2147483647, %v1896_v43  ;;  %v842_v21 = vand.u32 2147483648, %v1896_v43  ;;  %vm718_vm9 = vmor %vm716_vm2, %vm717_vm7 }
  0xd5   : > { %v1060_v15 = vadd.f32 %v1538_v52, %v1059_v7  ;;  %v833_v27 = vsub.f32 1.0, %v832_v18  ;;  %1549 = vpow2.f32 %v1392_v9  ;;  %vm837_vm8 = vweird.f32 %v1544_v10 }
  0xd6   : > { %v944_v14 = vsel %vm943_vm3, %v1536_v45, %v940_v6  ;;  %v714_v26 = vmul.f32 %v1542_v3, %v713_v16  ;;  %v1956_v20 = vadd.f32 1.0, %v1546_v24  ;;  %1551 = vpow2.f32 %v1400_v13 }
  0xd7   : > { %v949_v19 = vsel %vm1910_vm14, %v948_v61, %v944_v14  ;;  %v1064_v25 = vsel %vm1063_vm6, %v1538_v52, %v1060_v15  ;;  %v834_v30 = vmul.f32 %v1544_v10, %v833_v27  ;;  %v508_v31 = vsub.f32 %v452_v22, %v1838_v39 }
  0xd8   : > { %1193 = vst.msk [vmem:[%s1919_s11 + $0x80] sm:$0xff] %vm1176_vm4, %v949_v19  ;;  %v1069_v28 = vsel %vm1925_vm15, %v1068_v4, %v1064_v25  ;;  %v715_v29 = vadd.f32 %v1542_v3, %v714_v26  ;;  %v516_v32 = vsub.f32 %v472_v23, %v1838_v39  ;;  %v1548_v34 = vpop.eup %1547  ;;  %v723_v35 = vor.u32 1.1754944e-38, %v722_v12  ;;  %v474_v9 = vpop.f32.mrf.mxu3 }
  0xd9   : > { %1201 = vst.msk [vmem:[%s1919_s11 + $0xc0] sm:$0xff] %vm1176_vm4, %v1069_v28  ;;  %vm836_vm10 = vweird.f32 %v1896_v43  ;;  %vm1966_vm11 = vcmp.eq.f32.partialorder %v840_v17, 8.507059e+37  ;;  %1553 = vrcp.f32 %v1956_v20  ;;  %v835_v38 = vadd.f32 %v1544_v10, %v834_v30 }
  0xda   : > { %v719_v37 = vsel %vm718_vm9, %v1542_v3, %v715_v29  ;;  %v843_v41 = vor.u32 1.1754944e-38, %v842_v21  ;;  %v952_v44 = vmul.f32 %v1548_v34, %v1933_v5  ;;  %vm838_vm12 = vmor %vm836_vm10, %vm837_vm8  ;;  %v960_v42 = vand.u32 2147483647, %v1933_v5 }
  0xdb   : > { %v724_v45 = vsel %vm1938_vm5, %v723_v35, %v719_v37  ;;  %v962_v43 = vand.u32 2147483648, %v1933_v5  ;;  %v554_v46 = vmul.f32 %v1840_v40, %v508_v31  ;;  %v1550_v47 = vpop.eup %1549  ;;  %v839_v48 = vsel %vm838_vm12, %v1544_v10, %v835_v38  ;;  %v417_v10 = vpop.f32.mrf.mxu0 }
  0xdc   : > { %1178 = vst.msk [vmem:[%s1919_s11 + $0x8] sm:$0xff] %vm1176_vm4, %v724_v45  ;;  %v953_v49 = vsub.f32 1.0, %v952_v44  ;;  %v562_v50 = vmul.f32 %v1840_v40, %v516_v32  ;;  %v493_v51 = vsub.f32 %v414_v33, %v1838_v39  ;;  %v1552_v52 = vpop.eup %1551  ;;  %v844_v53 = vsel %vm1966_vm11, %v843_v41, %v839_v48 }
  0xdd   : > { %v1080_v54 = vand.u32 2147483647, %v1956_v20  ;;  %v1082_v55 = vand.u32 2147483648, %v1956_v20  ;;  %v1986_v56 = vadd.f32 1.0, %v1550_v47  ;;  %1186 = vst.msk [vmem:[%s1919_s11 + $0x48] sm:$0xff] %vm1176_vm4, %v844_v53  ;;  %vm957_vm13 = vweird.f32 %v1548_v34  ;;  %v437_v47 = vpop.f32.mrf.mxu1 }
  0xde   : > { %v954_v58 = vmul.f32 %v1548_v34, %v953_v49  ;;  %v1990_v59 = vadd.f32 1.0, %v1552_v52  ;;  %v1408_v60 = vmul.f32 -1.442695, %v554_v46  ;;  %vm956_vm14 = vweird.f32 %v1933_v5  ;;  %v454_v5 = vpop.f32.mrf.mxu2 }
  0xdf   : > { %v1554_v61 = vpop.eup %1553  ;;  %1555 = vrcp.f32 %v1986_v56  ;;  %v1416_v62 = vmul.f32 -1.442695, %v562_v50  ;;  %v539_v63 = vmul.f32 %v1840_v40, %v493_v51  ;;  %v501_v2 = vsub.f32 %v434_v57, %v1838_v39  ;;  %vm958_vm15 = vmor %vm956_vm14, %vm957_vm13 }
  0xe0   : > { %v955_v0 = vadd.f32 %v1548_v34, %v954_v58  ;;  %v1072_v1 = vmul.f32 %v1554_v61, %v1956_v20  ;;  %1557 = vrcp.f32 %v1990_v59  ;;  %vm961_vm0 = vcmp.eq.f32.partialorder %v960_v42, 8.507059e+37 }
  0xe1   : > { %v963_v3 = vor.u32 1.1754944e-38, %v962_v43  ;;  %vm1076_vm1 = vweird.f32 %v1956_v20  ;;  %vm1999_vm2 = vcmp.eq.f32.partialorder %v1080_v54, 8.507059e+37  ;;  %v1083_v8 = vor.u32 1.1754944e-38, %v1082_v55 }
  0xe2   : > { %v959_v6 = vsel %vm958_vm15, %v1548_v34, %v955_v0  ;;  %v1073_v7 = vsub.f32 1.0, %v1072_v1  ;;  %1559 = vpow2.f32 %v1408_v60  ;;  %vm731_vm3 = vweird.f32 %v1986_v56 }
  0xe3   : > { %v964_v11 = vsel %vm961_vm0, %v963_v3, %v959_v6  ;;  %1561 = vpow2.f32 %v1416_v62  ;;  %v1393_v12 = vmul.f32 -1.442695, %v539_v63  ;;  %vm1077_vm5 = vweird.f32 %v1554_v61 }
  0xe4   : > { %1194 = vst.msk [vmem:[%s1919_s11 + $0x88] sm:$0xff] %vm1176_vm4, %v964_v11  ;;  %v1074_v13 = vmul.f32 %v1554_v61, %v1073_v7  ;;  %v547_v14 = vmul.f32 %v1840_v40, %v501_v2  ;;  %v509_v15 = vsub.f32 %v454_v5, %v1838_v39  ;;  %v735_v18 = vand.u32 2147483647, %v1986_v56  ;;  %vm1078_vm6 = vmor %vm1076_vm1, %vm1077_vm5 }
  0xe5   : > { %v1556_v16 = vpop.eup %1555  ;;  %1563 = vpow2.f32 %v1393_v12  ;;  %v517_v19 = vsub.f32 %v474_v9, %v1838_v39  ;;  %v494_v17 = vsub.f32 %v417_v10, %v1838_v39  ;;  %v737_v24 = vand.u32 2147483648, %v1986_v56 }
  0xe6   : > { %v1558_v21 = vpop.eup %1557  ;;  %v1075_v22 = vadd.f32 %v1554_v61, %v1074_v13  ;;  %v727_v23 = vmul.f32 %v1556_v16, %v1986_v56  ;;  %v1401_v25 = vmul.f32 -1.442695, %v547_v14  ;;  %vm851_vm7 = vweird.f32 %v1990_v59 }
  0xe7   : > { %v847_v26 = vmul.f32 %v1558_v21, %v1990_v59  ;;  %v857_v27 = vand.u32 2147483648, %v1990_v59  ;;  %v555_v28 = vmul.f32 %v1840_v40, %v509_v15  ;;  %v563_v32 = vmul.f32 %v1840_v40, %v517_v19  ;;  %v2070_v15 = vpop.f32.mrf.mxu2 }
  0xe8   : > { %v1560_v29 = vpop.eup %1559  ;;  %v1079_v30 = vsel %vm1078_vm6, %v1554_v61, %v1075_v22  ;;  %v728_v31 = vsub.f32 1.0, %v727_v23  ;;  %1565 = vpow2.f32 %v1401_v25  ;;  %v540_v36 = vmul.f32 %v1840_v40, %v494_v17 }
  0xe9   : > { %v1562_v33 = vpop.eup %1561  ;;  %v1084_v20 = vsel %vm1999_vm2, %v1083_v8, %v1079_v30  ;;  %v848_v34 = vsub.f32 1.0, %v847_v26  ;;  %v2022_v35 = vadd.f32 1.0, %v1560_v29  ;;  %vm732_vm8 = vweird.f32 %v1556_v16 }
  0xea   : > { %1202 = vst.msk [vmem:[%s1919_s11 + $0xc8] sm:$0xff] %vm1176_vm4, %v1084_v20  ;;  %v729_v37 = vmul.f32 %v1556_v16, %v728_v31  ;;  %v2027_v38 = vadd.f32 1.0, %v1562_v33  ;;  %v1409_v41 = vmul.f32 -1.442695, %v555_v28  ;;  %vm852_vm9 = vweird.f32 %v1558_v21  ;;  %vm733_vm11 = vmor %vm731_vm3, %vm732_vm8 }
  0xeb   : > { %v1564_v44 = vpop.eup %1563  ;;  %v849_v45 = vmul.f32 %v1558_v21, %v848_v34  ;;  %v855_v42 = vand.u32 2147483647, %v1990_v59  ;;  %1567 = vrcp.f32 %v2022_v35  ;;  %vm736_vm10 = vcmp.eq.f32.partialorder %v735_v18, 8.507059e+37  ;;  %vm853_vm12 = vmor %vm851_vm7, %vm852_vm9 }
  0xec   : > { %v730_v43 = vadd.f32 %v1556_v16, %v729_v37  ;;  %v738_v46 = vor.u32 1.1754944e-38, %v737_v24  ;;  %1569 = vrcp.f32 %v2027_v38  ;;  %v858_v49 = vor.u32 1.1754944e-38, %v857_v27 }
  0xed   : > { %v850_v48 = vadd.f32 %v1558_v21, %v849_v45  ;;  %v1417_v50 = vmul.f32 -1.442695, %v563_v32  ;;  %v1394_v51 = vmul.f32 -1.442695, %v540_v36  ;;  %v975_v54 = vand.u32 2147483647, %v2022_v35 }
  0xee   : > { %v1566_v52 = vpop.eup %1565  ;;  %v734_v53 = vsel %vm733_vm11, %v1556_v16, %v730_v43  ;;  %v2038_v55 = vadd.f32 1.0, %v1564_v44  ;;  %1571 = vpow2.f32 %v1409_v41  ;;  %vm856_vm13 = vcmp.eq.f32.partialorder %v855_v42, 8.507059e+37  ;;  %v477_v41 = vpop.f32.mrf.mxu3 }
  0xef   : > { %v739_v57 = vsel %vm736_vm10, %v738_v46, %v734_v53  ;;  %v854_v56 = vsel %vm853_vm12, %v1558_v21, %v850_v48  ;;  %v502_v58 = vsub.f32 %v437_v47, %v1838_v39  ;;  %v977_v61 = vand.u32 2147483648, %v2022_v35 }
  0xf0   : > { %1179 = vst.msk [vmem:[%s1919_s11 + $0x10] sm:$0xff] %vm1176_vm4, %v739_v57  ;;  %v859_v60 = vsel %vm856_vm13, %v858_v49, %v854_v56  ;;  %v1095_v62 = vand.u32 2147483647, %v2027_v38  ;;  %1573 = vrcp.f32 %v2038_v55  ;;  %vm971_vm14 = vweird.f32 %v2022_v35 }
  0xf1   : > { %v1568_v59 = vpop.eup %1567  ;;  %1187 = vst.msk [vmem:[%s1919_s11 + $0x50] sm:$0xff] %vm1176_vm4, %v859_v60  ;;  %v1097_v63 = vand.u32 2147483648, %v2027_v38  ;;  %v2050_v0 = vadd.f32 1.0, %v1566_v52  ;;  %1575 = vpow2.f32 %v1417_v50  ;;  %vm2053_vm15 = vcmp.eq.f32.partialorder %v975_v54, 8.507059e+37  ;;  %v419_v60 = vpop.f32.mrf.mxu0 }
  0xf2   : > { %v1570_v1 = vpop.eup %1569  ;;  %v967_v2 = vmul.f32 %v1568_v59, %v2022_v35  ;;  %vm1091_vm0 = vweird.f32 %v2027_v38  ;;  %1577 = vpow2.f32 %v1394_v51  ;;  %v750_v5 = vand.u32 2147483647, %v2038_v55 }
  0xf3   : > { %v1087_v4 = vmul.f32 %v1570_v1, %v2027_v38  ;;  %v752_v6 = vand.u32 2147483648, %v2038_v55  ;;  %1579 = vrcp.f32 %v2050_v0  ;;  %v978_v9 = vor.u32 1.1754944e-38, %v977_v61 }
  0xf4   : > { %v1572_v7 = vpop.eup %1571  ;;  %v968_v8 = vsub.f32 1.0, %v967_v2  ;;  %vm2062_vm1 = vcmp.eq.f32.partialorder %v1095_v62, 8.507059e+37  ;;  %v548_v11 = vmul.f32 %v1840_v40, %v502_v58  ;;  %v1098_v13 = vor.u32 1.1754944e-38, %v1097_v63 }
  0xf5   : > { %v1088_v12 = vsub.f32 1.0, %v1087_v4  ;;  %vm746_vm2 = vweird.f32 %v2038_v55  ;;  %v2068_v14 = vadd.f32 1.0, %v1572_v7  ;;  %vm972_vm3 = vweird.f32 %v1568_v59 }
  0xf6   : > { %v1574_v16 = vpop.eup %1573  ;;  %v969_v18 = vmul.f32 %v1568_v59, %v968_v8  ;;  %vm1092_vm5 = vweird.f32 %v1570_v1  ;;  %v870_v19 = vand.u32 2147483647, %v2050_v0  ;;  %vm2074_vm6 = vcmp.eq.f32.partialorder %v750_v5, 8.507059e+37  ;;  %vm973_vm8 = vmor %vm971_vm14, %vm972_vm3 }
  0xf7   : > { %v1576_v17 = vpop.eup %1575  ;;  %v1089_v21 = vmul.f32 %v1570_v1, %v1088_v12  ;;  %v742_v22 = vmul.f32 %v1574_v16, %v2038_v55  ;;  %v753_v24 = vor.u32 1.1754944e-38, %v752_v6  ;;  %1581 = vrcp.f32 %v2068_v14  ;;  %vm1093_vm9 = vmor %vm1091_vm0, %vm1092_vm5  ;;  %v439_v6 = vpop.f32.mrf.mxu1 }
  0xf8   : > { %v1578_v25 = vpop.eup %1577  ;;  %v970_v26 = vadd.f32 %v1568_v59, %v969_v18  ;;  %vm866_vm7 = vweird.f32 %v2050_v0  ;;  %v872_v27 = vand.u32 2147483648, %v2050_v0  ;;  %v1402_v28 = vmul.f32 -1.442695, %v548_v11  ;;  %v459_v11 = vpop.f32.mrf.mxu2 }
  0xf9   : > { %v510_v29 = vsub.f32 %v2070_v15, %v1838_v39  ;;  %v1580_v30 = vpop.eup %1579  ;;  %v1090_v31 = vadd.f32 %v1570_v1, %v1089_v21  ;;  %v743_v32 = vsub.f32 1.0, %v742_v22  ;;  %v2086_v33 = vadd.f32 1.0, %v1576_v17 }
  0xfa   : > { %v2088_v20 = vadd.f32 1.0, %v1578_v25  ;;  %v974_v34 = vsel %vm973_vm8, %v1568_v59, %v970_v26  ;;  %vm747_vm10 = vweird.f32 %v1574_v16  ;;  %v862_v36 = vmul.f32 %v1580_v30, %v2050_v0 }
  0xfb   : > { %vm2094_vm11 = vcmp.eq.f32.partialorder %v870_v19, 8.507059e+37  ;;  %v990_v35 = vand.u32 2147483647, %v2068_v14  ;;  %v979_v44 = vsel %vm2053_vm15, %v978_v9, %v974_v34  ;;  %v1094_v45 = vsel %vm1093_vm9, %v1570_v1, %v1090_v31  ;;  %vm748_vm13 = vmor %vm746_vm2, %vm747_vm10 }
  0xfc   : > { %v744_v42 = vmul.f32 %v1574_v16, %v743_v32  ;;  %v992_v43 = vand.u32 2147483648, %v2068_v14  ;;  %1195 = vst.msk [vmem:[%s1919_s11 + $0x90] sm:$0xff] %vm1176_vm4, %v979_v44  ;;  %v1099_v38 = vsel %vm2062_vm1, %v1098_v13, %v1094_v45  ;;  %v863_v46 = vsub.f32 1.0, %v862_v36 }
  0xfd   : > { %v873_v47 = vor.u32 1.1754944e-38, %v872_v27  ;;  %1583 = vrcp.f32 %v2086_v33  ;;  %v1582_v48 = vpop.eup %1581  ;;  %1203 = vst.msk [vmem:[%s1919_s11 + $0xd0] sm:$0xff] %vm1176_vm4, %v1099_v38  ;;  %vm986_vm12 = vweird.f32 %v2068_v14  ;;  %v518_v50 = vsub.f32 %v477_v41, %v1838_v39 }
  0xfe   : > { %v745_v49 = vadd.f32 %v1574_v16, %v744_v42  ;;  %1585 = vrcp.f32 %v2088_v20  ;;  %v864_v51 = vmul.f32 %v1580_v30, %v863_v46  ;;  %vm867_vm14 = vweird.f32 %v1580_v30 }
  0xff   : > { %v982_v52 = vmul.f32 %v1582_v48, %v2068_v14  ;;  %vm2116_vm15 = vcmp.eq.f32.partialorder %v990_v35, 8.507059e+37  ;;  %v993_v57 = vor.u32 1.1754944e-38, %v992_v43  ;;  %v1110_v56 = vand.u32 2147483647, %v2086_v33  ;;  %vm868_vm1 = vmor %vm866_vm7, %vm867_vm14 }
 0x100   : > { %v749_v54 = vsel %vm748_vm13, %v1574_v16, %v745_v49  ;;  %v1112_v58 = vand.u32 2147483648, %v2086_v33  ;;  %v865_v55 = vadd.f32 %v1580_v30, %v864_v51  ;;  %vm987_vm0 = vweird.f32 %v1582_v48 }
 0x101   : > { %v754_v61 = vsel %vm2074_vm6, %v753_v24, %v749_v54  ;;  %v983_v62 = vsub.f32 1.0, %v982_v52  ;;  %vm761_vm2 = vweird.f32 %v2088_v20  ;;  %1587 = vpow2.f32 %v1402_v28  ;;  %vm988_vm5 = vmor %vm986_vm12, %vm987_vm0 }
 0x102   : > { %1180 = vst.msk [vmem:[%s1919_s11 + $0x18] sm:$0xff] %vm1176_vm4, %v754_v61  ;;  %v556_v59 = vmul.f32 %v1840_v40, %v510_v29  ;;  %v564_v63 = vmul.f32 %v1840_v40, %v518_v50  ;;  %v869_v2 = vsel %vm868_vm1, %v1580_v30, %v865_v55  ;;  %v765_v4 = vand.u32 2147483647, %v2088_v20 }
 0x103   : > { %v1584_v1 = vpop.eup %1583  ;;  %v984_v3 = vmul.f32 %v1582_v48, %v983_v62  ;;  %v495_v5 = vsub.f32 %v419_v60, %v1838_v39  ;;  %v874_v0 = vsel %vm2094_vm11, %v873_v47, %v869_v2  ;;  %v767_v9 = vand.u32 2147483648, %v2088_v20 }
 0x104   : > { %v1586_v7 = vpop.eup %1585  ;;  %v1102_v8 = vmul.f32 %v1584_v1, %v2086_v33  ;;  %v1410_v10 = vmul.f32 -1.442695, %v556_v59  ;;  %1188 = vst.msk [vmem:[%s1919_s11 + $0x58] sm:$0xff] %vm1176_vm4, %v874_v0  ;;  %vm1107_vm3 = vweird.f32 %v1584_v1  ;;  %v1418_v15 = vmul.f32 -1.442695, %v564_v63  ;;  %v442_v0 = vpop.f32.mrf.mxu1 }
 0x105   : > { %v985_v12 = vadd.f32 %v1582_v48, %v984_v3  ;;  %v757_v13 = vmul.f32 %v1586_v7, %v2088_v20  ;;  %v541_v18 = vmul.f32 %v1840_v40, %v495_v5  ;;  %v503_v19 = vsub.f32 %v439_v6, %v1838_v39  ;;  %v422_v20 = vpop.f32.mrf.mxu0 }
 0x106   : > { %v1103_v16 = vsub.f32 1.0, %v1102_v8  ;;  %1589 = vpow2.f32 %v1410_v10  ;;  %v511_v22 = vsub.f32 %v459_v11, %v1838_v39  ;;  %vm762_vm6 = vweird.f32 %v1586_v7 }
 0x107   : > { %v989_v17 = vsel %vm988_vm5, %v1582_v48, %v985_v12  ;;  %v758_v21 = vsub.f32 1.0, %v757_v13  ;;  %1591 = vpow2.f32 %v1418_v15  ;;  %v1588_v23 = vpop.eup %1587  ;;  %v1395_v26 = vmul.f32 -1.442695, %v541_v18  ;;  %vm763_vm10 = vmor %vm761_vm2, %vm762_vm6 }
 0x108   : > { %v994_v24 = vsel %vm2116_vm15, %v993_v57, %v989_v17  ;;  %v1104_v25 = vmul.f32 %v1584_v1, %v1103_v16  ;;  %v549_v14 = vmul.f32 %v1840_v40, %v503_v19  ;;  %v2151_v28 = vadd.f32 1.0, %v1588_v23 }
 0x109   : > { %1196 = vst.msk [vmem:[%s1919_s11 + $0x98] sm:$0xff] %vm1176_vm4, %v994_v24  ;;  %v759_v27 = vmul.f32 %v1586_v7, %v758_v21  ;;  %v557_v29 = vmul.f32 %v1840_v40, %v511_v22  ;;  %vm1106_vm7 = vweird.f32 %v2086_v33  ;;  %1593 = vpow2.f32 %v1395_v26  ;;  %v479_v33 = vpop.f32.mrf.mxu3 }
 0x10a   : > { %v1105_v30 = vadd.f32 %v1584_v1, %v1104_v25  ;;  %v1403_v31 = vmul.f32 -1.442695, %v549_v14  ;;  %vm1108_vm8 = vmor %vm1106_vm7, %vm1107_vm3  ;;  %vm1111_vm9 = vcmp.eq.f32.partialorder %v1110_v56, 8.507059e+37  ;;  %v1113_v32 = vor.u32 1.1754944e-38, %v1112_v58 }
 0x10b   : > { %v760_v34 = vadd.f32 %v1586_v7, %v759_v27  ;;  %1595 = vrcp.f32 %v2151_v28  ;;  %v768_v35 = vor.u32 1.1754944e-38, %v767_v9  ;;  %v1411_v41 = vmul.f32 -1.442695, %v557_v29 }
 0x10c   : > { %v1590_v36 = vpop.eup %1589  ;;  %v1109_v37 = vsel %vm1108_vm8, %v1584_v1, %v1105_v30  ;;  %1597 = vpow2.f32 %v1403_v31  ;;  %vm766_vm11 = vcmp.eq.f32.partialorder %v765_v4, 8.507059e+37  ;;  %v885_v46 = vand.u32 2147483647, %v2151_v28 }
 0x10d   : > { %v1592_v44 = vpop.eup %1591  ;;  %v1114_v45 = vsel %vm1111_vm9, %v1113_v32, %v1109_v37  ;;  %v764_v42 = vsel %vm763_vm10, %v1586_v7, %v760_v34  ;;  %v2159_v43 = vadd.f32 1.0, %v1590_v36  ;;  %1599 = vpow2.f32 %v1411_v41 }
 0x10e   : > { %1204 = vst.msk [vmem:[%s1919_s11 + $0xd8] sm:$0xff] %vm1176_vm4, %v1114_v45  ;;  %v769_v38 = vsel %vm766_vm11, %v768_v35, %v764_v42  ;;  %v2164_v47 = vadd.f32 1.0, %v1592_v44  ;;  %v519_v48 = vsub.f32 %v479_v33, %v1838_v39  ;;  %v887_v50 = vand.u32 2147483648, %v2151_v28  ;;  %v462_v42 = vpop.f32.mrf.mxu2 }
 0x10f   : > { %1181 = vst.msk [vmem:[%s1919_s11 + $0x20] sm:$0xff] %vm1176_vm4, %v769_v38  ;;  %1601 = vrcp.f32 %v2159_v43  ;;  %v1594_v49 = vpop.eup %1593  ;;  %v1007_v52 = vand.u32 2147483648, %v2159_v43  ;;  %v496_v57 = vsub.f32 %v422_v20, %v1838_v39  ;;  %vm881_vm12 = vweird.f32 %v2151_v28 }
 0x110   : > { %1603 = vrcp.f32 %v2164_v47  ;;  %v1127_v53 = vand.u32 2147483648, %v2164_v47  ;;  %v2174_v54 = vadd.f32 1.0, %v1594_v49  ;;  %vm2179_vm13 = vcmp.eq.f32.partialorder %v885_v46, 8.507059e+37 }
 0x111   : > { %v1596_v51 = vpop.eup %1595  ;;  %v1005_v61 = vand.u32 2147483647, %v2159_v43  ;;  %v1125_v55 = vand.u32 2147483647, %v2164_v47  ;;  %v565_v59 = vmul.f32 %v1840_v40, %v519_v48  ;;  %v888_v2 = vor.u32 1.1754944e-38, %v887_v50 }
 0x112   : > { %v1598_v56 = vpop.eup %1597  ;;  %v877_v58 = vmul.f32 %v1596_v51, %v2151_v28  ;;  %1605 = vrcp.f32 %v2174_v54  ;;  %v782_v62 = vand.u32 2147483648, %v2174_v54  ;;  %vm1001_vm14 = vweird.f32 %v2159_v43 }
 0x113   : > { %v1600_v63 = vpop.eup %1599  ;;  %v2189_v3 = vadd.f32 1.0, %v1598_v56  ;;  %vm882_vm15 = vweird.f32 %v1596_v51  ;;  %v1008_v5 = vor.u32 1.1754944e-38, %v1007_v52  ;;  %vm1121_vm0 = vweird.f32 %v2164_v47 }
 0x114   : > { %v878_v1 = vsub.f32 1.0, %v877_v58  ;;  %v1128_v6 = vor.u32 1.1754944e-38, %v1127_v53  ;;  %v2192_v7 = vadd.f32 1.0, %v1600_v63  ;;  %vm2195_vm1 = vcmp.eq.f32.partialorder %v1005_v61, 8.507059e+37  ;;  %vm883_vm5 = vmor %vm881_vm12, %vm882_vm15  ;;  %v482_v53 = vpop.f32.mrf.mxu3 }
 0x115   : > { %v1602_v4 = vpop.eup %1601  ;;  %v780_v12 = vand.u32 2147483647, %v2174_v54  ;;  %1607 = vrcp.f32 %v2189_v3  ;;  %vm2202_vm2 = vcmp.eq.f32.partialorder %v1125_v55, 8.507059e+37  ;;  %v2206_v16 = vor.u32 1.1754944e-38, %v782_v62 }
 0x116   : > { %v1604_v8 = vpop.eup %1603  ;;  %v879_v9 = vmul.f32 %v1596_v51, %v878_v1  ;;  %v997_v10 = vmul.f32 %v1602_v4, %v2159_v43  ;;  %v1419_v18 = vmul.f32 -1.442695, %v565_v59  ;;  %v542_v19 = vmul.f32 %v1840_v40, %v496_v57  ;;  %v424_v57 = vpop.f32.mrf.mxu0 }
 0x117   : > { %v1117_v13 = vmul.f32 %v1604_v8, %v2164_v47  ;;  %vm776_vm3 = vweird.f32 %v2174_v54  ;;  %1609 = vrcp.f32 %v2192_v7  ;;  %v504_v22 = vsub.f32 %v442_v0, %v1838_v39 }
 0x118   : > { %v880_v17 = vadd.f32 %v1596_v51, %v879_v9  ;;  %v998_v21 = vsub.f32 1.0, %v997_v10  ;;  %v1606_v23 = vpop.eup %1605  ;;  %vm1002_vm6 = vweird.f32 %v1602_v4  ;;  %v900_v25 = vand.u32 2147483647, %v2189_v3 }
 0x119   : > { %v1118_v24 = vsub.f32 1.0, %v1117_v13  ;;  %v902_v26 = vand.u32 2147483648, %v2189_v3  ;;  %vm1122_vm7 = vweird.f32 %v1604_v8  ;;  %v772_v29 = vmul.f32 %v1606_v23, %v2174_v54  ;;  %vm1003_vm11 = vmor %vm1001_vm14, %vm1002_vm6 }
 0x11a   : > { %v884_v14 = vsel %vm883_vm5, %v1596_v51, %v880_v17  ;;  %v999_v27 = vmul.f32 %v1602_v4, %v998_v21  ;;  %vm2218_vm8 = vcmp.eq.f32.partialorder %v780_v12, 8.507059e+37  ;;  %vm896_vm9 = vweird.f32 %v2189_v3  ;;  %vm1123_vm14 = vmor %vm1121_vm0, %vm1122_vm7 }
 0x11b   : > { %v889_v28 = vsel %vm2179_vm13, %v888_v2, %v884_v14  ;;  %v1119_v31 = vmul.f32 %v1604_v8, %v1118_v24  ;;  %v1020_v32 = vand.u32 2147483647, %v2192_v7  ;;  %v1608_v34 = vpop.eup %1607  ;;  %v773_v37 = vsub.f32 1.0, %v772_v29 }
 0x11c   : > { %1189 = vst.msk [vmem:[%s1919_s11 + $0x60] sm:$0xff] %vm1176_vm4, %v889_v28  ;;  %v1000_v36 = vadd.f32 %v1602_v4, %v999_v27  ;;  %vm777_vm10 = vweird.f32 %v1606_v23  ;;  %1611 = vpow2.f32 %v1419_v18  ;;  %v892_v41 = vmul.f32 %v1608_v34, %v2189_v3  ;;  %v484_v28 = vpop.f32.mrf.mxu3 }
 0x11d   : > { %v1120_v35 = vadd.f32 %v1604_v8, %v1119_v31  ;;  %vm2232_vm12 = vcmp.eq.f32.partialorder %v900_v25, 8.507059e+37  ;;  %v903_v44 = vor.u32 1.1754944e-38, %v902_v26  ;;  %vm1016_vm13 = vweird.f32 %v2192_v7  ;;  %v1610_v38 = vpop.eup %1609  ;;  %vm778_vm0 = vmor %vm776_vm3, %vm777_vm10 }
 0x11e   : > { %v1396_v45 = vmul.f32 -1.442695, %v542_v19  ;;  %v1004_v46 = vsel %vm1003_vm11, %v1602_v4, %v1000_v36  ;;  %v774_v43 = vmul.f32 %v1606_v23, %v773_v37  ;;  %v1022_v20 = vand.u32 2147483648, %v2192_v7 }
 0x11f   : > { %v550_v48 = vmul.f32 %v1840_v40, %v504_v22  ;;  %v1009_v49 = vsel %vm2195_vm1, %v1008_v5, %v1004_v46  ;;  %v1124_v50 = vsel %vm1123_vm14, %v1604_v8, %v1120_v35  ;;  %v893_v51 = vsub.f32 1.0, %v892_v41  ;;  %v464_v22 = vpop.f32.mrf.mxu2 }
 0x120   : > { %v1012_v52 = vmul.f32 %v1610_v38, %v2192_v7  ;;  %1197 = vst.msk [vmem:[%s1919_s11 + $0xa0] sm:$0xff] %vm1176_vm4, %v1009_v49  ;;  %v1129_v47 = vsel %vm2202_vm2, %v1128_v6, %v1124_v50  ;;  %v775_v56 = vadd.f32 %v1606_v23, %v774_v43  ;;  %vm897_vm15 = vweird.f32 %v1608_v34  ;;  %v444_v6 = vpop.f32.mrf.mxu1 }
 0x121   : > { %1613 = vpow2.f32 %v1396_v45  ;;  %1205 = vst.msk [vmem:[%s1919_s11 + $0xe0] sm:$0xff] %vm1176_vm4, %v1129_v47  ;;  %v894_v58 = vmul.f32 %v1608_v34, %v893_v51  ;;  %v1404_v61 = vmul.f32 -1.442695, %v550_v48  ;;  %v512_v55 = vsub.f32 %v462_v42, %v1838_v39  ;;  %vm898_vm2 = vmor %vm896_vm9, %vm897_vm15 }
 0x122   : > { %v1013_v60 = vsub.f32 1.0, %v1012_v52  ;;  %v1612_v62 = vpop.eup %1611  ;;  %v779_v59 = vsel %vm778_vm0, %v1606_v23, %v775_v56  ;;  %vm1017_vm1 = vweird.f32 %v1610_v38  ;;  %v520_v63 = vsub.f32 %v482_v53, %v1838_v39 }
 0x123   : > { %v497_v1 = vsub.f32 %v424_v57, %v1838_v39  ;;  %v784_v2 = vsel %vm2218_vm8, %v2206_v16, %v779_v59  ;;  %v895_v4 = vadd.f32 %v1608_v34, %v894_v58  ;;  %v2260_v5 = vadd.f32 1.0, %v1612_v62  ;;  %vm1018_vm5 = vmor %vm1016_vm13, %vm1017_vm1 }
 0x124   : > { %v1014_v54 = vmul.f32 %v1610_v38, %v1013_v60  ;;  %1182 = vst.msk [vmem:[%s1919_s11 + $0x28] sm:$0xff] %vm1176_vm4, %v784_v2  ;;  %1615 = vpow2.f32 %v1404_v61  ;;  %v558_v0 = vmul.f32 %v1840_v40, %v512_v55  ;;  %v566_v8 = vmul.f32 %v1840_v40, %v520_v63 }
 0x125   : > { %v543_v9 = vmul.f32 %v1840_v40, %v497_v1  ;;  %v899_v10 = vsel %vm898_vm2, %v1608_v34, %v895_v4  ;;  %vm1021_vm3 = vcmp.eq.f32.partialorder %v1020_v32, 8.507059e+37  ;;  %1617 = vrcp.f32 %v2260_v5 }
 0x126   : > { %v1015_v11 = vadd.f32 %v1610_v38, %v1014_v54  ;;  %v904_v13 = vsel %vm2232_vm12, %v903_v44, %v899_v10  ;;  %v1023_v3 = vor.u32 1.1754944e-38, %v1022_v20  ;;  %v1412_v15 = vmul.f32 -1.442695, %v558_v0 }
 0x127   : > { %v1614_v12 = vpop.eup %1613  ;;  %v505_v16 = vsub.f32 %v444_v6, %v1838_v39  ;;  %1190 = vst.msk [vmem:[%s1919_s11 + $0x68] sm:$0xff] %vm1176_vm4, %v904_v13  ;;  %v1420_v17 = vmul.f32 -1.442695, %v566_v8  ;;  %v1397_v21 = vmul.f32 -1.442695, %v543_v9  ;;  %v513_v25 = vsub.f32 %v464_v22, %v1838_v39 }
 0x128   : > { %v1019_v18 = vsel %vm1018_vm5, %v1610_v38, %v1015_v11  ;;  %v2279_v19 = vadd.f32 1.0, %v1614_v12  ;;  %1619 = vpow2.f32 %v1412_v15  ;;  %v1140_v34 = vand.u32 2147483647, %v2260_v5 }
 0x129   : > { %v1024_v23 = vsel %vm1021_vm3, %v1023_v3, %v1019_v18  ;;  %v551_v24 = vmul.f32 %v1840_v40, %v505_v16  ;;  %v559_v30 = vmul.f32 %v1840_v40, %v513_v25  ;;  %v1142_v35 = vand.u32 2147483648, %v2260_v5 }
 0x12a   : > { %1198 = vst.msk [vmem:[%s1919_s11 + $0xa8] sm:$0xff] %vm1176_vm4, %v1024_v23  ;;  %1621 = vrcp.f32 %v2279_v19  ;;  %v1616_v7 = vpop.eup %1615  ;;  %v521_v33 = vsub.f32 %v484_v28, %v1838_v39  ;;  %vm1136_vm7 = vweird.f32 %v2260_v5  ;;  %v795_v46 = vand.u32 2147483647, %v2279_v19 }
 0x12b   : > { %1623 = vpow2.f32 %v1420_v17  ;;  %v1618_v26 = vpop.eup %1617  ;;  %v2286_v14 = vadd.f32 1.0, %v1616_v7  ;;  %v1405_v29 = vmul.f32 -1.442695, %v551_v24  ;;  %v1413_v36 = vmul.f32 -1.442695, %v559_v30 }
 0x12c   : > { %1625 = vpow2.f32 %v1397_v21  ;;  %v1132_v27 = vmul.f32 %v1618_v26, %v2260_v5  ;;  %vm1137_vm6 = vweird.f32 %v1618_v26  ;;  %v797_v43 = vand.u32 2147483648, %v2279_v19 }
 0x12d   : > { %1627 = vrcp.f32 %v2286_v14  ;;  %vm1138_vm8 = vmor %vm1136_vm7, %vm1137_vm6  ;;  %vm1141_vm9 = vcmp.eq.f32.partialorder %v1140_v34, 8.507059e+37  ;;  %v1143_v51 = vor.u32 1.1754944e-38, %v1142_v35  ;;  %vm791_vm10 = vweird.f32 %v2279_v19 }
 0x12e   : > { %v1620_v31 = vpop.eup %1619  ;;  %v1133_v32 = vsub.f32 1.0, %v1132_v27  ;;  %1629 = vpow2.f32 %v1405_v29  ;;  %v567_v52 = vmul.f32 %v1840_v40, %v521_v33  ;;  %vm2308_vm12 = vcmp.eq.f32.partialorder %v795_v46, 8.507059e+37 }
 0x12f   : > { %v2293_v41 = vadd.f32 1.0, %v1620_v31  ;;  %1631 = vpow2.f32 %v1413_v36  ;;  %v798_v62 = vor.u32 1.1754944e-38, %v797_v43  ;;  %vm911_vm14 = vweird.f32 %v2286_v14 }
 0x130   : > { %v1622_v37 = vpop.eup %1621  ;;  %v1134_v45 = vmul.f32 %v1618_v26, %v1133_v32  ;;  %v915_v63 = vand.u32 2147483647, %v2286_v14  ;;  %v917_v1 = vand.u32 2147483648, %v2286_v14  ;;  %v1421_v2 = vmul.f32 -1.442695, %v567_v52 }
 0x131   : > { %v1624_v44 = vpop.eup %1623  ;;  %v787_v42 = vmul.f32 %v1622_v37, %v2279_v19  ;;  %1633 = vrcp.f32 %v2293_v41  ;;  %vm792_vm11 = vweird.f32 %v1622_v37  ;;  %v1035_v0 = vand.u32 2147483647, %v2293_v41 }
 0x132   : > { %v1626_v38 = vpop.eup %1625  ;;  %v1135_v20 = vadd.f32 %v1618_v26, %v1134_v45  ;;  %v2301_v49 = vadd.f32 1.0, %v1624_v44  ;;  %vm793_vm13 = vmor %vm791_vm10, %vm792_vm11  ;;  %v1037_v10 = vand.u32 2147483648, %v2293_v41  ;;  %vm916_vm1 = vcmp.eq.f32.partialorder %v915_v63, 8.507059e+37 }
 0x133   : > { %v788_v48 = vsub.f32 1.0, %v787_v42  ;;  %v2303_v39 = vadd.f32 1.0, %v1626_v38  ;;  %v1628_v50 = vpop.eup %1627  ;;  %v918_v13 = vor.u32 1.1754944e-38, %v917_v1  ;;  %vm1031_vm3 = vweird.f32 %v2293_v41 }
 0x134   : > { %v1139_v53 = vsel %vm1138_vm8, %v1618_v26, %v1135_v20  ;;  %v907_v47 = vmul.f32 %v1628_v50, %v2286_v14  ;;  %v1630_v56 = vpop.eup %1629  ;;  %1635 = vrcp.f32 %v2301_v49  ;;  %vm912_vm15 = vweird.f32 %v1628_v50 }
 0x135   : > { %v789_v57 = vmul.f32 %v1622_v37, %v788_v48  ;;  %v1144_v58 = vsel %vm1141_vm9, %v1143_v51, %v1139_v53  ;;  %v1632_v61 = vpop.eup %1631  ;;  %1637 = vrcp.f32 %v2303_v39  ;;  %v2328_v11 = vadd.f32 1.0, %v1630_v56  ;;  %vm913_vm0 = vmor %vm911_vm14, %vm912_vm15 }
 0x136   : > { %1206 = vst.msk [vmem:[%s1919_s11 + $0xe8] sm:$0xff] %vm1176_vm4, %v1144_v58  ;;  %v908_v40 = vsub.f32 1.0, %v907_v47  ;;  %v2332_v3 = vadd.f32 1.0, %v1632_v61  ;;  %1639 = vpow2.f32 %v1421_v2  ;;  %vm1036_vm5 = vcmp.eq.f32.partialorder %v1035_v0, 8.507059e+37 }
 0x137   : > { %v790_v55 = vadd.f32 %v1622_v37, %v789_v57  ;;  %v1634_v59 = vpop.eup %1633  ;;  %1641 = vrcp.f32 %v2328_v11  ;;  %v1038_v23 = vor.u32 1.1754944e-38, %v1037_v10  ;;  %v1155_v24 = vand.u32 2147483647, %v2301_v49 }
 0x138   : > { %v909_v54 = vmul.f32 %v1628_v50, %v908_v40  ;;  %v1027_v5 = vmul.f32 %v1634_v59, %v2293_v41  ;;  %vm1032_vm2 = vweird.f32 %v1634_v59  ;;  %v1157_v25 = vand.u32 2147483648, %v2301_v49 }
 0x139   : > { %v794_v4 = vsel %vm793_vm13, %v1622_v37, %v790_v55  ;;  %vm1033_vm6 = vmor %vm1031_vm3, %vm1032_vm2  ;;  %1643 = vrcp.f32 %v2332_v3  ;;  %v812_v29 = vand.u32 2147483648, %v2303_v39  ;;  %v810_v32 = vand.u32 2147483647, %v2303_v39 }
 0x13a   : > { %v799_v6 = vsel %vm2308_vm12, %v798_v62, %v794_v4  ;;  %v910_v8 = vadd.f32 %v1628_v50, %v909_v54  ;;  %v1028_v9 = vsub.f32 1.0, %v1027_v5  ;;  %v1636_v12 = vpop.eup %1635  ;;  %vm1151_vm9 = vweird.f32 %v2301_v49 }
 0x13b   : > { %1183 = vst.msk [vmem:[%s1919_s11 + $0x30] sm:$0xff] %vm1176_vm4, %v799_v6  ;;  %v1638_v15 = vpop.eup %1637  ;;  %v1147_v19 = vmul.f32 %v1636_v12, %v2301_v49  ;;  %vm1152_vm7 = vweird.f32 %v1636_v12  ;;  %vm1156_vm11 = vcmp.eq.f32.partialorder %v1155_v24, 8.507059e+37  ;;  %v1158_v35 = vor.u32 1.1754944e-38, %v1157_v25 }
 0x13c   : > { %v914_v16 = vsel %vm913_vm0, %v1628_v50, %v910_v8  ;;  %v1029_v18 = vmul.f32 %v1634_v59, %v1028_v9  ;;  %v802_v21 = vmul.f32 %v1638_v15, %v2303_v39  ;;  %v1640_v30 = vpop.eup %1639  ;;  %vm807_vm8 = vweird.f32 %v1638_v15  ;;  %vm1153_vm10 = vmor %vm1151_vm9, %vm1152_vm7 }
 0x13d   : > { %v919_v17 = vsel %vm916_vm1, %v918_v13, %v914_v16  ;;  %v1148_v7 = vsub.f32 1.0, %v1147_v19  ;;  %v2348_v36 = vadd.f32 1.0, %v1640_v30  ;;  %v1642_v37 = vpop.eup %1641  ;;  %vm806_vm12 = vweird.f32 %v2303_v39 }
 0x13e   : > { %1191 = vst.msk [vmem:[%s1919_s11 + $0x70] sm:$0xff] %vm1176_vm4, %v919_v17  ;;  %v1030_v22 = vadd.f32 %v1634_v59, %v1029_v18  ;;  %v803_v26 = vsub.f32 1.0, %v802_v21  ;;  %vm808_vm13 = vmor %vm806_vm12, %vm807_vm8  ;;  %v813_v44 = vor.u32 1.1754944e-38, %v812_v29  ;;  %v922_v45 = vmul.f32 %v1642_v37, %v2328_v11 }
 0x13f   : > { %v1149_v27 = vmul.f32 %v1636_v12, %v1148_v7  ;;  %1645 = vrcp.f32 %v2348_v36  ;;  %v1644_v42 = vpop.eup %1643  ;;  %vm811_vm14 = vcmp.eq.f32.partialorder %v810_v32, 8.507059e+37  ;;  %v932_v49 = vand.u32 2147483648, %v2328_v11 }
 0x140   : > { %v1034_v14 = vsel %vm1033_vm6, %v1634_v59, %v1030_v22  ;;  %v804_v31 = vmul.f32 %v1638_v15, %v803_v26  ;;  %v923_v20 = vsub.f32 1.0, %v922_v45  ;;  %v1042_v48 = vmul.f32 %v1644_v42, %v2332_v3 }
 0x141   : > { %v1039_v28 = vsel %vm1036_vm5, %v1038_v23, %v1034_v14  ;;  %v1150_v34 = vadd.f32 %v1636_v12, %v1149_v27  ;;  %vm927_vm15 = vweird.f32 %v1642_v37  ;;  %v930_v50 = vand.u32 2147483647, %v2328_v11 }
 0x142   : > { %1199 = vst.msk [vmem:[%s1919_s11 + $0xb0] sm:$0xff] %vm1176_vm4, %v1039_v28  ;;  %v805_v41 = vadd.f32 %v1638_v15, %v804_v31  ;;  %v924_v39 = vmul.f32 %v1642_v37, %v923_v20  ;;  %v1043_v51 = vsub.f32 1.0, %v1042_v48  ;;  %vm926_vm0 = vweird.f32 %v2328_v11 }
 0x143   : > { %v1154_v33 = vsel %vm1153_vm10, %v1636_v12, %v1150_v34  ;;  %v1052_v52 = vand.u32 2147483648, %v2332_v3  ;;  %vm1047_vm1 = vweird.f32 %v1644_v42  ;;  %v1050_v56 = vand.u32 2147483647, %v2332_v3  ;;  %vm928_vm2 = vmor %vm926_vm0, %vm927_vm15 }
 0x144   : > { %v1159_v38 = vsel %vm1156_vm11, %v1158_v35, %v1154_v33  ;;  %v809_v46 = vsel %vm808_vm13, %v1638_v15, %v805_v41  ;;  %v925_v57 = vadd.f32 %v1642_v37, %v924_v39  ;;  %v1044_v47 = vmul.f32 %v1644_v42, %v1043_v51 }
 0x145   : > { %1207 = vst.msk [vmem:[%s1919_s11 + $0xf0] sm:$0xff] %vm1176_vm4, %v1159_v38  ;;  %v814_v43 = vsel %vm811_vm14, %v813_v44, %v809_v46  ;;  %v1646_v53 = vpop.eup %1645  ;;  %v933_v58 = vor.u32 1.1754944e-38, %v932_v49  ;;  %vm931_vm3 = vcmp.eq.f32.partialorder %v930_v50, 8.507059e+37  ;;  %vm1046_vm5 = vweird.f32 %v2332_v3 }
 0x146   : > { %1184 = vst.msk [vmem:[%s1919_s11 + $0x38] sm:$0xff] %vm1176_vm4, %v814_v43  ;;  %v1162_v60 = vmul.f32 %v1646_v53, %v2348_v36  ;;  %v929_v61 = vsel %vm928_vm2, %v1642_v37, %v925_v57  ;;  %v1045_v55 = vadd.f32 %v1644_v42, %v1044_v47  ;;  %vm1048_vm6 = vmor %vm1046_vm5, %vm1047_vm1  ;;  %v1053_v40 = vor.u32 1.1754944e-38, %v1052_v52 }
 0x147   : > { %v934_v62 = vsel %vm931_vm3, %v933_v58, %v929_v61  ;;  %vm1051_vm7 = vcmp.eq.f32.partialorder %v1050_v56, 8.507059e+37  ;;  %v1172_v1 = vand.u32 2147483648, %v2348_v36  ;;  %vm1167_vm8 = vweird.f32 %v1646_v53 }
 0x148   : > { %v1163_v59 = vsub.f32 1.0, %v1162_v60  ;;  %1192 = vst.msk [vmem:[%s1919_s11 + $0x78] sm:$0xff] %vm1176_vm4, %v934_v62  ;;  %v1049_v63 = vsel %vm1048_vm6, %v1644_v42, %v1045_v55  ;;  %v1170_v54 = vand.u32 2147483647, %v2348_v36  ;;  %vm1166_vm9 = vweird.f32 %v2348_v36 }
 0x149   : > { %v1054_v2 = vsel %vm1051_vm7, %v1053_v40, %v1049_v63  ;;  %vm1168_vm10 = vmor %vm1166_vm9, %vm1167_vm8  ;;  %v1173_v6 = vor.u32 1.1754944e-38, %v1172_v1 }
 0x14a   : > { %v1164_v4 = vmul.f32 %v1646_v53, %v1163_v59  ;;  %1200 = vst.msk [vmem:[%s1919_s11 + $0xb8] sm:$0xff] %vm1176_vm4, %v1054_v2  ;;  %vm1171_vm11 = vcmp.eq.f32.partialorder %v1170_v54, 8.507059e+37 }
 0x14c   : > { %v1165_v5 = vadd.f32 %v1646_v53, %v1164_v4 }
 0x14e   : > { %v1169_v0 = vsel %vm1168_vm10, %v1646_v53, %v1165_v5 }
 0x14f   : > { %v1174_v8 = vsel %vm1171_vm11, %v1173_v6, %v1169_v0 }
 0x150   : > { %1208 = vst.msk [vmem:[%s1919_s11 + $0xf8] sm:$0xff] %vm1176_vm4, %v1174_v8 }
 0x151   : > { %1674 = shalt.err (!%p1671_p3)
}
 0x152   : > { %s1711_s8 = smov 128   ;;  %s1712_s9 = smov 8  }
 0x153   : > { %1476 = dma.vmem_to_hbm [thread:$0]  (%p1776_p5), %s1223_s20, 4096, %s1225_s22, %s1210_s23, %s1711_s8, %s1711_s8, %s1712_s9  }
 0x154 PF: > { %p1482_p4 = scmp.ge.s32.totalorder %s1709_s18, 2  ;;  %s1239_s10 = sand.u32 1, %s1697_s15  }
 0x155   : > { %s1240_s11 = scalar_lea.sflag [#allocation3], %s1239_s10 }
 0x156   : > { %p1479_p7 = pnand %p1482_p4, %p1780_p6 }
 0x158   : > { %p1480_p8 = pneg %p1479_p7 }
 0x15a   : > { %1692 = dma.done.wait (%p1480_p8), %s1240_s11, 4096  }
 0x15b   : > { %1694 = vsyncadd (%p1480_p8), %s1240_s11, 4294963200  ;;  %p14_p9 = scmp.ge.s32.totalorder %s1763_s21, 4   ;;  %s2451_s15 = smov %s1701_s16 }
 0x15c   : > { %s2452_s16 = smov %s1705_s17  ;;  %s2453_s17 = smov %s1774_s24 }
 0x15d   : > { %s2454_s18 = smov %s1763_s21  ;;  %16 = sbr.rel (!%p14_p9) target bundleno = 3 (0x3), region = 71 }
 0x162   :  { %1246 = vsyncpa [#allocation3], 1 }
 0x163   :  { %1248 = vsyncpa [#allocation3 + $0x1], 1 }

// kernel: block_forward.8
= control target key start
LH: loop header
LB: loop body
LE: loop exit
PB: predicated region body
PF: predicated region fallthrough
CT: control target
= control target key end

     0   :  { %s4711_s15 = smov 0   ;;  %s4713_s16 = smov 0   ;;  %s5675_s0 = inlined_call_operand.vmem [shape: bf16[512,128], index: 0, kind: input, shape index: {}]   ;;  %s5676_s1 = inlined_call_operand.vmem [shape: bf16[9,128,128], index: 1, kind: input, shape index: {}]   ;;  %s5677_s2 = inlined_call_operand.vmem [shape: bf16[512,128], index: 2, kind: output, shape index: {0}]   ;;  %s5678_s3 = inlined_call_operand.vmem [shape: f32[1,128], index: 3, kind: output, shape index: {1}]   ;;  %s5679_s4 = inlined_call_operand.vmem [shape: f32[1,128], index: 4, kind: output, shape index: {2}]  }
   0x1   :  { %s4715_s17 = smov 0  }
   0x2 LB: > { %s4722_s18 = sadd.s32 4294967295, %s4650_s17   ;;  %s4724_s19 = sadd.s32 1, %s4650_s17   ;;  %s4650_s17 = sphi %s4715_s17, %s5711_s17   ;;  %s4646_s16 = sphi %s4713_s16, %s5710_s16   ;;  %s4642_s15 = sphi %s4711_s15, %s5709_s15  }
   0x3   : > { %s66_s20 = ssub.s32 %s4650_s17, %s4724_s19  ;;  %s69_s21 = sadd.s32 1, %s4646_s16 }
   0x4   : > { %p67_p0 = scmp.eq.s32.totalorder %s66_s20, 0  ;;  %p79_p1 = scmp.ne.s32.totalorder %s4646_s16, %s4642_s15 }
   0x5   : > { %p80_p2 = scmp.eq.s32.totalorder %s4722_s18, 1  ;;  %p3528_p3 = scmp.ge.s32.totalorder %s4650_s17, 1 }
   0x6   : > { %s4731_s22 = scalar_select %p67_p0, %s4646_s16, %s69_s21  }
   0x7   : > { %p4733_p4 = por %p80_p2, %p79_p1  ;;  %p158_p5 = scmp.lt.s32.totalorder %s4650_s17, 3 }
   0x9   : > { %p159_p6 = pnand %p3528_p3, %p158_p5 }
   0xb   : > { %162 = sbr.rel (%p159_p6) target bundleno = 798 (0x31e), region = 28 }
  0x10   : > { %s176_s24 = sand.u32 1, %s4642_s15   ;;  %s3529_s25 = sshll.u32 %s4722_s18, 5 }
  0x11   : > { %s4498_s26 = smul.u32 112, %s176_s24  ;;  %p184_p7 = scmp.lt.s32.totalorder %s3529_s25, 63 }
  0x12   : > { %p3531_p8 = scmp.ne.s32.totalorder %s4722_s18, 0 }
  0x13   : > { %s5713_s25 = smov (!%p184_p7, %s3529_s25), 63  ;;  %s4743_s5 = scalar_lea.vmem [#allocation3], %s4498_s26  }
  0x14   : > { %s3530_s27 = sshll.u32 %s5713_s25, 2  ;;  %198 = sbr.rel (%p3531_p8) target bundleno = 28 (0x1c), region = 32 }
  0x15   : > { %s4741_s30 = scalar_lea.vmem %s5675_s0, %s3530_s27 }
  0x19   : > { %v4684_v0 = vmov 0.0  }
  0x1a   : > { %199 = vst [vmem:[%s5678_s3] sm:$0x1] %v4684_v0 }
  0x1b   : > { %200 = vst [vmem:[%s5679_s4] sm:$0x1] %v4684_v0 }
  0x1c PF: > { %v4256_v1 = vld [vmem:[%s5676_s1 + $0x78] sm:$0xff]  ;;  %v4255_v2 = vld [vmem:[%s5676_s1 + $0x70] sm:$0xff]  ;;  %v201_v3 = vld [vmem:[%s4741_s30] sm:$0xff]   ;;  %vm401_vm0 = vsmask.f32 7424  ;;  %vm821_vm1 = vcmask 1046528  }
  0x1d   : > { %580 = vmatpush.bf16.msra.mxu0 %v4256_v1  ;;  %4474 = vmatpush.bf16.msra.mxu1 %v4256_v1  ;;  %v203_v4 = vld [vmem:[%s4741_s30 + $0x8] sm:$0xff]   ;;  %233 = vst [vmem:[#allocation2] sm:$0xff] %v201_v3   ;;  %v209_v5 = vld [vmem:[%s4741_s30 + $0x20] sm:$0xff]   ;;  %v221_v7 = vld [vmem:[%s4741_s30 + $0x50] sm:$0xff]   ;;  %s3194_s9 = smul.u32 (%p4733_p4), 28, %s4722_s18 }
  0x1e   : > { %4476 = vmatpush.bf16.msra.mxu3 %v4256_v1  ;;  %4475 = vmatpush.bf16.msra.mxu2 %v4256_v1  ;;  %v211_v6 = vld [vmem:[%s4741_s30 + $0x28] sm:$0xff]   ;;  %235 = vst [vmem:[#allocation2 + $0x8] sm:$0xff] %v203_v4   ;;  %v223_v8 = vld [vmem:[%s4741_s30 + $0x58] sm:$0xff]   ;;  %v205_v10 = vld [vmem:[%s4741_s30 + $0x10] sm:$0xff]   ;;  %s4367_s10 = smul.u32 (%p4733_p4), 112, %s4722_s18 }
  0x1f   : > { %241 = vst [vmem:[#allocation2 + $0x20] sm:$0xff] %v209_v5   ;;  %v4254_v9 = vld [vmem:[%s5676_s1 + $0x68] sm:$0xff]  ;;  %v213_v11 = vld [vmem:[%s4741_s30 + $0x30] sm:$0xff]   ;;  %v225_v12 = vld [vmem:[%s4741_s30 + $0x60] sm:$0xff]   ;;  %s3195_s11 = ssub.s32 (%p4733_p4), 64, %s3194_s9 }
  0x20   : > { %243 = vst [vmem:[#allocation2 + $0x28] sm:$0xff] %v211_v6   ;;  %v217_v13 = vld [vmem:[%s4741_s30 + $0x40] sm:$0xff]   ;;  %v219_v15 = vld [vmem:[%s4741_s30 + $0x48] sm:$0xff]   ;;  %v4252_v16 = vld [vmem:[%s5676_s1 + $0x58] sm:$0xff]  ;;  %p3196_p9 = scmp.lt.s32.totalorder (%p4733_p4), %s3195_s11, 28  ;;  %s5552_s14 = scalar_lea.vmem (%p4733_p4), %s5677_s2, %s4367_s10  }
  0x21   : > { %581 = vmatpush.bf16.msra.mxu0 %v4255_v2  ;;  %4477 = vmatpush.bf16.msra.mxu1 %v4255_v2  ;;  %253 = vst [vmem:[#allocation2 + $0x50] sm:$0xff] %v221_v7   ;;  %v4253_v14 = vld [vmem:[%s5676_s1 + $0x60] sm:$0xff]  ;;  %v4251_v23 = vld [vmem:[%s5676_s1 + $0x50] sm:$0xff]  ;;  %v4250_v28 = vld [vmem:[%s5676_s1 + $0x48] sm:$0xff] }
  0x22   : > { %4479 = vmatpush.bf16.msra.mxu3 %v4255_v2  ;;  %4478 = vmatpush.bf16.msra.mxu2 %v4255_v2  ;;  %255 = vst [vmem:[#allocation2 + $0x58] sm:$0xff] %v223_v8   ;;  %v207_v37 = vld [vmem:[%s4741_s30 + $0x18] sm:$0xff]   ;;  %v227_v39 = vld [vmem:[%s4741_s30 + $0x68] sm:$0xff]   ;;  %v4249_v46 = vld [vmem:[%s5676_s1 + $0x40] sm:$0xff] }
  0x23   : > { %237 = vst [vmem:[#allocation2 + $0x10] sm:$0xff] %v205_v10   ;;  %v215_v38 = vld [vmem:[%s4741_s30 + $0x38] sm:$0xff]   ;;  %v4247_v61 = vld [vmem:[%s5676_s1 + $0x30] sm:$0xff]  ;;  %v4246_v6 = vld [vmem:[%s5676_s1 + $0x28] sm:$0xff] }
  0x24   : > { %245 = vst [vmem:[#allocation2 + $0x30] sm:$0xff] %v213_v11   ;;  %v4778_v17 = vld [vmem:[#allocation2] sm:$0xff]   ;;  %v4248_v53 = vld [vmem:[%s5676_s1 + $0x38] sm:$0xff]  ;;  %v4285_v63 = vld [vmem:[%s5676_s1 + $0xf0] sm:$0xff] }
  0x25   : > { %582 = vmatpush.bf16.msra.mxu0 %v4254_v9  ;;  %4480 = vmatpush.bf16.msra.mxu1 %v4254_v9  ;;  %257 = vst [vmem:[#allocation2 + $0x60] sm:$0xff] %v225_v12   ;;  %v4784_v20 = vld [vmem:[#allocation2 + $0x8] sm:$0xff]  ;;  %v405_v21 = vshll.u32 %v4778_v17, 16  ;;  %v403_v29 = vshrl.u32 %v4778_v17, 16  ;;  %v4286_v54 = vld [vmem:[%s5676_s1 + $0xf8] sm:$0xff]  ;;  %v4306_v0 = vld [vmem:[%s5676_s1 + $0x130] sm:$0xff] }
  0x26   : > { %4482 = vmatpush.bf16.msra.mxu3 %v4254_v9  ;;  %4481 = vmatpush.bf16.msra.mxu2 %v4254_v9  ;;  %249 = vst [vmem:[#allocation2 + $0x40] sm:$0xff] %v217_v13   ;;  %v4780_v18 = vld [vmem:[#allocation2 + $0x20] sm:$0xff]  ;;  %v410_v31 = vshll.u32 %v4784_v20, 16  ;;  %v4307_v55 = vld [vmem:[%s5676_s1 + $0x138] sm:$0xff]  ;;  %v229_v1 = vld [vmem:[%s4741_s30 + $0x70] sm:$0xf] }
  0x27   : > { %251 = vst [vmem:[#allocation2 + $0x48] sm:$0xff] %v219_v15   ;;  %v4787_v22 = vld [vmem:[#allocation2 + $0x28] sm:$0xff]  ;;  %v434_v24 = vshll.u32 %v4780_v18, 16  ;;  %v407_v30 = vrot.slane %v405_v21, 1  ;;  %v438_v35 = vshrl.u32 %v4780_v18, 16  ;;  %v4264_v62 = vld [vmem:[%s5676_s1 + $0xb8] sm:$0xff] }
  0x28   : > { %v4782_v19 = vld [vmem:[#allocation2 + $0x50] sm:$0xff]  ;;  %v442_v32 = vshll.u32 %v4787_v22, 16  ;;  %239 = vst [vmem:[#allocation2 + $0x18] sm:$0xff] %v207_v37   ;;  %v4817_v44 = vrot.slane %v410_v31, 1  ;;  %v4284_v8 = vld [vmem:[%s5676_s1 + $0xe8] sm:$0xff]  ;;  %v414_v10 = vshrl.u32 %v4784_v20, 16 }
  0x29   : > { %583 = vmatpush.bf16.msra.mxu0 %v4253_v14  ;;  %4483 = vmatpush.bf16.msra.mxu1 %v4253_v14  ;;  %v4793_v25 = vld [vmem:[#allocation2 + $0x58] sm:$0xff]  ;;  %v482_v26 = vshll.u32 %v4782_v19, 16  ;;  %v4806_v34 = vrot.slane %v434_v24, 1  ;;  %v486_v41 = vshrl.u32 %v4782_v19, 16  ;;  %247 = vst [vmem:[#allocation2 + $0x38] sm:$0xff] %v215_v38   ;;  %v408_v43 = vor.u32 %v407_v30, %v403_v29  ;;  %v4263_v7 = vld [vmem:[%s5676_s1 + $0xb0] sm:$0xff] }
  0x2a   : > { %4485 = vmatpush.bf16.msra.mxu3 %v4253_v14  ;;  %4484 = vmatpush.bf16.msra.mxu2 %v4253_v14  ;;  %v490_v42 = vshll.u32 %v4793_v25, 16  ;;  %v4819_v45 = vrot.slane %v442_v32, 1  ;;  %259 = vst [vmem:[#allocation2 + $0x68] sm:$0xff] %v227_v39   ;;  %v4858_v2 = vld [vmem:[#allocation2 + $0x10] sm:$0xff]  ;;  %v4305_v9 = vld [vmem:[%s5676_s1 + $0x128] sm:$0xff]  ;;  %v446_v12 = vshrl.u32 %v4787_v22, 16 }
  0x2b   : > { %v4813_v40 = vrot.slane %v482_v26, 1  ;;  %v440_v47 = vor.u32 %v438_v35, %v4806_v34  ;;  %v413_v56 = vsel %vm401_vm0, %v408_v43, %v4817_v44  ;;  %261 = vst [vmem:[#allocation2 + $0x70] sm:$0xf] %v229_v1  ;;  %v4860_v3 = vld [vmem:[#allocation2 + $0x30] sm:$0xff]  ;;  %v418_v11 = vshll.u32 %v4858_v2, 16  ;;  %v4262_v21 = vld [vmem:[%s5676_s1 + $0xa8] sm:$0xff] }
  0x2c   : > { %v492_v52 = vrot.slane %v490_v42, 1  ;;  %v4863_v5 = vld [vmem:[#allocation2 + $0x60] sm:$0xff]  ;;  %v450_v13 = vshll.u32 %v4860_v3, 16  ;;  %v494_v14 = vshrl.u32 %v4793_v25, 16  ;;  %v416_v26 = vor.u32 %v414_v10, %v4817_v44  ;;  %v4282_v38 = vld [vmem:[%s5676_s1 + $0xd8] sm:$0xff] }
  0x2d   : > { %584 = vmatpush.bf16.msra.mxu0 %v4252_v16  ;;  %4486 = vmatpush.bf16.msra.mxu1 %v4252_v16  ;;  %v4796_v27 = vld [vmem:[#allocation2 + $0x40] sm:$0xff]  ;;  %v488_v51 = vor.u32 %v486_v41, %v4813_v40  ;;  %v445_v57 = vsel %vm401_vm0, %v440_v47, %v4819_v45  ;;  %v498_v15 = vshll.u32 %v4863_v5, 16  ;;  %v448_v29 = vor.u32 %v446_v12, %v4819_v45  ;;  %v4303_v39 = vld [vmem:[%s5676_s1 + $0x118] sm:$0xff]  ;;  %v4281_v47 = vld [vmem:[%s5676_s1 + $0xd0] sm:$0xff] }
  0x2e   : > { %4488 = vmatpush.bf16.msra.mxu3 %v4252_v16  ;;  %4487 = vmatpush.bf16.msra.mxu2 %v4252_v16  ;;  %v4804_v33 = vld [vmem:[#allocation2 + $0x48] sm:$0xff]  ;;  %v466_v36 = vshll.u32 %v4796_v27, 16  ;;  %v470_v49 = vshrl.u32 %v4796_v27, 16  ;;  %v4245_v16 = vld [vmem:[%s5676_s1 + $0x20] sm:$0xff]  ;;  %v452_v30 = vrot.slane %v450_v13, 1  ;;  %v496_v32 = vor.u32 %v494_v14, %v492_v52  ;;  %v4260_v45 = vld [vmem:[%s5676_s1 + $0x98] sm:$0xff] }
  0x2f   : > { %v474_v50 = vshll.u32 %v4804_v33, 16  ;;  %v493_v60 = vsel %vm401_vm0, %v488_v51, %v492_v52  ;;  %v4304_v24 = vld [vmem:[%s5676_s1 + $0x120] sm:$0xff]  ;;  %v478_v31 = vshrl.u32 %v4804_v33, 16  ;;  %v500_v35 = vrot.slane %v498_v15, 1  ;;  %v4302_v52 = vld [vmem:[%s5676_s1 + $0x110] sm:$0xff] }
  0x30   : > { %v4825_v48 = vrot.slane %v466_v36, 1  ;;  %v4244_v36 = vld [vmem:[%s5676_s1 + $0x18] sm:$0xff]  ;;  %v4261_v37 = vld [vmem:[%s5676_s1 + $0xa0] sm:$0xff]  ;;  %v453_v42 = vsel %vm401_vm0, %v448_v29, %v452_v30 }
  0x31   : > { %585 = vmatpush.bf16.msra.mxu0 %v4251_v23  ;;  %4489 = vmatpush.bf16.msra.mxu1 %v4251_v23  ;;  %v476_v59 = vrot.slane %v474_v50, 1  ;;  %v501_v44 = vsel %vm401_vm0, %v496_v32, %v500_v35  ;;  %v4924_v50 = vld [vmem:[#allocation2 + $0x38] sm:$0xff]  ;;  %v4451_v1 = vld [vmem:[#allocation2] sm:$0xe] }
  0x32   : > { %4491 = vmatpush.bf16.msra.mxu3 %v4251_v23  ;;  %4490 = vmatpush.bf16.msra.mxu2 %v4251_v23  ;;  %v472_v58 = vor.u32 %v470_v49, %v4825_v48  ;;  %v4283_v23 = vld [vmem:[%s5676_s1 + $0xe0] sm:$0xff]  ;;  %v4922_v49 = vld [vmem:[#allocation2 + $0x18] sm:$0xff] }
  0x33   : > { %v480_v43 = vor.u32 %v478_v31, %v476_v59  ;;  %v4257_v15 = vld [vmem:[%s5676_s1 + $0x80] sm:$0xff]  ;;  %v4358_v32 = vld [vmem:[%s5676_s1 + $0x1f8] sm:$0xff] }
  0x34   : > { %v477_v4 = vsel %vm401_vm0, %v472_v58, %v476_v59  ;;  %v426_v58 = vshll.u32 %v4922_v49, 16  ;;  %v454_v59 = vshrl.u32 %v4860_v3, 16 }
  0x35   : > { %586 = vmatpush.bf16.msra.mxu0 %v4250_v28  ;;  %4492 = vmatpush.bf16.msra.mxu1 %v4250_v28  ;;  %v485_v51 = vsel %vm401_vm0, %v480_v43, %v4813_v40  ;;  %v4280_v40 = vld [vmem:[%s5676_s1 + $0xc8] sm:$0xff] }
  0x36   : > { %4494 = vmatpush.bf16.msra.mxu3 %v4250_v28  ;;  %4493 = vmatpush.bf16.msra.mxu2 %v4250_v28  ;;  %v420_v28 = vrot.slane %v418_v11, 1  ;;  %v456_v10 = vor.u32 %v454_v59, %v452_v30 }
  0x38   : > { %v421_v41 = vsel %vm401_vm0, %v416_v26, %v420_v28 }
  0x39   : > { %587 = vmatpush.bf16.msra.mxu0 %v4249_v46  ;;  %4495 = vmatpush.bf16.msra.mxu1 %v4249_v46 }
  0x3a   : > { %4497 = vmatpush.bf16.msra.mxu3 %v4249_v46  ;;  %4496 = vmatpush.bf16.msra.mxu2 %v4249_v46  ;;  %v4243_v46 = vld [vmem:[%s5676_s1 + $0x10] sm:$0xff] }
  0x3c   : > { %588 = vmatmul.bf16.vlgmr.msra.gmra.mxu0 %v413_v56  ;;  %608 = vmatmul.bf16.vlgmr.msra.gmra.mxu1 %v445_v57  ;;  %v4301_v56 = vld [vmem:[%s5676_s1 + $0x108] sm:$0xff]  ;;  %v422_v57 = vshrl.u32 %v4858_v2, 16 }
  0x3d   : > { %721 = vmatpush.bf16.msrb.mxu1 %v4248_v53  ;;  %1601 = vmatpush.bf16.msrb.mxu0 %v4307_v55  ;;  %v4931_v53 = vld [vmem:[#allocation2 + $0x68] sm:$0xff] }
  0x3e   : > { %1197 = vmatpush.bf16.msrb.mxu3 %v4286_v54  ;;  %913 = vmatpush.bf16.msrb.mxu2 %v4264_v62  ;;  %v4259_v54 = vld [vmem:[%s5676_s1 + $0x90] sm:$0xff]  ;;  %v4242_v55 = vld [vmem:[%s5676_s1 + $0x8] sm:$0xff] }
  0x3f   : > { %638 = vmatmul.bf16.vlgmr.msra.gmra.mxu3 %v493_v60  ;;  %628 = vmatmul.bf16.vlgmr.msra.gmra.mxu2 %v477_v4  ;;  %v458_v60 = vshll.u32 %v4924_v50, 16  ;;  %v4258_v62 = vld [vmem:[%s5676_s1 + $0x88] sm:$0xff]  ;;  %v4241_v4 = vld [vmem:[%s5676_s1] sm:$0xff] }
  0x41   : > { %722 = vmatpush.bf16.msrb.mxu1 %v4247_v61  ;;  %1602 = vmatpush.bf16.msrb.mxu0 %v4306_v0  ;;  %v502_v61 = vshrl.u32 %v4863_v5, 16  ;;  %v4450_v0 = vld [vmem:[#allocation2] sm:$0xf0]  ;;  %v460_v11 = vrot.slane %v458_v60, 1 }
  0x42   : > { %1198 = vmatpush.bf16.msrb.mxu3 %v4285_v63  ;;  %914 = vmatpush.bf16.msrb.mxu2 %v4263_v7  ;;  %v506_v63 = vshll.u32 %v4931_v53, 16  ;;  %v4300_v7 = vld [vmem:[%s5676_s1 + $0x100] sm:$0xff]  ;;  %v4452_v12 = vor.u32 %v4451_v1, %v4450_v0  ;;  %v4265_v0 = vld [vmem:[#allocation2 + $0x8] sm:$0xff] }
  0x43   : > { %v504_v13 = vor.u32 %v502_v61, %v500_v35  ;;  %v4315_v35 = vld [vmem:[%s5676_s1 + $0x178] sm:$0xff] }
  0x44   : > { %v508_v14 = vrot.slane %v506_v63, 1  ;;  %v822_v26 = vrot.slane %v4452_v12, 1 }
  0x45   : > { %723 = vmatpush.bf16.msrb.mxu1 %v4246_v6  ;;  %1603 = vmatpush.bf16.msrb.mxu0 %v4305_v9  ;;  %v4279_v6 = vld [vmem:[%s5676_s1 + $0xc0] sm:$0xff]  ;;  %v428_v9 = vrot.slane %v426_v58, 1  ;;  %v4314_v58 = vld [vmem:[%s5676_s1 + $0x170] sm:$0xff] }
  0x46   : > { %1199 = vmatpush.bf16.msrb.mxu3 %v4284_v8  ;;  %915 = vmatpush.bf16.msrb.mxu2 %v4262_v21  ;;  %v424_v8 = vor.u32 %v422_v57, %v420_v28  ;;  %v4337_v21 = vld [vmem:[%s5676_s1 + $0x1b8] sm:$0xff]  ;;  %v823_v28 = vrot.slane %v4784_v20, 1  ;;  %v509_v29 = vsel %vm401_vm0, %v504_v13, %v508_v14  ;;  %v4266_v13 = vld [vmem:[#allocation2 + $0x10] sm:$0xff] }
  0x48   : > { %v824_v31 = vsel %vm821_vm1, %v822_v26, %v823_v28 }
  0x49   : > { %724 = vmatpush.bf16.msrb.mxu1 %v4245_v16  ;;  %1604 = vmatpush.bf16.msrb.mxu0 %v4304_v24  ;;  %v310_v16 = vld [vmem:[#allocation2 + $0x70] sm:$0x1]  ;;  %v461_v24 = vsel %vm401_vm0, %v456_v10, %v460_v11 }
  0x4a   : > { %1200 = vmatpush.bf16.msrb.mxu3 %v4283_v23  ;;  %916 = vmatpush.bf16.msrb.mxu2 %v4261_v37  ;;  %v429_v23 = vsel %vm401_vm0, %v424_v8, %v428_v9  ;;  %v385_v30 = vunpack.c.l.b16 %v310_v16  ;;  %v4365_v8 = vld [vmem:[%s5676_s1 + $0x230] sm:$0xff] }
  0x4c   : > { %593 = vmatmul.bf16.gmra.mxu0 %v421_v41  ;;  %613 = vmatmul.bf16.gmra.mxu1 %v453_v42  ;;  %v4983_v37 = vpack.c.b16 %v385_v30, %v385_v30  ;;  %v510_v41 = vshrl.u32 %v4931_v53, 16  ;;  %v4267_v30 = vld [vmem:[#allocation2 + $0x18] sm:$0xff] }
  0x4d   : > { %725 = vmatpush.bf16.msrb.mxu1 %v4244_v36  ;;  %1605 = vmatpush.bf16.msrb.mxu0 %v4303_v39  ;;  %v4366_v36 = vld [vmem:[%s5676_s1 + $0x238] sm:$0xff]  ;;  %v462_v39 = vshrl.u32 %v4924_v50, 16 }
  0x4e   : > { %1201 = vmatpush.bf16.msrb.mxu3 %v4282_v38  ;;  %917 = vmatpush.bf16.msrb.mxu2 %v4260_v45  ;;  %v430_v38 = vshrl.u32 %v4922_v49, 16  ;;  %v514_v42 = vshll.u32 %v4983_v37, 16  ;;  %v512_v45 = vor.u32 %v510_v41, %v508_v14  ;;  %v829_v14 = vrot.slane %v4780_v18, 1 }
  0x4f   : > { %643 = vmatmul.bf16.gmra.mxu3 %v501_v44  ;;  %633 = vmatmul.bf16.gmra.mxu2 %v485_v51  ;;  %v464_v44 = vor.u32 %v462_v39, %v460_v11 }
  0x50   : > { %v432_v43 = vor.u32 %v430_v38, %v428_v9  ;;  %v4364_v38 = vld [vmem:[%s5676_s1 + $0x228] sm:$0xff] }
  0x51   : > { %726 = vmatpush.bf16.msrb.mxu1 %v4243_v46  ;;  %1606 = vmatpush.bf16.msrb.mxu0 %v4302_v52  ;;  %v516_v46 = vrot.slane %v514_v42, 1  ;;  %v469_v51 = vsel %vm401_vm0, %v464_v44, %v4825_v48  ;;  %v825_v52 = vrot.slane %v4858_v2, 1  ;;  %v4357_v48 = vld [vmem:[%s5676_s1 + $0x1f0] sm:$0xff]  ;;  %v4268_v44 = vld [vmem:[#allocation2 + $0x20] sm:$0xff] }
  0x52   : > { %1202 = vmatpush.bf16.msrb.mxu3 %v4281_v47  ;;  %918 = vmatpush.bf16.msrb.mxu2 %v4259_v54  ;;  %v437_v47 = vsel %vm401_vm0, %v432_v43, %v4806_v34  ;;  %v4336_v34 = vld [vmem:[%s5676_s1 + $0x1b0] sm:$0xff] }
  0x53   : > { %v517_v54 = vsel %vm401_vm0, %v512_v45, %v516_v46  ;;  %v826_v57 = vsel %vm821_vm1, %v823_v28, %v825_v52  ;;  %v833_v45 = vrot.slane %v4860_v3, 1  ;;  %v5050_v46 = vld [vmem:[#allocation2 + $0x30] sm:$0xff] }
  0x55   : > { %727 = vmatpush.bf16.msrb.mxu1 %v4242_v55  ;;  %1607 = vmatpush.bf16.msrb.mxu0 %v4301_v56  ;;  %v4453_v55 = vld [vmem:[#allocation2 + $0x8] sm:$0xff]  }
  0x56   : > { %1203 = vmatpush.bf16.msrb.mxu3 %v4280_v40  ;;  %919 = vmatpush.bf16.msrb.mxu2 %v4258_v62  ;;  %v4995_v40 = vld [vmem:[#allocation2 + $0x10] sm:$0xff]  ;;  %v1426_v56 = vshll.u32 %v4453_v55, 16  ;;  %v1424_v59 = vshrl.u32 %v4453_v55, 16  ;;  %v4312_v55 = vld [vmem:[%s5676_s1 + $0x160] sm:$0xff] }
  0x57   : > { %v1431_v61 = vshll.u32 %v4995_v40, 16  ;;  %v1435_v9 = vshrl.u32 %v4995_v40, 16 }
  0x58   : > { %v1428_v60 = vrot.slane %v1426_v56, 1 }
  0x59   : > { %728 = vmatpush.bf16.msrb.mxu1 %v4241_v4  ;;  %1608 = vmatpush.bf16.msrb.mxu0 %v4300_v7  ;;  %v1433_v63 = vrot.slane %v1431_v61, 1  ;;  %v827_v4 = vrot.slane %v4922_v49, 1  ;;  %v835_v61 = vrot.slane %v4924_v50, 1 }
  0x5a   : > { %1204 = vmatpush.bf16.msrb.mxu3 %v4279_v6  ;;  %920 = vmatpush.bf16.msrb.mxu2 %v4257_v15  ;;  %v1429_v62 = vor.u32 %v1428_v60, %v1424_v59  ;;  %v5011_v6 = vld [vmem:[#allocation2 + $0x18] sm:$0xff]  ;;  %v5022_v15 = vld [vmem:[#allocation2 + $0x20] sm:$0xff]  ;;  %v4269_v59 = vld [vmem:[#allocation2 + $0x28] sm:$0xff] }
  0x5b   : > { %v828_v7 = vsel %vm821_vm1, %v825_v52, %v827_v4  ;;  %v1439_v10 = vshll.u32 %v5011_v6, 16  ;;  %v1437_v11 = vor.u32 %v1435_v9, %v1433_v63  ;;  %v830_v16 = vsel %vm821_vm1, %v827_v4, %v829_v14  ;;  %v4355_v52 = vld [vmem:[%s5676_s1 + $0x1e0] sm:$0xff] }
  0x5c   : > { %598 = vmatmul.bf16.gmra.mxu0 %v429_v23  ;;  %618 = vmatmul.bf16.gmra.mxu1 %v461_v24  ;;  %v1434_v1 = vsel %vm401_vm0, %v1429_v62, %v1433_v63  ;;  %v4356_v23 = vld [vmem:[%s5676_s1 + $0x1e8] sm:$0xff]  ;;  %v1447_v26 = vshll.u32 %v5022_v15, 16  ;;  %v1451_v39 = vshrl.u32 %v5022_v15, 16  ;;  %v5074_v62 = vld [vmem:[#allocation2 + $0x38] sm:$0xff]  ;;  %v836_v63 = vsel %vm821_vm1, %v833_v45, %v835_v61 }
  0x5d   : > { %1820 = vmatpush.bf16.msra.mxu1 %v4315_v35  ;;  %2727 = vmatpush.bf16.msra.mxu0 %v4366_v36  ;;  %v1441_v12 = vrot.slane %v1439_v10, 1  ;;  %v4313_v24 = vld [vmem:[%s5676_s1 + $0x168] sm:$0xff] }
  0x5e   : > { %2104 = vmatpush.bf16.msra.mxu2 %v4337_v21  ;;  %2508 = vmatpush.bf16.msra.mxu3 %v4358_v32  ;;  %v4335_v21 = vld [vmem:[%s5676_s1 + $0x1a8] sm:$0xff]  ;;  %v831_v32 = vrot.slane %v4787_v22, 1 }
  0x5f   : > { %648 = vmatmul.bf16.gmra.mxu3 %v509_v29  ;;  %921 = vmatmul.bf16.vlgmr.msrb.gmra.mxu2 %v824_v31  ;;  %v1449_v29 = vrot.slane %v1447_v26, 1  ;;  %v5039_v35 = vld [vmem:[#allocation2 + $0x28] sm:$0xff]  ;;  %v4354_v26 = vld [vmem:[%s5676_s1 + $0x1d8] sm:$0xff] }
  0x60   : > { %v832_v36 = vsel %vm821_vm1, %v829_v14, %v831_v32  ;;  %v1455_v41 = vshll.u32 %v5039_v35, 16 }
  0x61   : > { %1821 = vmatpush.bf16.msra.mxu1 %v4314_v58  ;;  %2728 = vmatpush.bf16.msra.mxu0 %v4365_v8  ;;  %v1453_v42 = vor.u32 %v1451_v39, %v1449_v29  ;;  %v1471_v8 = vshll.u32 %v5074_v62, 16 }
  0x62   : > { %2105 = vmatpush.bf16.msra.mxu2 %v4336_v34  ;;  %2509 = vmatpush.bf16.msra.mxu3 %v4357_v48  ;;  %v1457_v43 = vrot.slane %v1455_v41, 1  ;;  %v4363_v34 = vld [vmem:[%s5676_s1 + $0x220] sm:$0xff] }
  0x63   : > { %v1473_v10 = vrot.slane %v1471_v8, 1 }
  0x65   : > { %1822 = vmatpush.bf16.msra.mxu1 %v4313_v24  ;;  %2729 = vmatpush.bf16.msra.mxu0 %v4364_v38  ;;  %v5101_v24 = vld [vmem:[#allocation2 + $0x40] sm:$0xff] }
  0x66   : > { %2106 = vmatpush.bf16.msra.mxu2 %v4335_v21  ;;  %2510 = vmatpush.bf16.msra.mxu3 %v4356_v23  ;;  %v4333_v21 = vld [vmem:[%s5676_s1 + $0x198] sm:$0xff] }
  0x69   : > { %1823 = vmatpush.bf16.msra.mxu1 %v4312_v55  ;;  %2730 = vmatpush.bf16.msra.mxu0 %v4363_v34 }
  0x6a   : > { %2511 = vmatpush.bf16.msra.mxu3 %v4355_v52  ;;  %v5134_v52 = vld [vmem:[#allocation2 + $0x48] sm:$0xff] }
  0x6b   : > { %5684 = vst [vmem:[#allocation4_spill] sm:$0xff] %v5134_v52  ;;  %v1487_v34 = vshll.u32 %v5134_v52, 16 }
  0x6c   : > { %603 = vmatmul.bf16.gmra.mxu0 %v437_v47  ;;  %623 = vmatmul.bf16.gmra.mxu1 %v469_v51  ;;  %v834_v47 = vsel %vm821_vm1, %v831_v32, %v833_v45  ;;  %v4334_v51 = vld [vmem:[%s5676_s1 + $0x1a0] sm:$0xff]  ;;  %v1479_v32 = vshll.u32 %v5101_v24, 16 }
  0x6d   : > { %2107 = vmatpush.bf16.msra.mxu2 %v4334_v51 }
  0x6e   : > { %2512 = vmatpush.bf16.msra.mxu3 %v4354_v26  ;;  %v1481_v41 = vrot.slane %v1479_v32, 1 }
  0x6f   : > { %653 = vmatmul.bf16.gmra.mxu3 %v517_v54  ;;  %926 = vmatmul.bf16.gmra.mxu2 %v826_v57  ;;  %v1459_v54 = vshrl.u32 %v5039_v35, 16 }
  0x71   : > { %v1461_v56 = vor.u32 %v1459_v54, %v1457_v43  ;;  %2108 = vmatpush.bf16.msra.mxu2 %v4333_v21 }
  0x7c   : > { %729 = vmatmul.bf16.vlgmr.msrb.gmra.mxu1 %v4778_v17  ;;  %1609 = vmatmul.bf16.vlgmr.msrb.gmra.mxu0 %v1434_v1  ;;  %v1442_v17 = vsel %vm401_vm0, %v1437_v11, %v1441_v12 }
  0x7f   : > { %1205 = vmatmul.bf16.vlgmr.msrb.gmra.mxu3 %v4265_v0  ;;  %931 = vmatmul.bf16.gmra.mxu2 %v828_v7  ;;  %v1467_v7 = vshrl.u32 %v5050_v46, 16 }
  0x8c   : > { %734 = vmatmul.bf16.gmra.mxu1 %v4784_v20  ;;  %1614 = vmatmul.bf16.gmra.mxu0 %v1442_v17  ;;  %v1443_v20 = vshrl.u32 %v5011_v6, 16  ;;  %v4270_v17 = vld [vmem:[#allocation2 + $0x30] sm:$0xff] }
  0x8e   : > { %v1445_v28 = vor.u32 %v1443_v20, %v1441_v12 }
  0x8f   : > { %1210 = vmatmul.bf16.gmra.mxu3 %v4266_v13  ;;  %936 = vmatmul.bf16.gmra.mxu2 %v830_v16  ;;  %v837_v16 = vrot.slane %v4796_v27, 1 }
  0x90   : > { %v1450_v31 = vsel %vm401_vm0, %v1445_v28, %v1449_v29  ;;  %v4311_v28 = vld [vmem:[%s5676_s1 + $0x158] sm:$0xff] }
  0x91   : > { %v838_v20 = vsel %vm821_vm1, %v835_v61, %v837_v16  ;;  %1824 = vmatpush.bf16.msra.mxu1 %v4311_v28  ;;  %v1489_v61 = vrot.slane %v1487_v34, 1  ;;  %v4273_v34 = vld [vmem:[#allocation2 + $0x48] sm:$0xff] }
  0x9c   : > { %739 = vmatmul.bf16.gmra.mxu1 %v4858_v2  ;;  %1619 = vmatmul.bf16.gmra.mxu0 %v1450_v31  ;;  %v1458_v2 = vsel %vm401_vm0, %v1453_v42, %v1457_v43  ;;  %v1475_v31 = vshrl.u32 %v5074_v62, 16 }
  0x9e   : > { %v1477_v39 = vor.u32 %v1475_v31, %v1473_v10 }
  0x9f   : > { %1215 = vmatmul.bf16.gmra.mxu3 %v4267_v30  ;;  %941 = vmatmul.bf16.gmra.mxu2 %v832_v36  ;;  %v4362_v36 = vld [vmem:[%s5676_s1 + $0x218] sm:$0xff] }
  0xa0   : > { %2731 = vmatpush.bf16.msra.mxu0 %v4362_v36  ;;  %v1482_v45 = vsel %vm401_vm0, %v1477_v39, %v1481_v41  ;;  %v1491_v36 = vshrl.u32 %v5134_v52, 16  ;;  %v845_v52 = vrot.slane %v4863_v5, 1 }
  0xac   : > { %744 = vmatmul.bf16.gmra.mxu1 %v4922_v49  ;;  %1624 = vmatmul.bf16.gmra.mxu0 %v1458_v2  ;;  %v1463_v49 = vshll.u32 %v5050_v46, 16  ;;  %v4271_v2 = vld [vmem:[#allocation2 + $0x38] sm:$0xff] }
  0xae   : > { %v1465_v57 = vrot.slane %v1463_v49, 1 }
  0xaf   : > { %1220 = vmatmul.bf16.gmra.mxu3 %v4268_v44  ;;  %946 = vmatmul.bf16.gmra.mxu2 %v834_v47  ;;  %v839_v47 = vrot.slane %v4804_v33, 1 }
  0xb0   : > { %v1466_v60 = vsel %vm401_vm0, %v1461_v56, %v1465_v57 }
  0xb1   : > { %v840_v54 = vsel %vm821_vm1, %v837_v16, %v839_v47  ;;  %v4310_v16 = vld [vmem:[%s5676_s1 + $0x150] sm:$0xff] }
  0xb2   : > { %1825 = vmatpush.bf16.msra.mxu1 %v4310_v16  ;;  %v5183_v16 = vld [vmem:[#allocation2 + $0x58] sm:$0xff] }
  0xb3   : > { %5689 = vst [vmem:[#allocation9_spill] sm:$0xff] %v5183_v16 }
  0xb9   : > { %v5067_v48 = vpop.f32.mrf.mxu0  ;;  %v5069_v58 = vpop.f32.mrf.mxu1 }
  0xbc   : > { %749 = vmatmul.bf16.gmra.mxu1 %v4780_v18  ;;  %1629 = vmatmul.bf16.gmra.mxu0 %v1466_v60  ;;  %v1469_v18 = vor.u32 %v1467_v7, %v1465_v57  ;;  %v1483_v57 = vshrl.u32 %v5101_v24, 16 }
  0xbe   : > { %v1474_v14 = vsel %vm401_vm0, %v1469_v18, %v1473_v10  ;;  %v1485_v60 = vor.u32 %v1483_v57, %v1481_v41  ;;  %v4272_v18 = vld [vmem:[#allocation2 + $0x40] sm:$0xff] }
  0xbf   : > { %1225 = vmatmul.bf16.gmra.mxu3 %v4269_v59  ;;  %951 = vmatmul.bf16.gmra.mxu2 %v836_v63 }
  0xc0   : > { %v1490_v10 = vsel %vm401_vm0, %v1485_v60, %v1489_v61  ;;  %v843_v60 = vrot.slane %v4793_v25, 1 }
  0xc1   : > { %v5079_v1 = vpop.f32.mrf.mxu0  ;;  %v5081_v4 = vpop.f32.mrf.mxu1 }
  0xc2   : > { %v5077_v0 = vpop.f32.mrf.mxu3  ;;  %v5085_v9 = vpop.f32.mrf.mxu2 }
  0xc9   : > { %v5089_v12 = vpop.f32.mrf.mxu0  ;;  %v5091_v13 = vpop.f32.mrf.mxu1 }
  0xca   : > { %v5087_v11 = vpop.f32.mrf.mxu3  ;;  %v5098_v23 = vpop.f32.mrf.mxu2 }
  0xcc   : > { %754 = vmatmul.bf16.gmra.mxu1 %v4787_v22  ;;  %1634 = vmatmul.bf16.gmra.mxu0 %v1474_v14  ;;  %v4353_v14 = vld [vmem:[%s5676_s1 + $0x1d0] sm:$0xff] }
  0xcd   : > { %2513 = vmatpush.bf16.msra.mxu3 %v4353_v14 }
  0xcf   : > { %1230 = vmatmul.bf16.gmra.mxu3 %v4270_v17  ;;  %956 = vmatmul.bf16.gmra.mxu2 %v838_v20  ;;  %v841_v17 = vrot.slane %v4782_v19, 1  ;;  %v5163_v20 = vld [vmem:[#allocation2 + $0x50] sm:$0xff] }
  0xd0   : > { %5686 = vst [vmem:[#allocation6_spill] sm:$0xff] %v5163_v20  ;;  %v1495_v39 = vshll.u32 %v5163_v20, 16 }
  0xd1   : > { %v5112_v22 = vpop.f32.mrf.mxu0  ;;  %v5114_v30 = vpop.f32.mrf.mxu1  ;;  %v842_v26 = vsel %vm821_vm1, %v839_v47, %v841_v17 }
  0xd2   : > { %v5110_v29 = vpop.f32.mrf.mxu3  ;;  %v5121_v38 = vpop.f32.mrf.mxu2 }
  0xd9   : > { %v5125_v43 = vpop.f32.mrf.mxu0  ;;  %v5127_v44 = vpop.f32.mrf.mxu1 }
  0xda   : > { %v5123_v42 = vpop.f32.mrf.mxu3  ;;  %v5131_v51 = vpop.f32.mrf.mxu2 }
  0xdc   : > { %759 = vmatmul.bf16.gmra.mxu1 %v4860_v3  ;;  %1639 = vmatmul.bf16.gmra.mxu0 %v1482_v45  ;;  %v4332_v3 = vld [vmem:[%s5676_s1 + $0x190] sm:$0xff]  ;;  %v1497_v45 = vrot.slane %v1495_v39, 1 }
  0xdd   : > { %2109 = vmatpush.bf16.msra.mxu2 %v4332_v3 }
  0xdf   : > { %1235 = vmatmul.bf16.gmra.mxu3 %v4271_v2  ;;  %961 = vmatmul.bf16.gmra.mxu2 %v840_v54  ;;  %v1493_v2 = vor.u32 %v1491_v36, %v1489_v61  ;;  %v844_v61 = vsel %vm821_vm1, %v841_v17, %v843_v60  ;;  %v4309_v17 = vld [vmem:[%s5676_s1 + $0x148] sm:$0xff] }
  0xe0   : > { %1826 = vmatpush.bf16.msra.mxu1 %v4309_v17 }
  0xe1   : > { %v5139_v55 = vpop.f32.mrf.mxu0  ;;  %v5141_v56 = vpop.f32.mrf.mxu1  ;;  %v1498_v3 = vsel %vm401_vm0, %v1493_v2, %v1497_v45  ;;  %v1499_v2 = vshrl.u32 %v5163_v20, 16  ;;  %v4274_v20 = vld [vmem:[#allocation2 + $0x50] sm:$0xff] }
  0xe2   : > { %v5137_v49 = vpop.f32.mrf.mxu3  ;;  %v922_v59 = vpop.f32.mrf.mxu2 }
  0xe9   : > { %v5150_v7 = vpop.f32.mrf.mxu0  ;;  %v5152_v8 = vpop.f32.mrf.mxu1 }
  0xea   : > { %v5148_v63 = vpop.f32.mrf.mxu3  ;;  %v924_v21 = vpop.f32.mrf.mxu2 }
  0xeb   : > { %5685 = vst [vmem:[#allocation5_spill] sm:$0xff] %v5148_v63 }
  0xec   : > { %764 = vmatmul.bf16.gmra.mxu1 %v4924_v50  ;;  %1644 = vmatmul.bf16.gmra.mxu0 %v1490_v10  ;;  %v4361_v50 = vld [vmem:[%s5676_s1 + $0x210] sm:$0xff] }
  0xed   : > { %2732 = vmatpush.bf16.msra.mxu0 %v4361_v50 }
  0xef   : > { %1240 = vmatmul.bf16.gmra.mxu3 %v4272_v18  ;;  %966 = vmatmul.bf16.gmra.mxu2 %v842_v26 }
  0xf1   : > { %v5168_v31 = vpop.f32.mrf.mxu0  ;;  %v5170_v32 = vpop.f32.mrf.mxu1 }
  0xf2   : > { %v5166_v28 = vpop.f32.mrf.mxu3  ;;  %v927_v41 = vpop.f32.mrf.mxu2 }
  0xf3   : > { %5687 = vst [vmem:[#allocation7_spill] sm:$0xff] %v5166_v28 }
  0xf9   : > { %v730_v54 = vpop.f32.mrf.mxu1  ;;  %v1610_v57 = vpop.f32.mrf.mxu0 }
  0xfa   : > { %v5177_v47 = vpop.f32.mrf.mxu3  ;;  %v731_v18 = vadd.f32 %v730_v54, %v5067_v48  ;;  %v929_v10 = vpop.f32.mrf.mxu2 }
  0xfb   : > { %5688 = vst [vmem:[#allocation8_spill] sm:$0xff] %v5177_v47  ;;  %v1503_v47 = vshll.u32 %v5183_v16, 16 }
  0xfc   : > { %769 = vmatmul.bf16.gmra.mxu1 %v4796_v27  ;;  %1649 = vmatmul.bf16.gmra.mxu0 %v1498_v3  ;;  %v992_v14 = vadd.f32 %v922_v59, %v731_v18  ;;  %v4331_v27 = vld [vmem:[%s5676_s1 + $0x188] sm:$0xff]  ;;  %v1501_v18 = vor.u32 %v1499_v2, %v1497_v45  ;;  %v5206_v45 = vld [vmem:[#allocation2 + $0x60] sm:$0xff] }
  0xfd   : > { %v4352_v59 = vld [vmem:[%s5676_s1 + $0x1c8] sm:$0xff]  ;;  %2110 = vmatpush.bf16.msra.mxu2 %v4331_v27 }
  0xfe   : > { %2514 = vmatpush.bf16.msra.mxu3 %v4352_v59  ;;  %v4360_v2 = vld [vmem:[%s5676_s1 + $0x208] sm:$0xff] }
  0xff   : > { %1245 = vmatmul.bf16.gmra.mxu3 %v4273_v34  ;;  %971 = vmatmul.bf16.gmra.mxu2 %v844_v61 }
 0x100   : > { %2733 = vmatpush.bf16.msra.mxu0 %v4360_v2  ;;  %v847_v2 = vrot.slane %v4931_v53, 1 }
 0x101   : > { %v732_v39 = vpop.f32.mrf.mxu1  ;;  %v1612_v50 = vpop.f32.mrf.mxu0 }
 0x102   : > { %v1206_v26 = vpop.f32.mrf.mxu3  ;;  %v733_v48 = vadd.f32 %v732_v39, %v5079_v1  ;;  %v932_v54 = vpop.f32.mrf.mxu2  ;;  %v1505_v1 = vrot.slane %v1503_v47, 1  ;;  %v846_v47 = vsel %vm821_vm1, %v843_v60, %v845_v52 }
 0x103   : > { %v1276_v36 = vadd.f32 %v1206_v26, %v992_v14 }
 0x104   : > { %v993_v3 = vadd.f32 %v924_v21, %v733_v48  ;;  %v1506_v28 = vsel %vm401_vm0, %v1501_v18, %v1505_v1  ;;  %v230_v48 = vld [vmem:[%s4741_s30 + $0x74] sm:$0xff]  }
 0x105   : > { %v5198_v34 = vadd.f32 %v1610_v57, %v1276_v36  ;;  %262 = vst [vmem:[#allocation2 + $0x74] sm:$0xff] %v230_v48  }
 0x109   : > { %v735_v26 = vpop.f32.mrf.mxu1  ;;  %v1615_v39 = vpop.f32.mrf.mxu0 }
 0x10a   : > { %v1208_v14 = vpop.f32.mrf.mxu3  ;;  %v736_v63 = vadd.f32 %v735_v26, %v5089_v12  ;;  %v934_v57 = vpop.f32.mrf.mxu2 }
 0x10b   : > { %v1277_v61 = vadd.f32 %v1208_v14, %v993_v3 }
 0x10c   : > { %774 = vmatmul.bf16.gmra.mxu1 %v4804_v33  ;;  %1654 = vmatmul.bf16.gmra.mxu0 %v1506_v28  ;;  %v994_v21 = vadd.f32 %v927_v41, %v736_v63  ;;  %v1507_v33 = vshrl.u32 %v5183_v16, 16  ;;  %v1511_v63 = vshll.u32 %v5206_v45, 16 }
 0x10d   : > { %v5203_v36 = vadd.f32 %v1612_v50, %v1277_v61 }
 0x10e   : > { %v1509_v17 = vor.u32 %v1507_v33, %v1505_v1  ;;  %v1513_v3 = vrot.slane %v1511_v63, 1  ;;  %v848_v1 = vsel %vm821_vm1, %v845_v52, %v847_v2  ;;  %v1515_v33 = vshrl.u32 %v5206_v45, 16  ;;  %v4308_v63 = vld [vmem:[%s5676_s1 + $0x140] sm:$0xff] }
 0x10f   : > { %1250 = vmatmul.bf16.gmra.mxu3 %v4274_v20  ;;  %976 = vmatmul.bf16.gmra.mxu2 %v846_v47  ;;  %v4275_v47 = vld [vmem:[#allocation2 + $0x58] sm:$0xff] }
 0x110   : > { %1827 = vmatpush.bf16.msra.mxu1 %v4308_v63 }
 0x111   : > { %v737_v27 = vpop.f32.mrf.mxu1  ;;  %v1617_v59 = vpop.f32.mrf.mxu0 }
 0x112   : > { %v1211_v12 = vpop.f32.mrf.mxu3  ;;  %v738_v20 = vadd.f32 %v737_v27, %v5112_v22  ;;  %v937_v28 = vpop.f32.mrf.mxu2 }
 0x113   : > { %v1278_v50 = vadd.f32 %v1211_v12, %v994_v21  ;;  %v1514_v21 = vsel %vm401_vm0, %v1509_v17, %v1513_v3 }
 0x114   : > { %v995_v60 = vadd.f32 %v929_v10, %v738_v20  ;;  %v5224_v10 = vld [vmem:[#allocation2 + $0x68] sm:$0xff] }
 0x115   : > { %v5216_v41 = vadd.f32 %v1615_v39, %v1278_v50  ;;  %v4330_v39 = vld [vmem:[%s5676_s1 + $0x180] sm:$0xff] }
 0x116   : > { %2111 = vmatpush.bf16.msra.mxu2 %v4330_v39  ;;  %v4359_v39 = vld [vmem:[%s5676_s1 + $0x200] sm:$0xff] }
 0x117   : > { %2734 = vmatpush.bf16.msra.mxu0 %v4359_v39 }
 0x119   : > { %v740_v61 = vpop.f32.mrf.mxu1  ;;  %v1620_v26 = vpop.f32.mrf.mxu0 }
 0x11a   : > { %v1213_v18 = vpop.f32.mrf.mxu3  ;;  %v741_v48 = vadd.f32 %v740_v61, %v5125_v43  ;;  %v939_v12 = vpop.f32.mrf.mxu2 }
 0x11b   : > { %v1279_v14 = vadd.f32 %v1213_v18, %v995_v60  ;;  %v1517_v18 = vor.u32 %v1515_v33, %v1513_v3 }
 0x11c   : > { %779 = vmatmul.bf16.gmra.mxu1 %v4782_v19  ;;  %1659 = vmatmul.bf16.gmra.mxu0 %v1514_v21  ;;  %v996_v22 = vadd.f32 %v932_v54, %v741_v48  ;;  %v1519_v19 = vshll.u32 %v5224_v10, 16  ;;  %v4351_v54 = vld [vmem:[%s5676_s1 + $0x1c0] sm:$0xff] }
 0x11d   : > { %v5221_v16 = vadd.f32 %v1617_v59, %v1279_v14  ;;  %2515 = vmatpush.bf16.msra.mxu3 %v4351_v54 }
 0x11e   : > { %v1521_v14 = vrot.slane %v1519_v19, 1 }
 0x11f   : > { %1255 = vmatmul.bf16.gmra.mxu3 %v4275_v47  ;;  %981 = vmatmul.bf16.gmra.mxu2 %v848_v1 }
 0x120   : > { %v1522_v1 = vsel %vm401_vm0, %v1517_v18, %v1521_v14 }
 0x121   : > { %v742_v27 = vpop.f32.mrf.mxu1  ;;  %v1622_v59 = vpop.f32.mrf.mxu0 }
 0x122   : > { %v1216_v50 = vpop.f32.mrf.mxu3  ;;  %v743_v52 = vadd.f32 %v742_v27, %v5139_v55  ;;  %v942_v20 = vpop.f32.mrf.mxu2  ;;  %v849_v55 = vrot.slane %v4983_v37, 1 }
 0x123   : > { %v1280_v43 = vadd.f32 %v1216_v50, %v996_v22  ;;  %v4276_v22 = vld [vmem:[#allocation2 + $0x60] sm:$0xff] }
 0x124   : > { %v997_v17 = vadd.f32 %v934_v57, %v743_v52  ;;  %v850_v27 = vsel %vm821_vm1, %v847_v2, %v849_v55 }
 0x125   : > { %v5239_v60 = vadd.f32 %v1620_v26, %v1280_v43  ;;  %v5250_v43 = vld [vmem:[#allocation2 + $0x70] sm:$0xff] }
 0x126   : > { %v1527_v52 = vshll.u32 %v5250_v43, 16 }
 0x128   : > { %v1529_v18 = vrot.slane %v1527_v52, 1 }
 0x129   : > { %v745_v21 = vpop.f32.mrf.mxu1  ;;  %v1625_v48 = vpop.f32.mrf.mxu0 }
 0x12a   : > { %v1218_v61 = vpop.f32.mrf.mxu3  ;;  %v746_v26 = vadd.f32 %v745_v21, %v5150_v7  ;;  %v944_v50 = vpop.f32.mrf.mxu2  ;;  %v1523_v7 = vshrl.u32 %v5224_v10, 16 }
 0x12b   : > { %v1281_v47 = vadd.f32 %v1218_v61, %v997_v17  ;;  %v1332_v61 = vld [vmem:[#allocation2 + $0x78] sm:$0x1] }
 0x12c   : > { %784 = vmatmul.bf16.gmra.mxu1 %v4793_v25  ;;  %1664 = vmatmul.bf16.gmra.mxu0 %v1522_v1  ;;  %v998_v3 = vadd.f32 %v937_v28, %v746_v26  ;;  %v1525_v17 = vor.u32 %v1523_v7, %v1521_v14  ;;  %v4277_v1 = vld [vmem:[#allocation2 + $0x68] sm:$0xff]  ;;  %v1407_v39 = vunpack.c.l.b16 %v1332_v61  ;;  %v1531_v7 = vshrl.u32 %v5250_v43, 16 }
 0x12d   : > { %v5247_v57 = vadd.f32 %v1622_v59, %v1281_v47 }
 0x12e   : > { %v1530_v55 = vsel %vm401_vm0, %v1525_v17, %v1529_v18  ;;  %v5263_v14 = vpack.c.b16 %v1407_v39, %v1407_v39  ;;  %v4457_v39 = vld [vmem:[#allocation2 + $0x10] sm:$0xff]  }
 0x12f   : > { %1260 = vmatmul.bf16.gmra.mxu3 %v4276_v22  ;;  %986 = vmatmul.bf16.gmra.mxu2 %v850_v27 }
 0x131   : > { %v747_v19 = vpop.f32.mrf.mxu1  ;;  %v1627_v54 = vpop.f32.mrf.mxu0 }
 0x132   : > { %v1221_v37 = vpop.f32.mrf.mxu3  ;;  %v748_v59 = vadd.f32 %v747_v19, %v5168_v31  ;;  %v947_v63 = vpop.f32.mrf.mxu2 }
 0x133   : > { %v1282_v33 = vadd.f32 %v1221_v37, %v998_v3 }
 0x134   : > { %v999_v28 = vadd.f32 %v939_v12, %v748_v59  ;;  %v4316_v12 = vld [vmem:[#allocation2 + $0x10] sm:$0xff] }
 0x135   : > { %v5256_v25 = vadd.f32 %v1625_v48, %v1282_v33 }
 0x139   : > { %v750_v21 = vpop.f32.mrf.mxu1  ;;  %v1630_v22 = vpop.f32.mrf.mxu0 }
 0x13a   : > { %v1223_v47 = vpop.f32.mrf.mxu3  ;;  %v751_v26 = vadd.f32 %v750_v21, %v5069_v58  ;;  %v949_v3 = vpop.f32.mrf.mxu2  ;;  %v1535_v58 = vshll.u32 %v5263_v14, 16  ;;  %v4278_v21 = vld [vmem:[#allocation2 + $0x70] sm:$0xff] }
 0x13b   : > { %v1283_v2 = vadd.f32 %v1223_v47, %v999_v28 }
 0x13c   : > { %789 = vmatmul.bf16.gmra.mxu1 %v4863_v5  ;;  %1669 = vmatmul.bf16.gmra.mxu0 %v1530_v55  ;;  %v1000_v31 = vadd.f32 %v942_v20, %v751_v26  ;;  %v1533_v20 = vor.u32 %v1531_v7, %v1529_v18  ;;  %v1537_v28 = vrot.slane %v1535_v58, 1  ;;  %v4454_v18 = vld [vmem:[#allocation2 + $0x8] sm:$0xf0] }
 0x13d   : > { %v5260_v27 = vadd.f32 %v1627_v54, %v1283_v2 }
 0x13f   : > { %1265 = vmatmul.bf16.gmra.mxu3 %v4277_v1  ;;  %2112 = vmatmul.bf16.vlgmr.msra.gmra.mxu2 %v4316_v12  ;;  %v1538_v1 = vsel %vm401_vm0, %v1533_v20, %v1537_v28  ;;  %v2333_v12 = vshll.u32 %v4457_v39, 16  ;;  %v2331_v20 = vshrl.u32 %v4457_v39, 16 }
 0x141   : > { %v752_v33 = vpop.f32.mrf.mxu1  ;;  %v1632_v19 = vpop.f32.mrf.mxu0 }
 0x142   : > { %v1226_v48 = vpop.f32.mrf.mxu3  ;;  %v753_v54 = vadd.f32 %v752_v33, %v5081_v4  ;;  %v952_v52 = vpop.f32.mrf.mxu2  ;;  %v4459_v33 = vld [vmem:[#allocation2 + $0x10] sm:$0xe] }
 0x143   : > { %v1284_v37 = vadd.f32 %v1226_v48, %v1000_v31  ;;  %v4455_v48 = vld [vmem:[#allocation2 + $0x8] sm:$0xe] }
 0x144   : > { %v1001_v5 = vadd.f32 %v944_v50, %v753_v54  ;;  %v4317_v50 = vld [vmem:[#allocation2 + $0x18] sm:$0xff] }
 0x145   : > { %v5268_v59 = vadd.f32 %v1630_v22, %v1284_v37  ;;  %v5275_v22 = vld [vmem:[#allocation2 + $0x18] sm:$0xff]  ;;  %v4458_v37 = vld [vmem:[#allocation2 + $0x10] sm:$0xf0] }
 0x146   : > { %v2338_v28 = vshll.u32 %v5275_v22, 16 }
 0x149   : > { %v755_v47 = vpop.f32.mrf.mxu1  ;;  %v1635_v2 = vpop.f32.mrf.mxu0 }
 0x14a   : > { %v1228_v17 = vpop.f32.mrf.mxu3  ;;  %v756_v55 = vadd.f32 %v755_v47, %v5091_v13  ;;  %v954_v26 = vpop.f32.mrf.mxu2 }
 0x14b   : > { %v1285_v61 = vadd.f32 %v1228_v17, %v1001_v5  ;;  %v4460_v5 = vor.u32 %v4459_v33, %v4458_v37 }
 0x14c   : > { %794 = vmatmul.bf16.gmra.mxu1 %v4931_v53  ;;  %1674 = vmatmul.bf16.gmra.mxu0 %v1538_v1  ;;  %v1002_v4 = vadd.f32 %v947_v63, %v756_v55  ;;  %v2335_v63 = vrot.slane %v2333_v12, 1  ;;  %v1730_v1 = vrot.slane %v4995_v40, 1 }
 0x14d   : > { %v5272_v31 = vadd.f32 %v1632_v19, %v1285_v61  ;;  %v4456_v19 = vor.u32 %v4455_v48, %v4454_v18  ;;  %v2636_v55 = vrot.slane %v4460_v5, 1 }
 0x14f   : > { %1270 = vmatmul.bf16.gmra.mxu3 %v4278_v21  ;;  %2117 = vmatmul.bf16.gmra.mxu2 %v4317_v50  ;;  %v1729_v21 = vrot.slane %v4456_v19, 1  ;;  %v2336_v50 = vor.u32 %v2335_v63, %v2331_v20  ;;  %v4339_v19 = vld [vmem:[#allocation2 + $0x20] sm:$0xff] }
 0x151   : > { %v757_v58 = vpop.f32.mrf.mxu1  ;;  %v1637_v54 = vpop.f32.mrf.mxu0  ;;  %v1731_v39 = vsel %vm821_vm1, %v1729_v21, %v1730_v1 }
 0x152   : > { %v1231_v7 = vpop.f32.mrf.mxu3  ;;  %v758_v53 = vadd.f32 %v757_v58, %v5114_v30  ;;  %v957_v17 = vpop.f32.mrf.mxu2  ;;  %v4318_v58 = vld [vmem:[#allocation2 + $0x20] sm:$0xff] }
 0x153   : > { %v1286_v13 = vadd.f32 %v1231_v7, %v1002_v4  ;;  %v2637_v4 = vrot.slane %v5275_v22, 1  ;;  %v2340_v7 = vrot.slane %v2338_v28, 1 }
 0x154   : > { %v1003_v47 = vadd.f32 %v949_v3, %v758_v53 }
 0x155   : > { %v5279_v61 = vadd.f32 %v1635_v2, %v1286_v13  ;;  %v2638_v12 = vsel %vm821_vm1, %v2636_v55, %v2637_v4  ;;  %v2341_v3 = vsel %vm401_vm0, %v2336_v50, %v2340_v7  ;;  %v1732_v50 = vrot.slane %v5011_v6, 1 }
 0x159   : > { %v760_v37 = vpop.f32.mrf.mxu1  ;;  %v1640_v30 = vpop.f32.mrf.mxu0 }
 0x15a   : > { %v1233_v18 = vpop.f32.mrf.mxu3  ;;  %v761_v2 = vadd.f32 %v760_v37, %v5127_v44  ;;  %v959_v33 = vpop.f32.mrf.mxu2  ;;  %v2342_v44 = vshrl.u32 %v5275_v22, 16 }
 0x15b   : > { %v1287_v48 = vadd.f32 %v1233_v18, %v1003_v47  ;;  %v2346_v47 = vshll.u32 %v4339_v19, 16 }
 0x15c   : > { %1828 = vmatmul.bf16.vlgmr.msra.gmra.mxu1 %v1731_v39  ;;  %2735 = vmatmul.bf16.vlgmr.msra.gmra.mxu0 %v2638_v12  ;;  %v1004_v40 = vadd.f32 %v952_v52, %v761_v2  ;;  %v2639_v52 = vrot.slane %v4339_v19, 1  ;;  %v2344_v18 = vor.u32 %v2342_v44, %v2340_v7  ;;  %v4340_v7 = vld [vmem:[#allocation2 + $0x28] sm:$0xff] }
 0x15d   : > { %v5287_v13 = vadd.f32 %v1637_v54, %v1287_v48  ;;  %v2348_v48 = vrot.slane %v2346_v47, 1 }
 0x15f   : > { %2516 = vmatmul.bf16.vlgmr.msra.gmra.mxu3 %v2341_v3  ;;  %2122 = vmatmul.bf16.gmra.mxu2 %v4318_v58  ;;  %v1733_v3 = vsel %vm821_vm1, %v1730_v1, %v1732_v50 }
 0x161   : > { %v762_v20 = vpop.f32.mrf.mxu1  ;;  %v1642_v63 = vpop.f32.mrf.mxu0 }
 0x162   : > { %v1236_v5 = vpop.f32.mrf.mxu3  ;;  %v763_v28 = vadd.f32 %v762_v20, %v5141_v56  ;;  %v962_v21 = vpop.f32.mrf.mxu2  ;;  %v2640_v56 = vsel %vm821_vm1, %v2637_v4, %v2639_v52 }
 0x163   : > { %v1288_v53 = vadd.f32 %v1236_v5, %v1004_v40  ;;  %v2349_v40 = vsel %vm401_vm0, %v2344_v18, %v2348_v48  ;;  %v2641_v18 = vrot.slane %v4340_v7, 1 }
 0x164   : > { %v1005_v54 = vadd.f32 %v954_v26, %v763_v28  ;;  %v4319_v26 = vld [vmem:[#allocation2 + $0x28] sm:$0xff]  ;;  %v2350_v28 = vshrl.u32 %v4339_v19, 16 }
 0x165   : > { %v5291_v55 = vadd.f32 %v1640_v30, %v1288_v53 }
 0x169   : > { %v765_v12 = vpop.f32.mrf.mxu1  ;;  %v1645_v2 = vpop.f32.mrf.mxu0 }
 0x16a   : > { %v1238_v37 = vpop.f32.mrf.mxu3  ;;  %v766_v22 = vadd.f32 %v765_v12, %v5152_v8  ;;  %v964_v30 = vpop.f32.mrf.mxu2  ;;  %v2354_v8 = vshll.u32 %v4340_v7, 16 }
 0x16b   : > { %v1289_v39 = vadd.f32 %v1238_v37, %v1005_v54  ;;  %v1734_v54 = vrot.slane %v5022_v15, 1 }
 0x16c   : > { %1833 = vmatmul.bf16.gmra.mxu1 %v1733_v3  ;;  %2740 = vmatmul.bf16.gmra.mxu0 %v2640_v56  ;;  %v1006_v6 = vadd.f32 %v957_v17, %v766_v22  ;;  %v2352_v17 = vor.u32 %v2350_v28, %v2348_v48  ;;  %v2356_v37 = vrot.slane %v2354_v8, 1  ;;  %v4341_v48 = vld [vmem:[#allocation2 + $0x30] sm:$0xff]  ;;  %v1736_v8 = vrot.slane %v5039_v35, 1 }
 0x16d   : > { %v5298_v58 = vadd.f32 %v1642_v63, %v1289_v39  ;;  %v1735_v22 = vsel %vm821_vm1, %v1732_v50, %v1734_v54 }
 0x16e   : > { %v2357_v19 = vsel %vm401_vm0, %v2352_v17, %v2356_v37 }
 0x16f   : > { %2521 = vmatmul.bf16.gmra.mxu3 %v2349_v40  ;;  %2127 = vmatmul.bf16.gmra.mxu2 %v4319_v26  ;;  %v2642_v40 = vsel %vm821_vm1, %v2639_v52, %v2641_v18 }
 0x171   : > { %v767_v20 = vpop.f32.mrf.mxu1  ;;  %v1647_v1 = vpop.f32.mrf.mxu0 }
 0x172   : > { %v1241_v5 = vpop.f32.mrf.mxu3  ;;  %v768_v4 = vadd.f32 %v767_v20, %v5170_v32  ;;  %v967_v44 = vpop.f32.mrf.mxu2  ;;  %v2358_v20 = vshrl.u32 %v4340_v7, 16 }
 0x173   : > { %v1290_v53 = vadd.f32 %v1241_v5, %v1006_v6 }
 0x174   : > { %v1007_v63 = vadd.f32 %v959_v33, %v768_v4  ;;  %v4320_v33 = vld [vmem:[#allocation2 + $0x30] sm:$0xff] }
 0x175   : > { %v5301_v47 = vadd.f32 %v1645_v2, %v1290_v53 }
 0x179   : > { %v770_v3 = vpop.f32.mrf.mxu1  ;;  %v1650_v56 = vpop.f32.mrf.mxu0 }
 0x17a   : > { %v1243_v39 = vpop.f32.mrf.mxu3  ;;  %v771_v32 = vadd.f32 %v770_v3, %v5085_v9  ;;  %v969_v2 = vpop.f32.mrf.mxu2  ;;  %v2362_v9 = vshll.u32 %v4341_v48, 16 }
 0x17b   : > { %v1291_v12 = vadd.f32 %v1243_v39, %v1007_v63  ;;  %v2643_v63 = vrot.slane %v4341_v48, 1 }
 0x17c   : > { %1838 = vmatmul.bf16.gmra.mxu1 %v1735_v22  ;;  %2745 = vmatmul.bf16.gmra.mxu0 %v2642_v40  ;;  %v1008_v15 = vadd.f32 %v962_v21, %v771_v32  ;;  %v2360_v21 = vor.u32 %v2358_v20, %v2356_v37  ;;  %v2364_v17 = vrot.slane %v2362_v9, 1  ;;  %v1737_v40 = vsel %vm821_vm1, %v1734_v54, %v1736_v8  ;;  %v4342_v37 = vld [vmem:[#allocation2 + $0x38] sm:$0xff] }
 0x17d   : > { %v5308_v6 = vadd.f32 %v1647_v1, %v1291_v12  ;;  %v2644_v32 = vsel %vm821_vm1, %v2641_v18, %v2643_v63  ;;  %v1738_v20 = vrot.slane %v5050_v46, 1  ;;  %v2645_v9 = vrot.slane %v4342_v37, 1 }
 0x17e   : > { %v2365_v7 = vsel %vm401_vm0, %v2360_v21, %v2364_v17 }
 0x17f   : > { %2526 = vmatmul.bf16.gmra.mxu3 %v2357_v19  ;;  %2132 = vmatmul.bf16.gmra.mxu2 %v4320_v33 }
 0x181   : > { %v772_v53 = vpop.f32.mrf.mxu1  ;;  %v1652_v50 = vpop.f32.mrf.mxu0 }
 0x182   : > { %v1246_v26 = vpop.f32.mrf.mxu3  ;;  %v773_v52 = vadd.f32 %v772_v53, %v5098_v23  ;;  %v972_v4 = vpop.f32.mrf.mxu2 }
 0x183   : > { %v1292_v5 = vadd.f32 %v1246_v26, %v1008_v15 }
 0x184   : > { %v1009_v1 = vadd.f32 %v964_v30, %v773_v52  ;;  %v4321_v30 = vld [vmem:[#allocation2 + $0x38] sm:$0xff] }
 0x185   : > { %v5311_v28 = vadd.f32 %v1650_v56, %v1292_v5  ;;  %v2366_v5 = vshrl.u32 %v4341_v48, 16 }
 0x189   : > { %v775_v3 = vpop.f32.mrf.mxu1  ;;  %v1655_v22 = vpop.f32.mrf.mxu0 }
 0x18a   : > { %v1248_v39 = vpop.f32.mrf.mxu3  ;;  %v776_v23 = vadd.f32 %v775_v3, %v5121_v38  ;;  %v974_v56 = vpop.f32.mrf.mxu2  ;;  %v2370_v38 = vshll.u32 %v4342_v37, 16 }
 0x18b   : > { %v1293_v12 = vadd.f32 %v1248_v39, %v1009_v1 }
 0x18c   : > { %1843 = vmatmul.bf16.gmra.mxu1 %v1737_v40  ;;  %2750 = vmatmul.bf16.gmra.mxu0 %v2644_v32  ;;  %v1010_v35 = vadd.f32 %v967_v44, %v776_v23  ;;  %v2368_v44 = vor.u32 %v2366_v5, %v2364_v17  ;;  %v2372_v1 = vrot.slane %v2370_v38, 1  ;;  %v1739_v40 = vsel %vm821_vm1, %v1736_v8, %v1738_v20  ;;  %v4343_v17 = vld [vmem:[#allocation2 + $0x40] sm:$0xff] }
 0x18d   : > { %v5318_v19 = vadd.f32 %v1652_v50, %v1293_v12  ;;  %v2646_v32 = vsel %vm821_vm1, %v2643_v63, %v2645_v9  ;;  %v2647_v5 = vrot.slane %v4343_v17, 1 }
 0x18e   : > { %v2373_v48 = vsel %vm401_vm0, %v2368_v44, %v2372_v1 }
 0x18f   : > { %2531 = vmatmul.bf16.gmra.mxu3 %v2365_v7  ;;  %2137 = vmatmul.bf16.gmra.mxu2 %v4321_v30 }
 0x191   : > { %v777_v26 = vpop.f32.mrf.mxu1  ;;  %v1657_v54 = vpop.f32.mrf.mxu0 }
 0x192   : > { %v1251_v15 = vpop.f32.mrf.mxu3  ;;  %v778_v18 = vadd.f32 %v777_v26, %v5131_v51  ;;  %v977_v53 = vpop.f32.mrf.mxu2 }
 0x193   : > { %v1294_v33 = vadd.f32 %v1251_v15, %v1010_v35  ;;  %v2374_v15 = vshrl.u32 %v4342_v37, 16 }
 0x194   : > { %v1011_v50 = vadd.f32 %v969_v2, %v778_v18  ;;  %v4322_v2 = vld [vmem:[#allocation2 + $0x40] sm:$0xff]  ;;  %v1740_v18 = vrot.slane %v5074_v62, 1 }
 0x195   : > { %v5321_v52 = vadd.f32 %v1655_v22, %v1294_v33 }
 0x199   : > { %v780_v12 = vpop.f32.mrf.mxu1  ;;  %v1660_v3 = vpop.f32.mrf.mxu0 }
 0x19a   : > { %v1253_v21 = vpop.f32.mrf.mxu3  ;;  %v781_v51 = vadd.f32 %v780_v12, %v5077_v0  ;;  %v979_v22 = vpop.f32.mrf.mxu2  ;;  %v2378_v0 = vshll.u32 %v4343_v17, 16  ;;  %v1741_v12 = vsel %vm821_vm1, %v1738_v20, %v1740_v18 }
 0x19b   : > { %v1295_v39 = vadd.f32 %v1253_v21, %v1011_v50 }
 0x19c   : > { %1848 = vmatmul.bf16.gmra.mxu1 %v1739_v40  ;;  %2755 = vmatmul.bf16.gmra.mxu0 %v2646_v32  ;;  %v1012_v46 = vadd.f32 %v972_v4, %v781_v51  ;;  %v2376_v4 = vor.u32 %v2374_v15, %v2372_v1  ;;  %v2380_v38 = vrot.slane %v2378_v0, 1  ;;  %v2648_v40 = vsel %vm821_vm1, %v2645_v9, %v2647_v5  ;;  %v4344_v1 = vld [vmem:[#allocation2 + $0x48] sm:$0xff] }
 0x19d   : > { %v5328_v23 = vadd.f32 %v1657_v54, %v1295_v39 }
 0x19e   : > { %v2381_v37 = vsel %vm401_vm0, %v2376_v4, %v2380_v38 }
 0x19f   : > { %2536 = vmatmul.bf16.gmra.mxu3 %v2373_v48  ;;  %2142 = vmatmul.bf16.gmra.mxu2 %v4322_v2  ;;  %v2382_v2 = vshrl.u32 %v4343_v17, 16 }
 0x1a1   : > { %v782_v30 = vpop.f32.mrf.mxu1  ;;  %v1662_v8 = vpop.f32.mrf.mxu0 }
 0x1a2   : > { %v1256_v7 = vpop.f32.mrf.mxu3  ;;  %v783_v63 = vadd.f32 %v782_v30, %v5087_v11  ;;  %v982_v33 = vpop.f32.mrf.mxu2 }
 0x1a3   : > { %v1296_v35 = vadd.f32 %v1256_v7, %v1012_v46 }
 0x1a4   : > { %v1013_v54 = vadd.f32 %v974_v56, %v783_v63  ;;  %v4323_v56 = vld [vmem:[#allocation2 + $0x48] sm:$0xff]  ;;  %v2649_v63 = vrot.slane %v4344_v1, 1 }
 0x1a5   : > { %v5331_v26 = vadd.f32 %v1660_v3, %v1296_v35 }
 0x1a9   : > { %v785_v21 = vpop.f32.mrf.mxu1  ;;  %v1665_v39 = vpop.f32.mrf.mxu0 }
 0x1aa   : > { %v1258_v50 = vpop.f32.mrf.mxu3  ;;  %v786_v11 = vadd.f32 %v785_v21, %v5110_v29  ;;  %v984_v3 = vpop.f32.mrf.mxu2  ;;  %v2386_v29 = vshll.u32 %v4344_v1, 16  ;;  %v2650_v21 = vsel %vm821_vm1, %v2647_v5, %v2649_v63 }
 0x1ab   : > { %v1297_v44 = vadd.f32 %v1258_v50, %v1013_v54 }
 0x1ac   : > { %1853 = vmatmul.bf16.gmra.mxu1 %v1741_v12  ;;  %2760 = vmatmul.bf16.gmra.mxu0 %v2648_v40  ;;  %v1014_v62 = vadd.f32 %v977_v53, %v786_v11  ;;  %v2384_v53 = vor.u32 %v2382_v2, %v2380_v38  ;;  %v2388_v15 = vrot.slane %v2386_v29, 1  ;;  %v4345_v38 = vld [vmem:[#allocation2 + $0x50] sm:$0xff] }
 0x1ad   : > { %v5338_v32 = vadd.f32 %v1662_v8, %v1297_v44  ;;  %v1742_v8 = vrot.slane %v5101_v24, 1 }
 0x1ae   : > { %v2389_v17 = vsel %vm401_vm0, %v2384_v53, %v2388_v15 }
 0x1af   : > { %2541 = vmatmul.bf16.gmra.mxu3 %v2381_v37  ;;  %2147 = vmatmul.bf16.gmra.mxu2 %v4323_v56  ;;  %v1743_v44 = vsel %vm821_vm1, %v1740_v18, %v1742_v8  ;;  %v2390_v56 = vshrl.u32 %v4344_v1, 16  ;;  %v5692_v1 = vld [vmem:[#allocation7_spill] sm:$0xff] }
 0x1b1   : > { %v787_v46 = vpop.f32.mrf.mxu1  ;;  %v1667_v20 = vpop.f32.mrf.mxu0  ;;  %v2392_v2 = vor.u32 %v2390_v56, %v2388_v15  ;;  %v4325_v15 = vld [vmem:[#allocation2 + $0x58] sm:$0xff] }
 0x1b2   : > { %v1261_v51 = vpop.f32.mrf.mxu3  ;;  %v788_v9 = vadd.f32 %v787_v46, %v5123_v42  ;;  %v987_v7 = vpop.f32.mrf.mxu2 }
 0x1b3   : > { %v1298_v48 = vadd.f32 %v1261_v51, %v1014_v62  ;;  %v5690_v62 = vld [vmem:[#allocation5_spill] sm:$0xff] }
 0x1b4   : > { %v1015_v30 = vadd.f32 %v979_v22, %v788_v9  ;;  %v4324_v22 = vld [vmem:[#allocation2 + $0x50] sm:$0xff] }
 0x1b5   : > { %v5341_v35 = vadd.f32 %v1665_v39, %v1298_v48 }
 0x1b9   : > { %v790_v4 = vpop.f32.mrf.mxu1  ;;  %v1670_v50 = vpop.f32.mrf.mxu0 }
 0x1ba   : > { %v1263_v0 = vpop.f32.mrf.mxu3  ;;  %v791_v42 = vadd.f32 %v790_v4, %v5137_v49  ;;  %v989_v39 = vpop.f32.mrf.mxu2  ;;  %v2394_v49 = vshll.u32 %v4345_v38, 16 }
 0x1bb   : > { %v1299_v54 = vadd.f32 %v1263_v0, %v1015_v30 }
 0x1bc   : > { %1858 = vmatmul.bf16.gmra.mxu1 %v1743_v44  ;;  %2765 = vmatmul.bf16.gmra.mxu0 %v2650_v21  ;;  %v1016_v24 = vadd.f32 %v982_v33, %v791_v42  ;;  %v2651_v33 = vrot.slane %v4345_v38, 1  ;;  %v2396_v29 = vrot.slane %v2394_v49, 1 }
 0x1bd   : > { %v5348_v12 = vadd.f32 %v1667_v20, %v1299_v54  ;;  %v5691_v20 = vld [vmem:[#allocation4_spill] sm:$0xff] }
 0x1be   : > { %v1744_v9 = vrot.slane %v5691_v20, 1  ;;  %v2652_v44 = vsel %vm821_vm1, %v2649_v63, %v2651_v33  ;;  %v2397_v42 = vsel %vm401_vm0, %v2392_v2, %v2396_v29 }
 0x1bf   : > { %2546 = vmatmul.bf16.gmra.mxu3 %v2389_v17  ;;  %2152 = vmatmul.bf16.gmra.mxu2 %v4324_v22 }
 0x1c0   : > { %v1745_v4 = vsel %vm821_vm1, %v1742_v8, %v1744_v9 }
 0x1c1   : > { %v792_v37 = vpop.f32.mrf.mxu1  ;;  %v1672_v18 = vpop.f32.mrf.mxu0 }
 0x1c2   : > { %v1266_v40 = vpop.f32.mrf.mxu3  ;;  %v793_v5 = vadd.f32 %v792_v37, %v5690_v62  ;;  %v5351_v51 = vpop.f32.mrf.mxu2  ;;  %v5693_v37 = vld [vmem:[#allocation8_spill] sm:$0xff]  ;;  %v2398_v62 = vshrl.u32 %v4345_v38, 16 }
 0x1c3   : > { %v1300_v11 = vadd.f32 %v1266_v40, %v1016_v24  ;;  %v4346_v24 = vld [vmem:[#allocation2 + $0x58] sm:$0xff] }
 0x1c4   : > { %v1017_v46 = vadd.f32 %v984_v3, %v793_v5  ;;  %v2402_v5 = vshll.u32 %v4346_v24, 16  ;;  %v2400_v2 = vor.u32 %v2398_v62, %v2396_v29 }
 0x1c5   : > { %v5353_v48 = vadd.f32 %v1670_v50, %v1300_v11 }
 0x1c9   : > { %v795_v0 = vpop.f32.mrf.mxu1  ;;  %v1675_v54 = vpop.f32.mrf.mxu0 }
 0x1ca   : > { %v1268_v30 = vpop.f32.mrf.mxu3  ;;  %v796_v21 = vadd.f32 %v795_v0, %v5692_v1  ;;  %v2115_v50 = vpop.f32.mrf.mxu2 }
 0x1cb   : > { %v1301_v53 = vadd.f32 %v1268_v30, %v1017_v46  ;;  %v5694_v46 = vld [vmem:[#allocation6_spill] sm:$0xff]  ;;  %v2404_v30 = vrot.slane %v2402_v5, 1 }
 0x1cc   : > { %1863 = vmatmul.bf16.gmra.mxu1 %v1745_v4  ;;  %2770 = vmatmul.bf16.gmra.mxu0 %v2652_v44  ;;  %v1018_v3 = vadd.f32 %v987_v7, %v796_v21  ;;  %v1746_v20 = vrot.slane %v5694_v46, 1  ;;  %v2653_v7 = vrot.slane %v4346_v24, 1 }
 0x1cd   : > { %v5360_v17 = vadd.f32 %v1672_v18, %v1301_v53  ;;  %v2405_v38 = vsel %vm401_vm0, %v2400_v2, %v2404_v30 }
 0x1ce   : > { %v1747_v1 = vsel %vm821_vm1, %v1744_v9, %v1746_v20  ;;  %v2654_v21 = vsel %vm821_vm1, %v2651_v33, %v2653_v7 }
 0x1cf   : > { %2551 = vmatmul.bf16.gmra.mxu3 %v2397_v42  ;;  %2157 = vmatmul.bf16.gmra.mxu2 %v4325_v15  ;;  %v2890_v42 = vlaneseq  ;;  %v5377_v15 = vld [vmem:[#allocation2 + $0x60] sm:$0xff] }
 0x1d0   : > { %v2655_v2 = vrot.slane %v5377_v15, 1 }
 0x1d1   : > { %v797_v11 = vpop.f32.mrf.mxu1  ;;  %v1677_v8 = vpop.f32.mrf.mxu0  ;;  %v5375_v29 = vshrl.u32 %v2890_v42, 7 }
 0x1d2   : > { %v1271_v22 = vpop.f32.mrf.mxu3  ;;  %v798_v63 = vadd.f32 %v797_v11, %v5693_v37  ;;  %v5363_v56 = vpop.f32.mrf.mxu2  ;;  %v2406_v37 = vshrl.u32 %v4346_v24, 16 }
 0x1d3   : > { %v1302_v40 = vadd.f32 %v1271_v22, %v1018_v3  ;;  %v2892_v11 = vadd.s32 8, %v5375_v29 }
 0x1d4   : > { %v1019_v18 = vadd.f32 %v989_v39, %v798_v63  ;;  %v4326_v39 = vld [vmem:[#allocation2 + $0x60] sm:$0xff] }
 0x1d5   : > { %v5365_v49 = vadd.f32 %v1675_v54, %v1302_v40 }
 0x1d9   : > { %v1829_v4 = vpop.f32.mrf.mxu1  ;;  %v2736_v44 = vpop.f32.mrf.mxu0 }
 0x1da   : > { %v1273_v53 = vpop.f32.mrf.mxu3  ;;  %v5371_v3 = vpop.f32.mrf.mxu2  ;;  %v1899_v22 = vadd.f32 %v1829_v4, %v5198_v34 }
 0x1db   : > { %v1303_v0 = vadd.f32 %v1273_v53, %v1019_v18  ;;  %v5695_v18 = vld [vmem:[#allocation9_spill] sm:$0xff]  ;;  %v2920_v53 = vand.u32 15, %v2892_v11 }
 0x1dc   : > { %1868 = vmatmul.bf16.gmra.mxu1 %v1747_v1  ;;  %2775 = vmatmul.bf16.gmra.mxu0 %v2654_v21  ;;  %v2183_v5 = vadd.f32 %v5351_v51, %v1899_v22  ;;  %v1748_v46 = vrot.slane %v5695_v18, 1  ;;  %v4327_v11 = vld [vmem:[#allocation2 + $0x68] sm:$0xff] }
 0x1dd   : > { %v5373_v54 = vadd.f32 %v1677_v8, %v1303_v0  ;;  %v2410_v8 = vshll.u32 %v5377_v15, 16  ;;  %v2408_v0 = vor.u32 %v2406_v37, %v2404_v30  ;;  %vm5390_vm2 = vcmp.lt.s32.totalorder %v2920_v53, 14 }
 0x1df   : > { %2556 = vmatmul.bf16.gmra.mxu3 %v2405_v38  ;;  %2162 = vmatmul.bf16.gmra.mxu2 %v4326_v39  ;;  %v2412_v4 = vrot.slane %v2410_v8, 1  ;;  %v1749_v39 = vsel %vm821_vm1, %v1746_v20, %v1748_v46 }
 0x1e1   : > { %v1831_v33 = vpop.f32.mrf.mxu1  ;;  %v2738_v40 = vpop.f32.mrf.mxu0  ;;  %v2413_v22 = vsel %vm401_vm0, %v2408_v0, %v2412_v4 }
 0x1e2   : > { %v2517_v9 = vpop.f32.mrf.mxu3  ;;  %v1900_v63 = vadd.f32 %v1831_v33, %v5203_v36  ;;  %v5383_v62 = vpop.f32.mrf.mxu2  ;;  %v2656_v36 = vsel %vm821_vm1, %v2653_v7, %v2655_v2 }
 0x1e3   : > { %v2587_v34 = vadd.f32 %v2517_v9, %v2183_v5  ;;  %v232_v5 = vld [vmem:[%s4741_s30 + $0x7c] sm:$0xf] }
 0x1e4   : > { %v2184_v1 = vadd.f32 %v2115_v50, %v1900_v63  ;;  %v5400_v63 = vld [vmem:[#allocation2 + $0x68] sm:$0xff]  ;;  %264 = vst [vmem:[#allocation2 + $0x7c] sm:$0xf] %v232_v5 }
 0x1e5   : > { %v2806_v33 = vadd.f32 %v2736_v44, %v2587_v34 }
 0x1e7   : > { %v3096_v37 = vmul.f32 %v2806_v33, %v2806_v33 }
 0x1e9   : > { %v1834_v24 = vpop.f32.mrf.mxu1  ;;  %v2741_v42 = vpop.f32.mrf.mxu0 }
 0x1ea   : > { %v2519_v21 = vpop.f32.mrf.mxu3  ;;  %v1901_v50 = vadd.f32 %v1834_v24, %v5216_v41  ;;  %v5396_v9 = vpop.f32.mrf.mxu2  ;;  %v2418_v24 = vshll.u32 %v5400_v63, 16 }
 0x1eb   : > { %v2588_v38 = vadd.f32 %v2519_v21, %v2184_v1  ;;  %v2894_v21 = vadd.s32 24, %v5375_v29 }
 0x1ec   : > { %1873 = vmatmul.bf16.gmra.mxu1 %v1749_v39  ;;  %2780 = vmatmul.bf16.gmra.mxu0 %v2656_v36 }
 0x1ed   : > { %v2807_v30 = vadd.f32 %v2738_v40, %v2588_v38  ;;  %v2185_v40 = vadd.f32 %v5363_v56, %v1901_v50  ;;  %v2414_v38 = vshrl.u32 %v5377_v15, 16  ;;  %v2922_v50 = vand.u32 15, %v2894_v21  ;;  %v5428_v21 = vld [vmem:[#allocation2 + $0x70] sm:$0xff] }
 0x1ef   : > { %v4383_v20 = vpack.c.bf16 %v2807_v30, %v2806_v33  ;;  %v3033_v7 = vsel %vm5390_vm2, %v2807_v30, 0.0  ;;  %v3097_v44 = vmul.f32 %v2807_v30, %v2807_v30  ;;  %2561 = vmatmul.bf16.gmra.mxu3 %v2413_v22  ;;  %2167 = vmatmul.bf16.gmra.mxu2 %v4327_v11  ;;  %v1750_v22 = vrot.slane %v5206_v45, 1 }
 0x1f0   : > { %v3060_v8 = vadd.f32 %v3033_v7, %v2806_v33  ;;  %v2657_v30 = vrot.slane %v5400_v63, 1  ;;  %v2416_v11 = vor.u32 %v2414_v38, %v2412_v4  ;;  %vm5418_vm3 = vcmp.lt.s32.totalorder %v2922_v50, 14 }
 0x1f1   : > { %4384 = vst [vmem:[%s4743_s5] sm:$0xff] %v4383_v20   ;;  %v3125_v41 = vsel %vm5390_vm2, %v3097_v44, 0.0  ;;  %v1836_v0 = vpop.f32.mrf.mxu1  ;;  %v2743_v1 = vpop.f32.mrf.mxu0  ;;  %v2420_v20 = vrot.slane %v2418_v24, 1  ;;  %v2896_v50 = vadd.s32 40, %v5375_v29 }
 0x1f2   : > { %v2522_v18 = vpop.f32.mrf.mxu3  ;;  %v3152_v34 = vadd.f32 %v3125_v41, %v3096_v37  ;;  %v1902_v36 = vadd.f32 %v1836_v0, %v5221_v16  ;;  %v5411_v33 = vpop.f32.mrf.mxu2  ;;  %v1751_v16 = vsel %vm821_vm1, %v1748_v46, %v1750_v22  ;;  %v2658_v41 = vsel %vm821_vm1, %v2655_v2, %v2657_v30 }
 0x1f3   : > { %v2589_v53 = vadd.f32 %v2522_v18, %v2185_v40  ;;  %v2421_v45 = vsel %vm401_vm0, %v2416_v11, %v2420_v20  ;;  %v2422_v11 = vshrl.u32 %v5400_v63, 16 }
 0x1f4   : > { %v2186_v44 = vadd.f32 %v5371_v3, %v1902_v36  ;;  %v4328_v3 = vld [vmem:[#allocation2 + $0x70] sm:$0xff] }
 0x1f5   : > { %v2808_v39 = vadd.f32 %v2741_v42, %v2589_v53 }
 0x1f7   : > { %v3061_v51 = vadd.f32 %v3060_v8, %v2808_v39  ;;  %v3098_v56 = vmul.f32 %v2808_v39, %v2808_v39  ;;  %v2424_v8 = vor.u32 %v2422_v11, %v2420_v20 }
 0x1f9   : > { %v3153_v7 = vadd.f32 %v3152_v34, %v3098_v56  ;;  %v1839_v5 = vpop.f32.mrf.mxu1  ;;  %v2746_v42 = vpop.f32.mrf.mxu0  ;;  %v4685_v34 = vmov 0  }
 0x1fa   : > { %v2524_v15 = vpop.f32.mrf.mxu3  ;;  %v1903_v40 = vadd.f32 %v1839_v5, %v5239_v60  ;;  %v5424_v18 = vpop.f32.mrf.mxu2  ;;  %265 = vst [vmem:[#allocation2 + $0x80] sm:$0xf] %v4685_v34 }
 0x1fb   : > { %v2590_v37 = vadd.f32 %v2524_v15, %v2186_v44 }
 0x1fc   : > { %1878 = vmatmul.bf16.gmra.mxu1 %v1751_v16  ;;  %2785 = vmatmul.bf16.gmra.mxu0 %v2658_v41  ;;  %v2924_v41 = vand.u32 15, %v2896_v50 }
 0x1fd   : > { %v2809_v4 = vadd.f32 %v2743_v1, %v2590_v37  ;;  %v2187_v1 = vadd.f32 %v5383_v62, %v1903_v40  ;;  %v1752_v62 = vrot.slane %v5224_v10, 1 }
 0x1fe   : > { %vm5445_vm4 = vcmp.lt.s32.totalorder %v2924_v41, 14 }
 0x1ff   : > { %v4388_v46 = vpack.c.bf16 %v2809_v4, %v2808_v39  ;;  %v3035_v2 = vsel %vm5418_vm3, %v2809_v4, 0.0  ;;  %v3099_v53 = vmul.f32 %v2809_v4, %v2809_v4  ;;  %2566 = vmatmul.bf16.gmra.mxu3 %v2421_v45  ;;  %2172 = vmatmul.bf16.gmra.mxu2 %v4328_v3 }
 0x200   : > { %v3062_v0 = vadd.f32 %v3061_v51, %v3035_v2  ;;  %v2426_v51 = vshll.u32 %v5428_v21, 16 }
 0x201   : > { %4461 = vst [vmem:[%s4743_s5 + $0x8] sm:$0xff] %v4388_v46   ;;  %v3127_v60 = vsel %vm5418_vm3, %v3099_v53, 0.0  ;;  %v1841_v56 = vpop.f32.mrf.mxu1  ;;  %v2748_v39 = vpop.f32.mrf.mxu0 }
 0x202   : > { %v2527_v38 = vpop.f32.mrf.mxu3  ;;  %v3154_v24 = vadd.f32 %v3153_v7, %v3127_v60  ;;  %v1904_v15 = vadd.f32 %v1841_v56, %v5247_v57  ;;  %v5438_v37 = vpop.f32.mrf.mxu2  ;;  %v2659_v7 = vrot.slane %v5428_v21, 1  ;;  %v2428_v45 = vrot.slane %v2426_v51, 1 }
 0x203   : > { %v2591_v36 = vadd.f32 %v2527_v38, %v2187_v1  ;;  %v1753_v57 = vsel %vm821_vm1, %v1750_v22, %v1752_v62  ;;  %v5455_v38 = vld [vmem:[#allocation2 + $0x78] sm:$0xff]  ;;  %v2898_v51 = vadd.s32 56, %v5375_v29 }
 0x204   : > { %v2188_v40 = vadd.f32 %v5396_v9, %v1904_v15  ;;  %v2660_v46 = vsel %vm821_vm1, %v2657_v30, %v2659_v7  ;;  %v2429_v10 = vsel %vm401_vm0, %v2424_v8, %v2428_v45  ;;  %v4329_v9 = vld [vmem:[#allocation2 + $0x78] sm:$0xff]  ;;  %v2434_v15 = vshll.u32 %v5455_v38, 16 }
 0x205   : > { %v2810_v44 = vadd.f32 %v2746_v42, %v2591_v36 }
 0x207   : > { %v3063_v5 = vadd.f32 %v3062_v0, %v2810_v44  ;;  %v3100_v16 = vmul.f32 %v2810_v44, %v2810_v44 }
 0x209   : > { %v3155_v4 = vadd.f32 %v3154_v24, %v3100_v16  ;;  %v1844_v34 = vpop.f32.mrf.mxu1  ;;  %v2751_v42 = vpop.f32.mrf.mxu0 }
 0x20a   : > { %v2529_v63 = vpop.f32.mrf.mxu3  ;;  %v1905_v53 = vadd.f32 %v1844_v34, %v5256_v25  ;;  %v5451_v0 = vpop.f32.mrf.mxu2  ;;  %v2436_v34 = vrot.slane %v2434_v15, 1 }
 0x20b   : > { %v2592_v3 = vadd.f32 %v2529_v63, %v2188_v40  ;;  %v2926_v63 = vand.u32 15, %v2898_v51  ;;  %v2900_v51 = vadd.s32 72, %v5375_v29 }
 0x20c   : > { %1883 = vmatmul.bf16.gmra.mxu1 %v1753_v57  ;;  %2790 = vmatmul.bf16.gmra.mxu0 %v2660_v46  ;;  %v2189_v25 = vadd.f32 %v5411_v33, %v1905_v53  ;;  %v1754_v33 = vrot.slane %v5250_v43, 1 }
 0x20d   : > { %v2811_v20 = vadd.f32 %v2748_v39, %v2592_v3  ;;  %vm5472_vm5 = vcmp.lt.s32.totalorder %v2926_v63, 14 }
 0x20f   : > { %v4393_v60 = vpack.c.bf16 %v2811_v20, %v2810_v44  ;;  %v3037_v22 = vsel %vm5445_vm4, %v2811_v20, 0.0  ;;  %v3101_v1 = vmul.f32 %v2811_v20, %v2811_v20  ;;  %2571 = vmatmul.bf16.gmra.mxu3 %v2429_v10  ;;  %2177 = vmatmul.bf16.gmra.mxu2 %v4329_v9  ;;  %v2430_v44 = vshrl.u32 %v5428_v21, 16  ;;  %v2239_v21 = vld [vmem:[#allocation2 + $0x80] sm:$0x1] }
 0x210   : > { %v3064_v30 = vadd.f32 %v3063_v5, %v3037_v22  ;;  %v2314_v9 = vunpack.c.l.b16 %v2239_v21 }
 0x211   : > { %4462 = vst [vmem:[%s4743_s5 + $0x10] sm:$0xff] %v4393_v60   ;;  %v3129_v24 = vsel %vm5445_vm4, %v3101_v1, 0.0  ;;  %v1846_v50 = vpop.f32.mrf.mxu1  ;;  %v2753_v11 = vpop.f32.mrf.mxu0  ;;  %v2432_v3 = vor.u32 %v2430_v44, %v2428_v45  ;;  %v2438_v44 = vshrl.u32 %v5455_v38, 16 }
 0x212   : > { %v3156_v36 = vadd.f32 %v3155_v4, %v3129_v24  ;;  %v2532_v56 = vpop.f32.mrf.mxu3  ;;  %v1906_v16 = vadd.f32 %v1846_v50, %v5260_v27  ;;  %v5465_v41 = vpop.f32.mrf.mxu2  ;;  %v2661_v4 = vrot.slane %v5455_v38, 1  ;;  %v1755_v27 = vsel %vm821_vm1, %v1752_v62, %v1754_v33 }
 0x213   : > { %v2593_v39 = vadd.f32 %v2532_v56, %v2189_v25  ;;  %v2437_v45 = vsel %vm401_vm0, %v2432_v3, %v2436_v34  ;;  %v2329_v24 = vpack.c.b16 %v2314_v9, %v2314_v9  ;;  %v1756_v3 = vrot.slane %v5263_v14, 1 }
 0x214   : > { %v2190_v46 = vadd.f32 %v5424_v18, %v1906_v16  ;;  %v2662_v53 = vsel %vm821_vm1, %v2659_v7, %v2661_v4 }
 0x215   : > { %v2812_v5 = vadd.f32 %v2751_v42, %v2593_v39  ;;  %v2442_v15 = vshll.u32 %v2329_v24, 16 }
 0x217   : > { %v3065_v8 = vadd.f32 %v3064_v30, %v2812_v5  ;;  %v3102_v40 = vmul.f32 %v2812_v5, %v2812_v5  ;;  %v2444_v21 = vrot.slane %v2442_v15, 1 }
 0x219   : > { %v3157_v57 = vadd.f32 %v3156_v36, %v3102_v40  ;;  %v1849_v42 = vpop.f32.mrf.mxu1  ;;  %v2756_v20 = vpop.f32.mrf.mxu0 }
 0x21a   : > { %v2534_v2 = vpop.f32.mrf.mxu3  ;;  %v1907_v18 = vadd.f32 %v1849_v42, %v5268_v59  ;;  %v5478_v22 = vpop.f32.mrf.mxu2 }
 0x21b   : > { %v2594_v10 = vadd.f32 %v2534_v2, %v2190_v46  ;;  %v2663_v46 = vrot.slane %v2329_v24, 1 }
 0x21c   : > { %1888 = vmatmul.bf16.gmra.mxu1 %v1755_v27  ;;  %2795 = vmatmul.bf16.gmra.mxu0 %v2662_v53  ;;  %v2191_v36 = vadd.f32 %v5438_v37, %v1907_v18  ;;  %v2928_v37 = vand.u32 15, %v2900_v51 }
 0x21d   : > { %v2813_v60 = vadd.f32 %v2753_v11, %v2594_v10 }
 0x21e   : > { %vm2956_vm6 = vcmp.lt.s32.totalorder %v2928_v37, 14 }
 0x21f   : > { %v4398_v1 = vpack.c.bf16 %v2813_v60, %v2812_v5  ;;  %v3039_v62 = vsel %vm5472_vm5, %v2813_v60, 0.0  ;;  %v3103_v30 = vmul.f32 %v2813_v60, %v2813_v60  ;;  %2576 = vmatmul.bf16.gmra.mxu3 %v2437_v45 }
 0x220   : > { %v3066_v7 = vadd.f32 %v3065_v8, %v3039_v62 }
 0x221   : > { %4463 = vst [vmem:[%s4743_s5 + $0x18] sm:$0xff] %v4398_v1   ;;  %v3131_v25 = vsel %vm5472_vm5, %v3103_v30, 0.0  ;;  %v1851_v50 = vpop.f32.mrf.mxu1  ;;  %v2758_v11 = vpop.f32.mrf.mxu0 }
 0x222   : > { %v3158_v56 = vadd.f32 %v3157_v57, %v3131_v25  ;;  %v2537_v59 = vpop.f32.mrf.mxu3  ;;  %v1908_v16 = vadd.f32 %v1851_v50, %v5272_v31  ;;  %v2143_v8 = vpop.f32.mrf.mxu2  ;;  %v2440_v57 = vor.u32 %v2438_v44, %v2436_v34  ;;  %v2664_v31 = vsel %vm821_vm1, %v2661_v4, %v2663_v46 }
 0x223   : > { %v2595_v39 = vadd.f32 %v2537_v59, %v2191_v36  ;;  %v2902_v25 = vadd.s32 88, %v5375_v29 }
 0x224   : > { %v2192_v10 = vadd.f32 %v5451_v0, %v1908_v16  ;;  %v2445_v43 = vsel %vm401_vm0, %v2440_v57, %v2444_v21 }
 0x225   : > { %v2814_v5 = vadd.f32 %v2756_v20, %v2595_v39  ;;  %v1757_v20 = vsel %vm821_vm1, %v1754_v33, %v1756_v3  ;;  %v2930_v50 = vand.u32 15, %v2902_v25 }
 0x227   : > { %v3067_v40 = vadd.f32 %v3066_v7, %v2814_v5  ;;  %v3104_v63 = vmul.f32 %v2814_v5, %v2814_v5  ;;  %vm2958_vm7 = vcmp.lt.s32.totalorder %v2930_v50, 14 }
 0x229   : > { %v3159_v2 = vadd.f32 %v3158_v56, %v3104_v63  ;;  %v1854_v53 = vpop.f32.mrf.mxu1  ;;  %v2761_v38 = vpop.f32.mrf.mxu0 }
 0x22a   : > { %v2539_v42 = vpop.f32.mrf.mxu3  ;;  %v1909_v45 = vadd.f32 %v1854_v53, %v5279_v61  ;;  %v2145_v34 = vpop.f32.mrf.mxu2  ;;  %v2904_v53 = vadd.s32 104, %v5375_v29 }
 0x22b   : > { %v2596_v27 = vadd.f32 %v2539_v42, %v2192_v10 }
 0x22c   : > { %1893 = vmatmul.bf16.gmra.mxu1 %v1757_v20  ;;  %2800 = vmatmul.bf16.gmra.mxu0 %v2664_v31  ;;  %v2193_v33 = vadd.f32 %v5465_v41, %v1909_v45 }
 0x22d   : > { %v2815_v14 = vadd.f32 %v2758_v11, %v2596_v27 }
 0x22f   : > { %v4403_v9 = vpack.c.bf16 %v2815_v14, %v2814_v5  ;;  %v3041_v0 = vsel %vm2956_vm6, %v2815_v14, 0.0  ;;  %v3105_v60 = vmul.f32 %v2815_v14, %v2815_v14  ;;  %2581 = vmatmul.bf16.gmra.mxu3 %v2445_v43  ;;  %v2932_v43 = vand.u32 15, %v2904_v53 }
 0x230   : > { %v3068_v18 = vadd.f32 %v3067_v40, %v3041_v0 }
 0x231   : > { %4464 = vst [vmem:[%s4743_s5 + $0x20] sm:$0xff] %v4403_v9   ;;  %v3133_v1 = vsel %vm2956_vm6, %v3105_v60, 0.0  ;;  %v1856_v7 = vpop.f32.mrf.mxu1  ;;  %v2763_v24 = vpop.f32.mrf.mxu0  ;;  %vm2960_vm8 = vcmp.lt.s32.totalorder %v2932_v43, 14 }
 0x232   : > { %v3160_v62 = vadd.f32 %v3159_v2, %v3133_v1  ;;  %v2542_v4 = vpop.f32.mrf.mxu3  ;;  %v1910_v36 = vadd.f32 %v1856_v7, %v5287_v13  ;;  %v2148_v56 = vpop.f32.mrf.mxu2 }
 0x233   : > { %v2597_v30 = vadd.f32 %v2542_v4, %v2193_v33 }
 0x234   : > { %v2194_v51 = vadd.f32 %v5478_v22, %v1910_v36 }
 0x235   : > { %v2816_v61 = vadd.f32 %v2761_v38, %v2597_v30 }
 0x237   : > { %v3069_v59 = vadd.f32 %v3068_v18, %v2816_v61  ;;  %v3106_v39 = vmul.f32 %v2816_v61, %v2816_v61 }
 0x239   : > { %v3161_v11 = vadd.f32 %v3160_v62, %v3106_v39  ;;  %v1859_v15 = vpop.f32.mrf.mxu1  ;;  %v2766_v5 = vpop.f32.mrf.mxu0  ;;  %v2906_v39 = vadd.s32 120, %v5375_v29 }
 0x23a   : > { %v2544_v44 = vpop.f32.mrf.mxu3  ;;  %v1911_v40 = vadd.f32 %v1859_v15, %v5291_v55  ;;  %v2150_v37 = vpop.f32.mrf.mxu2 }
 0x23b   : > { %v2598_v41 = vadd.f32 %v2544_v44, %v2194_v51 }
 0x23c   : > { %v2195_v21 = vadd.f32 %v2143_v8, %v1911_v40 }
 0x23d   : > { %v2817_v16 = vadd.f32 %v2763_v24, %v2598_v41  ;;  %v2934_v41 = vand.u32 15, %v2906_v39 }
 0x23f   : > { %v4408_v63 = vpack.c.bf16 %v2817_v16, %v2816_v61  ;;  %v3043_v3 = vsel %vm2958_vm7, %v2817_v16, 0.0  ;;  %v3107_v46 = vmul.f32 %v2817_v16, %v2817_v16  ;;  %vm2962_vm9 = vcmp.lt.s32.totalorder %v2934_v41, 14 }
 0x240   : > { %v3070_v13 = vadd.f32 %v3069_v59, %v3043_v3 }
 0x241   : > { %4465 = vst [vmem:[%s4743_s5 + $0x28] sm:$0xff] %v4408_v63   ;;  %v3135_v57 = vsel %vm2958_vm7, %v3107_v46, 0.0  ;;  %v1861_v22 = vpop.f32.mrf.mxu1  ;;  %v2768_v27 = vpop.f32.mrf.mxu0 }
 0x242   : > { %v3162_v2 = vadd.f32 %v3161_v11, %v3135_v57  ;;  %v2547_v10 = vpop.f32.mrf.mxu3  ;;  %v1912_v20 = vadd.f32 %v1861_v22, %v5298_v58  ;;  %v2153_v0 = vpop.f32.mrf.mxu2 }
 0x243   : > { %v2599_v42 = vadd.f32 %v2547_v10, %v2195_v21 }
 0x244   : > { %v2196_v45 = vadd.f32 %v2145_v34, %v1912_v20  ;;  %v2908_v20 = vadd.s32 136, %v5375_v29 }
 0x245   : > { %v2818_v38 = vadd.f32 %v2766_v5, %v2599_v42 }
 0x247   : > { %v3071_v31 = vadd.f32 %v3070_v13, %v2818_v38  ;;  %v3108_v55 = vmul.f32 %v2818_v38, %v2818_v38 }
 0x249   : > { %v3163_v14 = vadd.f32 %v3162_v2, %v3108_v55  ;;  %v1864_v8 = vpop.f32.mrf.mxu1  ;;  %v2771_v18 = vpop.f32.mrf.mxu0 }
 0x24a   : > { %v2549_v9 = vpop.f32.mrf.mxu3  ;;  %v1913_v33 = vadd.f32 %v1864_v8, %v5301_v47  ;;  %v2155_v50 = vpop.f32.mrf.mxu2 }
 0x24b   : > { %v2600_v60 = vadd.f32 %v2549_v9, %v2196_v45 }
 0x24c   : > { %v2197_v24 = vadd.f32 %v2148_v56, %v1913_v33 }
 0x24d   : > { %v2819_v1 = vadd.f32 %v2768_v27, %v2600_v60 }
 0x24f   : > { %v4413_v62 = vpack.c.bf16 %v2819_v1, %v2818_v38  ;;  %v3045_v4 = vsel %vm2960_vm8, %v2819_v1, 0.0  ;;  %v3109_v30 = vmul.f32 %v2819_v1, %v2819_v1 }
 0x250   : > { %v3072_v7 = vadd.f32 %v3071_v31, %v3045_v4 }
 0x251   : > { %4466 = vst [vmem:[%s4743_s5 + $0x30] sm:$0xff] %v4413_v62   ;;  %v3137_v58 = vsel %vm2960_vm8, %v3109_v30, 0.0  ;;  %v1866_v34 = vpop.f32.mrf.mxu1  ;;  %v2773_v59 = vpop.f32.mrf.mxu0 }
 0x252   : > { %v3164_v25 = vadd.f32 %v3163_v14, %v3137_v58  ;;  %v2552_v61 = vpop.f32.mrf.mxu3  ;;  %v1914_v51 = vadd.f32 %v1866_v34, %v5308_v6  ;;  %v2158_v13 = vpop.f32.mrf.mxu2  ;;  %v2936_v14 = vand.u32 15, %v2908_v20 }
 0x253   : > { %v2601_v36 = vadd.f32 %v2552_v61, %v2197_v24 }
 0x254   : > { %v2198_v5 = vadd.f32 %v2150_v37, %v1914_v51  ;;  %vm2964_vm10 = vcmp.lt.s32.totalorder %v2936_v14, 14 }
 0x255   : > { %v2820_v11 = vadd.f32 %v2771_v18, %v2601_v36 }
 0x257   : > { %v3073_v44 = vadd.f32 %v3072_v7, %v2820_v11  ;;  %v3110_v47 = vmul.f32 %v2820_v11, %v2820_v11 }
 0x259   : > { %v3165_v15 = vadd.f32 %v3164_v25, %v3110_v47  ;;  %v1869_v56 = vpop.f32.mrf.mxu1  ;;  %v2776_v63 = vpop.f32.mrf.mxu0 }
 0x25a   : > { %v2554_v16 = vpop.f32.mrf.mxu3  ;;  %v1915_v46 = vadd.f32 %v1869_v56, %v5311_v28  ;;  %v2160_v45 = vpop.f32.mrf.mxu2 }
 0x25b   : > { %v2602_v40 = vadd.f32 %v2554_v16, %v2198_v5 }
 0x25c   : > { %v2199_v42 = vadd.f32 %v2153_v0, %v1915_v46 }
 0x25d   : > { %v2821_v3 = vadd.f32 %v2773_v59, %v2602_v40 }
 0x25f   : > { %v4418_v57 = vpack.c.bf16 %v2821_v3, %v2820_v11  ;;  %v3047_v21 = vsel %vm2962_vm9, %v2821_v3, 0.0  ;;  %v3111_v2 = vmul.f32 %v2821_v3, %v2821_v3 }
 0x260   : > { %v3074_v10 = vadd.f32 %v3073_v44, %v3047_v21 }
 0x261   : > { %4467 = vst [vmem:[%s4743_s5 + $0x38] sm:$0xff] %v4418_v57   ;;  %v3139_v6 = vsel %vm2962_vm9, %v3111_v2, 0.0  ;;  %v1871_v37 = vpop.f32.mrf.mxu1  ;;  %v2778_v38 = vpop.f32.mrf.mxu0 }
 0x262   : > { %v3166_v22 = vadd.f32 %v3165_v15, %v3139_v6  ;;  %v2557_v27 = vpop.f32.mrf.mxu3  ;;  %v1916_v55 = vadd.f32 %v1871_v37, %v5318_v19  ;;  %v2163_v36 = vpop.f32.mrf.mxu2  ;;  %v2912_v37 = vadd.s32 168, %v5375_v29 }
 0x263   : > { %v2603_v53 = vadd.f32 %v2557_v27, %v2199_v42 }
 0x264   : > { %v2200_v60 = vadd.f32 %v2155_v50, %v1916_v55  ;;  %v2910_v50 = vadd.s32 152, %v5375_v29 }
 0x265   : > { %v2822_v31 = vadd.f32 %v2776_v63, %v2603_v53 }
 0x266   : > { %v2938_v47 = vand.u32 15, %v2910_v50 }
 0x267   : > { %v3075_v43 = vadd.f32 %v3074_v10, %v2822_v31  ;;  %v3112_v28 = vmul.f32 %v2822_v31, %v2822_v31 }
 0x268   : > { %vm2966_vm11 = vcmp.lt.s32.totalorder %v2938_v47, 14 }
 0x269   : > { %v3167_v9 = vadd.f32 %v3166_v22, %v3112_v28  ;;  %v1874_v0 = vpop.f32.mrf.mxu1  ;;  %v2781_v1 = vpop.f32.mrf.mxu0 }
 0x26a   : > { %v2559_v8 = vpop.f32.mrf.mxu3  ;;  %v1917_v62 = vadd.f32 %v1874_v0, %v5321_v52  ;;  %v2165_v63 = vpop.f32.mrf.mxu2 }
 0x26b   : > { %v2604_v18 = vadd.f32 %v2559_v8, %v2200_v60 }
 0x26c   : > { %v2201_v24 = vadd.f32 %v2158_v13, %v1917_v62 }
 0x26d   : > { %v2823_v33 = vadd.f32 %v2778_v38, %v2604_v18 }
 0x26f   : > { %v4423_v4 = vpack.c.bf16 %v2823_v33, %v2822_v31  ;;  %v3049_v30 = vsel %vm2964_vm10, %v2823_v33, 0.0  ;;  %v3113_v7 = vmul.f32 %v2823_v33, %v2823_v33 }
 0x270   : > { %v3076_v58 = vadd.f32 %v3075_v43, %v3049_v30  ;;  %v2940_v43 = vand.u32 15, %v2912_v37 }
 0x271   : > { %4468 = vst [vmem:[%s4743_s5 + $0x40] sm:$0xff] %v4423_v4   ;;  %v3141_v19 = vsel %vm2964_vm10, %v3113_v7, 0.0  ;;  %v1876_v59 = vpop.f32.mrf.mxu1  ;;  %v2783_v39 = vpop.f32.mrf.mxu0 }
 0x272   : > { %v3168_v25 = vadd.f32 %v3167_v9, %v3141_v19  ;;  %v2562_v61 = vpop.f32.mrf.mxu3  ;;  %v1918_v51 = vadd.f32 %v1876_v59, %v5328_v23  ;;  %v2168_v31 = vpop.f32.mrf.mxu2  ;;  %vm2968_vm12 = vcmp.lt.s32.totalorder %v2940_v43, 14 }
 0x273   : > { %v2605_v34 = vadd.f32 %v2562_v61, %v2201_v24 }
 0x274   : > { %v2202_v15 = vadd.f32 %v2160_v45, %v1918_v51 }
 0x275   : > { %v2824_v11 = vadd.f32 %v2781_v1, %v2605_v34 }
 0x277   : > { %v3077_v44 = vadd.f32 %v3076_v58, %v2824_v11  ;;  %v3114_v52 = vmul.f32 %v2824_v11, %v2824_v11 }
 0x279   : > { %v3169_v41 = vadd.f32 %v3168_v25, %v3114_v52  ;;  %v1879_v40 = vpop.f32.mrf.mxu1  ;;  %v2786_v56 = vpop.f32.mrf.mxu0 }
 0x27a   : > { %v2564_v5 = vpop.f32.mrf.mxu3  ;;  %v1919_v46 = vadd.f32 %v1879_v40, %v5331_v26 }
 0x27b   : > { %v2606_v16 = vadd.f32 %v2564_v5, %v2202_v15 }
 0x27c   : > { %v2203_v10 = vadd.f32 %v2163_v36, %v1919_v46  ;;  %v2914_v36 = vadd.s32 184, %v5375_v29 }
 0x27d   : > { %v2825_v3 = vadd.f32 %v2783_v39, %v2606_v16 }
 0x27e   : > { %v2942_v50 = vand.u32 15, %v2914_v36 }
 0x27f   : > { %v4428_v13 = vpack.c.bf16 %v2825_v3, %v2824_v11  ;;  %v3051_v57 = vsel %vm2966_vm11, %v2825_v3, 0.0  ;;  %v3115_v21 = vmul.f32 %v2825_v3, %v2825_v3 }
 0x280   : > { %v3078_v2 = vadd.f32 %v3077_v44, %v3051_v57  ;;  %vm2970_vm13 = vcmp.lt.s32.totalorder %v2942_v50, 14 }
 0x281   : > { %4469 = vst [vmem:[%s4743_s5 + $0x48] sm:$0xff] %v4428_v13   ;;  %v3143_v23 = vsel %vm2966_vm11, %v3115_v21, 0.0  ;;  %v1881_v27 = vpop.f32.mrf.mxu1  ;;  %v2788_v53 = vpop.f32.mrf.mxu0 }
 0x282   : > { %v3170_v6 = vadd.f32 %v3169_v41, %v3143_v23  ;;  %v2567_v42 = vpop.f32.mrf.mxu3  ;;  %v1920_v20 = vadd.f32 %v1881_v27, %v5338_v32  ;;  %v2170_v32 = vpop.f32.mrf.mxu2 }
 0x283   : > { %v2607_v22 = vadd.f32 %v2567_v42, %v2203_v10  ;;  %v2916_v10 = vadd.s32 200, %v5375_v29 }
 0x284   : > { %v2204_v14 = vadd.f32 %v2165_v63, %v1920_v20 }
 0x285   : > { %v2826_v38 = vadd.f32 %v2786_v56, %v2607_v22 }
 0x287   : > { %v3079_v55 = vadd.f32 %v3078_v2, %v2826_v38  ;;  %v3116_v26 = vmul.f32 %v2826_v38, %v2826_v38 }
 0x289   : > { %v3171_v28 = vadd.f32 %v3170_v6, %v3116_v26  ;;  %v1884_v60 = vpop.f32.mrf.mxu1  ;;  %v2791_v8 = vpop.f32.mrf.mxu0 }
 0x28a   : > { %v2569_v45 = vpop.f32.mrf.mxu3  ;;  %v1921_v0 = vadd.f32 %v1884_v60, %v5341_v35  ;;  %v2173_v44 = vpop.f32.mrf.mxu2 }
 0x28b   : > { %v2608_v9 = vadd.f32 %v2569_v45, %v2204_v14 }
 0x28c   : > { %v2205_v7 = vadd.f32 %v2168_v31, %v1921_v0 }
 0x28d   : > { %v2827_v18 = vadd.f32 %v2788_v53, %v2608_v9  ;;  %v2944_v53 = vand.u32 15, %v2916_v10 }
 0x28f   : > { %v4433_v1 = vpack.c.bf16 %v2827_v18, %v2826_v38  ;;  %v3053_v33 = vsel %vm2968_vm12, %v2827_v18, 0.0  ;;  %v3117_v62 = vmul.f32 %v2827_v18, %v2827_v18  ;;  %vm2972_vm14 = vcmp.lt.s32.totalorder %v2944_v53, 14 }
 0x290   : > { %v3080_v4 = vadd.f32 %v3079_v55, %v3053_v33 }
 0x291   : > { %4470 = vst [vmem:[%s4743_s5 + $0x50] sm:$0xff] %v4433_v1   ;;  %v3145_v30 = vsel %vm2968_vm12, %v3117_v62, 0.0  ;;  %v1886_v25 = vpop.f32.mrf.mxu1  ;;  %v2793_v61 = vpop.f32.mrf.mxu0 }
 0x292   : > { %v3172_v58 = vadd.f32 %v3171_v28, %v3145_v30  ;;  %v2572_v19 = vpop.f32.mrf.mxu3  ;;  %v1922_v59 = vadd.f32 %v1886_v25, %v5348_v12  ;;  %v2175_v23 = vpop.f32.mrf.mxu2 }
 0x293   : > { %v2609_v24 = vadd.f32 %v2572_v19, %v2205_v7 }
 0x294   : > { %v2206_v51 = vadd.f32 %v2170_v32, %v1922_v59 }
 0x295   : > { %v2828_v34 = vadd.f32 %v2791_v8, %v2609_v24 }
 0x297   : > { %v3081_v39 = vadd.f32 %v3080_v4, %v2828_v34  ;;  %v3118_v35 = vmul.f32 %v2828_v34, %v2828_v34  ;;  %v2918_v4 = vadd.s32 216, %v5375_v29 }
 0x299   : > { %v3173_v11 = vadd.f32 %v3172_v58, %v3118_v35  ;;  %v1889_v41 = vpop.f32.mrf.mxu1  ;;  %v2796_v16 = vpop.f32.mrf.mxu0  ;;  %v2946_v19 = vand.u32 15, %v2918_v4 }
 0x29a   : > { %v2574_v52 = vpop.f32.mrf.mxu3  ;;  %v1923_v5 = vadd.f32 %v1889_v41, %v5353_v48  ;;  %v2178_v28 = vpop.f32.mrf.mxu2 }
 0x29b   : > { %v2610_v47 = vadd.f32 %v2574_v52, %v2206_v51  ;;  %vm2974_vm15 = vcmp.lt.s32.totalorder %v2946_v19, 14 }
 0x29c   : > { %v2207_v46 = vadd.f32 %v2173_v44, %v1923_v5 }
 0x29d   : > { %v2829_v15 = vadd.f32 %v2793_v61, %v2610_v47 }
 0x29f   : > { %v4438_v40 = vpack.c.bf16 %v2829_v15, %v2828_v34  ;;  %v3055_v56 = vsel %vm2970_vm13, %v2829_v15, 0.0  ;;  %v3119_v63 = vmul.f32 %v2829_v15, %v2829_v15 }
 0x2a0   : > { %v3082_v3 = vadd.f32 %v3081_v39, %v3055_v56  ;;  %v2975_v56 = vld [vmem:[%s5678_s3] sm:$0x1] }
 0x2a1   : > { %4471 = vst [vmem:[%s4743_s5 + $0x58] sm:$0xff] %v4438_v40   ;;  %v3147_v12 = vsel %vm2970_vm13, %v3119_v63, 0.0  ;;  %v1891_v2 = vpop.f32.mrf.mxu1  ;;  %v2798_v27 = vpop.f32.mrf.mxu0 }
 0x2a2   : > { %v3174_v13 = vadd.f32 %v3173_v11, %v3147_v12  ;;  %v2577_v57 = vpop.f32.mrf.mxu3  ;;  %v1924_v42 = vadd.f32 %v1891_v2, %v5360_v17  ;;  %v2180_v58 = vpop.f32.mrf.mxu2  ;;  %v3095_v12 = vld [vmem:[%s5679_s4] sm:$0x1] }
 0x2a3   : > { %v2611_v21 = vadd.f32 %v2577_v57, %v2207_v46 }
 0x2a4   : > { %v2208_v38 = vadd.f32 %v2175_v23, %v1924_v42 }
 0x2a5   : > { %v2830_v6 = vadd.f32 %v2796_v16, %v2611_v21 }
 0x2a7   : > { %v3083_v22 = vadd.f32 %v3082_v3, %v2830_v6  ;;  %v3120_v48 = vmul.f32 %v2830_v6, %v2830_v6 }
 0x2a9   : > { %v3175_v37 = vadd.f32 %v3174_v13, %v3120_v48  ;;  %v1894_v55 = vpop.f32.mrf.mxu1  ;;  %v2801_v0 = vpop.f32.mrf.mxu0 }
 0x2aa   : > { %v2579_v20 = vpop.f32.mrf.mxu3  ;;  %v1925_v43 = vadd.f32 %v1894_v55, %v5365_v49 }
 0x2ab   : > { %v2612_v31 = vadd.f32 %v2579_v20, %v2208_v38 }
 0x2ac   : > { %v2209_v8 = vadd.f32 %v2178_v28, %v1925_v43 }
 0x2ad   : > { %v2831_v26 = vadd.f32 %v2798_v27, %v2612_v31 }
 0x2af   : > { %v4443_v14 = vpack.c.bf16 %v2831_v26, %v2830_v6  ;;  %v3057_v45 = vsel %vm2972_vm14, %v2831_v26, 0.0  ;;  %v3121_v9 = vmul.f32 %v2831_v26, %v2831_v26 }
 0x2b0   : > { %v3084_v60 = vadd.f32 %v3083_v22, %v3057_v45 }
 0x2b1   : > { %4472 = vst [vmem:[%s4743_s5 + $0x60] sm:$0xff] %v4443_v14   ;;  %v3149_v17 = vsel %vm2972_vm14, %v3121_v9, 0.0  ;;  %v1896_v62 = vpop.f32.mrf.mxu1  ;;  %v2803_v34 = vpop.f32.mrf.mxu0 }
 0x2b2   : > { %v3176_v18 = vadd.f32 %v3175_v37, %v3149_v17  ;;  %v2582_v1 = vpop.f32.mrf.mxu3  ;;  %v1926_v30 = vadd.f32 %v1896_v62, %v5373_v54 }
 0x2b3   : > { %v2613_v33 = vadd.f32 %v2582_v1, %v2209_v8 }
 0x2b4   : > { %v2210_v25 = vadd.f32 %v2180_v58, %v1926_v30 }
 0x2b5   : > { %v2832_v32 = vadd.f32 %v2801_v0, %v2613_v33 }
 0x2b7   : > { %v3085_v49 = vadd.f32 %v3084_v60, %v2832_v32  ;;  %v3122_v7 = vmul.f32 %v2832_v32, %v2832_v32 }
 0x2b9   : > { %v3177_v24 = vadd.f32 %v3176_v18, %v3122_v7 }
 0x2ba   : > { %v2584_v61 = vpop.f32.mrf.mxu3 }
 0x2bb   : > { %v2614_v36 = vadd.f32 %v2584_v61, %v2210_v25 }
 0x2bd   : > { %v2833_v59 = vadd.f32 %v2803_v34, %v2614_v36 }
 0x2bf   : > { %v4448_v39 = vpack.c.bf16 %v2833_v59, %v2832_v32  ;;  %v3059_v35 = vsel %vm2974_vm15, %v2833_v59, 0.0  ;;  %v3123_v50 = vmul.f32 %v2833_v59, %v2833_v59 }
 0x2c0   : > { %v3086_v11 = vadd.f32 %v3085_v49, %v3059_v35 }
 0x2c1   : > { %4473 = vst [vmem:[%s4743_s5 + $0x68] sm:$0xff] %v4448_v39   ;;  %v3151_v29 = vsel %vm2974_vm15, %v3123_v50, 0.0 }
 0x2c2   : > { %v3087_v51 = vrot.slane %v3086_v11, 4  ;;  %v3178_v54 = vadd.f32 %v3177_v24, %v3151_v29 }
 0x2c4   : > { %v3088_v44 = vadd.f32 %v3087_v51, %v3086_v11  ;;  %v3179_v52 = vrot.slane %v3178_v54, 4 }
 0x2c6   : > { %v3089_v47 = vrot.slane %v3088_v44, 2  ;;  %v3180_v41 = vadd.f32 %v3179_v52, %v3178_v54 }
 0x2c8   : > { %v3090_v15 = vadd.f32 %v3089_v47, %v3088_v44  ;;  %v3181_v5 = vrot.slane %v3180_v41, 2 }
 0x2ca   : > { %v3091_v16 = vrot.slane %v3090_v15, 1  ;;  %v3182_v40 = vadd.f32 %v3181_v5, %v3180_v41 }
 0x2cc   : > { %v3092_v63 = vadd.f32 %v3091_v16, %v3090_v15  ;;  %v3183_v3 = vrot.slane %v3182_v40, 1 }
 0x2ce   : > { %v3093_v46 = vadd.f32 %v3092_v63, %v2975_v56  ;;  %v3184_v13 = vadd.f32 %v3183_v3, %v3182_v40  ;;  %3193 = sbr.rel (!%p4733_p4) target bundleno = 798 (0x31e), region = 36 }
 0x2d0   : > { %3094 = vst [vmem:[%s5678_s3] sm:$0x1] %v3093_v46  ;;  %v3185_v57 = vadd.f32 %v3184_v13, %v3095_v12 }
 0x2d2   : > { %3186 = vst [vmem:[%s5679_s4] sm:$0x1] %v3185_v57 }
 0x2d3   : > { %s5715_s11 = smov (!%p3196_p9, %s3195_s11), 28 }
 0x2d4   : > { %s4216_s15 = sshll.u32 %s5715_s11, 2 }
 0x2d5   : > { %p4219_p10 = scmp.eq.s32.totalorder %s4216_s15, 0 }
 0x2d6   : > { %4590 = sdivrem.u32 (!%p4219_p10), %s5715_s11, 28 }
 0x2d7   : > { %3204 = sbr.rel (%p4219_p10) target bundleno = 798 (0x31e), region = 40 }
 0x2df   : > { %s5558_s23 = spop.drf %4590 }
 0x2e0   : > { %s4592_s17 = spop.drf %4590  ;;  %p4220_p11 = scmp.le.s32.totalorder %s5558_s23, 0 }
 0x2e1   : > { %s5704_s18 = smov (!%p4220_p11), %s5552_s14  ;;  %s5705_s20 = smov (!%p4220_p11), %s4743_s5 }
 0x2e2   : > { %3481 = sbr.rel (%p4220_p11) target bundleno = 772 (0x304), region = 136  ;;  %s5567_s21 = smov (!%p4220_p11), 0  }
 0x2e3   : > { %s5569_s24 = smov (!%p4220_p11), 0  }
 0x2e7 LB: >> { %v3222_v21 = vld [vmem:[%s4658_s20] sm:$0xf]  ;;  %v3224_v2 = vld [vmem:[%s4658_s20 + $0x4] sm:$0xf]  ;;  %v3226_v23 = vld [vmem:[%s4658_s20 + $0x8] sm:$0xf]  ;;  %s4666_s24 = sphi %s5569_s24, %s3216_s24   ;;  %s4662_s21 = sphi %s5567_s21, %s5708_s21   ;;  %s4658_s20 = sphi %s5705_s20, %s5707_s20   ;;  %s4654_s18 = sphi %s5704_s18, %s5706_s18  }
 0x2e8   : >> { %3223 = vst [vmem:[%s4654_s18] sm:$0xf] %v3222_v21  ;;  %v3228_v10 = vld [vmem:[%s4658_s20 + $0xc] sm:$0xf]  ;;  %v3230_v6 = vld [vmem:[%s4658_s20 + $0x10] sm:$0xf]  ;;  %s3278_s25 = sadd.s32 1, %s4662_s21 }
 0x2e9   : >> { %3225 = vst [vmem:[%s4654_s18 + $0x4] sm:$0xf] %v3224_v2  ;;  %v3232_v42 = vld [vmem:[%s4658_s20 + $0x14] sm:$0xf]  ;;  %v3234_v22 = vld [vmem:[%s4658_s20 + $0x18] sm:$0xf]  ;;  %p3279_p12 = scmp.ge.s32.totalorder %s3278_s25, %s5558_s23 }
 0x2ea   : >> { %3227 = vst [vmem:[%s4654_s18 + $0x8] sm:$0xf] %v3226_v23  ;;  %v3236_v48 = vld [vmem:[%s4658_s20 + $0x1c] sm:$0xf]  ;;  %v3238_v27 = vld [vmem:[%s4658_s20 + $0x20] sm:$0xf] }
 0x2eb   : >> { %3229 = vst [vmem:[%s4654_s18 + $0xc] sm:$0xf] %v3228_v10  ;;  %v3240_v53 = vld [vmem:[%s4658_s20 + $0x24] sm:$0xf]  ;;  %v3242_v37 = vld [vmem:[%s4658_s20 + $0x28] sm:$0xf] }
 0x2ec   : >> { %3231 = vst [vmem:[%s4654_s18 + $0x10] sm:$0xf] %v3230_v6  ;;  %v3244_v38 = vld [vmem:[%s4658_s20 + $0x2c] sm:$0xf]  ;;  %v3246_v20 = vld [vmem:[%s4658_s20 + $0x30] sm:$0xf] }
 0x2ed   : >> { %3233 = vst [vmem:[%s4654_s18 + $0x14] sm:$0xf] %v3232_v42  ;;  %v3248_v31 = vld [vmem:[%s4658_s20 + $0x34] sm:$0xf]  ;;  %v3250_v55 = vld [vmem:[%s4658_s20 + $0x38] sm:$0xf] }
 0x2ee   : >> { %3235 = vst [vmem:[%s4654_s18 + $0x18] sm:$0xf] %v3234_v22  ;;  %v3252_v26 = vld [vmem:[%s4658_s20 + $0x3c] sm:$0xf]  ;;  %s5717_s25 = smov (%p3279_p12, %s3278_s25), 0  ;;  %s3216_s24 = sadd.s32 1, %s4666_s24  }
 0x2ef   : >> { %3237 = vst [vmem:[%s4654_s18 + $0x1c] sm:$0xf] %v3236_v48  ;;  %v3254_v43 = vld [vmem:[%s4658_s20 + $0x40] sm:$0xf]  ;;  %v3256_v28 = vld [vmem:[%s4658_s20 + $0x44] sm:$0xf]  ;;  %p3215_p13 = scmp.ge.s32.totalorder %s3216_s24, %s5558_s23  ;;  %s5708_s21 = smov %s5717_s25 }
 0x2f0   : >> { %3239 = vst [vmem:[%s4654_s18 + $0x20] sm:$0xf] %v3238_v27  ;;  %s3281_s30 = smul.u32 112, %s5717_s25  ;;  %v3258_v14 = vld [vmem:[%s4658_s20 + $0x48] sm:$0xf] }
 0x2f1   : >> { %3241 = vst [vmem:[%s4654_s18 + $0x24] sm:$0xf] %v3240_v53  ;;  %v3260_v45 = vld [vmem:[%s4658_s20 + $0x4c] sm:$0xf]  ;;  %v3262_v9 = vld [vmem:[%s4658_s20 + $0x50] sm:$0xf] }
 0x2f2   : >> { %3243 = vst [vmem:[%s4654_s18 + $0x28] sm:$0xf] %v3242_v37  ;;  %s3283_s26 = scalar_lea.vmem %s4743_s5, %s3281_s30 [#allocation3]   ;;  %s3284_s27 = scalar_lea.vmem %s5552_s14, %s3281_s30   ;;  %v3264_v60 = vld [vmem:[%s4658_s20 + $0x54] sm:$0xf]  ;;  %v3266_v17 = vld [vmem:[%s4658_s20 + $0x58] sm:$0xf] }
 0x2f3   : >> { %3245 = vst [vmem:[%s4654_s18 + $0x2c] sm:$0xf] %v3244_v38  ;;  %v3268_v8 = vld [vmem:[%s4658_s20 + $0x5c] sm:$0xf]  ;;  %v3270_v18 = vld [vmem:[%s4658_s20 + $0x60] sm:$0xf] }
 0x2f4   : >> { %3247 = vst [vmem:[%s4654_s18 + $0x30] sm:$0xf] %v3246_v20  ;;  %v3272_v0 = vld [vmem:[%s4658_s20 + $0x64] sm:$0xf]  ;;  %v3274_v1 = vld [vmem:[%s4658_s20 + $0x68] sm:$0xf] }
 0x2f5   : >> { %3249 = vst [vmem:[%s4654_s18 + $0x34] sm:$0xf] %v3248_v31  ;;  %v3276_v33 = vld [vmem:[%s4658_s20 + $0x6c] sm:$0xf]  ;;  %s5707_s20 = smov %s3283_s26 }
 0x2f6   : >> { %3251 = vst [vmem:[%s4654_s18 + $0x38] sm:$0xf] %v3250_v55 }
 0x2f7   : >> { %3253 = vst [vmem:[%s4654_s18 + $0x3c] sm:$0xf] %v3252_v26 }
 0x2f8   : >> { %3255 = vst [vmem:[%s4654_s18 + $0x40] sm:$0xf] %v3254_v43 }
 0x2f9   : >> { %3257 = vst [vmem:[%s4654_s18 + $0x44] sm:$0xf] %v3256_v28 }
 0x2fa   : >> { %3259 = vst [vmem:[%s4654_s18 + $0x48] sm:$0xf] %v3258_v14 }
 0x2fb   : >> { %3261 = vst [vmem:[%s4654_s18 + $0x4c] sm:$0xf] %v3260_v45 }
 0x2fc   : >> { %3263 = vst [vmem:[%s4654_s18 + $0x50] sm:$0xf] %v3262_v9 }
 0x2fd   : >> { %3265 = vst [vmem:[%s4654_s18 + $0x54] sm:$0xf] %v3264_v60 }
 0x2fe   : >> { %3267 = vst [vmem:[%s4654_s18 + $0x58] sm:$0xf] %v3266_v17 }
 0x2ff   : >> { %3269 = vst [vmem:[%s4654_s18 + $0x5c] sm:$0xf] %v3268_v8  ;;  %3218 = sbr.rel (!%p3215_p13) target bundleno = 743 (0x2e7), region = 142 }
 0x300   : >> { %3271 = vst [vmem:[%s4654_s18 + $0x60] sm:$0xf] %v3270_v18 }
 0x301   : >> { %3273 = vst [vmem:[%s4654_s18 + $0x64] sm:$0xf] %v3272_v0 }
 0x302   : >> { %3275 = vst [vmem:[%s4654_s18 + $0x68] sm:$0xf] %v3274_v1 }
 0x303   : >> { %3277 = vst [vmem:[%s4654_s18 + $0x6c] sm:$0xf] %v3276_v33  ;;  %s5706_s18 = smov %s3284_s27 }
 0x304 PF: > { %4593 = sdivrem.u32 %s5715_s11, 28 }
 0x305   : > { %s4221_s28 = smul.u32 112, %s5558_s23 }
 0x307   : > { %s5660_s29 = scalar_lea.vmem %s4743_s5, %s4221_s28 [#allocation3]   ;;  %s3291_s6 = scalar_lea.vmem %s5552_s14, %s4221_s28  }
 0x30d   : > { %s4594_s7 = spop.drf %4593 }
 0x30e   : > { %s4595_s8 = spop.drf %4593 }
 0x30f   : > { %p4223_p0 = scmp.le.s32.totalorder %s4595_s8, 0 }
 0x310   : > { %s4668_s9 = smov (!%p4223_p0), %s3291_s6   ;;  %s4672_s10 = smov (!%p4223_p0), %s5660_s29  }
 0x311   : > { %3495 = sbr.rel (%p4223_p0) target bundleno = 798 (0x31e), region = 147  ;;  %s4676_s12 = smov (!%p4223_p0), 0  }
 0x312   : > { %s4680_s13 = smov (!%p4223_p0), 0  }
 0x316 LB: >> { %v3301_v62 = vld [vmem:[%s4674_s10] sm:$0xf]  ;;  %s3303_s5 = sadd.s32 1, %s4678_s12  ;;  %s3295_s13 = sadd.s32 1, %s4682_s13   ;;  %s4682_s13 = sphi %s4680_s13, %s3295_s13   ;;  %s4678_s12 = sphi %s4676_s12, %s4677_s12   ;;  %s4674_s10 = sphi %s4672_s10, %s3308_s10   ;;  %s4670_s9 = sphi %s4668_s9, %s3309_s9  }
 0x317   : >> { %3302 = vst [vmem:[%s4670_s9] sm:$0xf] %v3301_v62  ;;  %p3304_p1 = scmp.ge.s32.totalorder %s3303_s5, %s4595_s8  ;;  %p3294_p2 = scmp.ge.s32.totalorder %s3295_s13, %s4595_s8 }
 0x319   : >> { %s5719_s5 = smov (%p3304_p1, %s3303_s5), 0  ;;  %3297 = sbr.rel (!%p3294_p2) target bundleno = 790 (0x316), region = 153 }
 0x31a   : >> { %s4224_s11 = sshll.u32 %s5719_s5, 2  ;;  %s4677_s12 = smov %s5719_s5  }
 0x31b   : >> { %s3308_s10 = scalar_lea.vmem %s5660_s29, %s4224_s11 [#allocation3]   ;;  %s3309_s9 = scalar_lea.vmem %s3291_s6, %s4224_s11  }
 0x31e PF: > { %p12_p3 = scmp.ge.s32.totalorder %s4724_s19, 4   ;;  %s5709_s15 = smov %s4646_s16 }
 0x31f   : > { %s5710_s16 = smov %s4731_s22  ;;  %s5711_s17 = smov %s4724_s19 }
 0x320   :  { %14 = sbr.rel (!%p12_p3) target bundleno = 2 (0x2), region = 164 }

</bundles_post_ra>
